<compile_context>
chip_gen: v6e
topology: v6e:2x2x1
jax: 0.10.0
libtpu: 0.0.40
codegen_flags: <defaults>
</compile_context>

<pallas_src>
import math

import jax
import jax.numpy as jnp
from jax.experimental import pallas as pl
from jax.experimental.pallas import tpu as pltpu  # noqa: F401  (TPU backend module)

# small synthetic config (the real model is 'sentence-transformers/all-mpnet-base-v2')
B = 2             # batch
S = 8             # sequence length
H = 32            # hidden size
NH = 4            # attention heads
HD = H // NH      # head dim
FFN = 4 * H       # FFN inner dim
VOCAB = 100
VOCAB_PAD = 128   # pad vocab to a lane multiple for the one-hot embedding matmul
NLAYERS = 2
NSEQ = 2 * B      # sentence-A batch + sentence-B batch processed together
N = NSEQ * S      # total token rows packed into one activation matrix (32)
NEG_INF = -1e9
LN_EPS = 1e-5
COS_EPS = 1e-4    # torch.nn.CosineSimilarity(dim=1, eps=0.0001)


def _layer_norm(x, g, b, eps=LN_EPS):
    mu = jnp.mean(x, axis=-1, keepdims=True)
    var = jnp.mean((x - mu) ** 2, axis=-1, keepdims=True)
    return (x - mu) * jax.lax.rsqrt(var + eps) * g + b


def _gelu(x):
    # TODO(synk): MPNet uses exact erf-GELU; tanh approximation used here (EUP-friendly).
    c = math.sqrt(2.0 / math.pi)
    return 0.5 * x * (1.0 + jnp.tanh(c * (x + 0.044715 * x * x * x)))


# ---------------------------------------------------------------------------
# Single fused kernel: embeddings -> NLAYERS encoder layers (both sentences
# packed together) -> masked mean pooling -> cosine similarity.
# ---------------------------------------------------------------------------
def bi_model_kernel(ids_ref, mask_key_ref, mask_pool_ref,
                    word_emb_ref, pos_emb_ref, emb_ln_g_ref, emb_ln_b_ref,
                    wqkv_ref, bqkv_ref, wo_ref, bo_ref, ln1g_ref, ln1b_ref,
                    w1_ref, b1_ref, w2_ref, b2_ref, ln2g_ref, ln2b_ref,
                    o_ref):
    # ---- embeddings: in-kernel gather via one-hot matmul on the MXU ----
    ids = ids_ref[...]                                                # (N, 1) int32
    iota_v = jax.lax.broadcasted_iota(jnp.int32, (N, VOCAB_PAD), 1)
    onehot = (ids == iota_v).astype(jnp.float32)                      # (N, VOCAB_PAD)
    x = jnp.dot(onehot, word_emb_ref[...],
                preferred_element_type=jnp.float32)                   # (N, H)
    x = _layer_norm(x + pos_emb_ref[...], emb_ln_g_ref[...], emb_ln_b_ref[...])

    mask_key = mask_key_ref[...]                                      # (NSEQ, 1, S)
    mask_add = (1.0 - mask_key) * NEG_INF                             # key padding bias
    scale = 1.0 / math.sqrt(HD)

    # TODO(synk): MPNet's relative-position attention bias is omitted in this stand-in.
    for l in range(NLAYERS):                                          # static unroll
        # fused QKV projection over all 2*B*S rows at once
        qkv = jnp.dot(x, wqkv_ref[l],
                      preferred_element_type=jnp.float32) + bqkv_ref[l]   # (N, 3H)
        qkv3 = qkv.reshape(NSEQ, S, 3 * H)

        ctx_parts = []
        for h in range(NH):                                           # static unroll
            qh = qkv3[:, :, h * HD:(h + 1) * HD]                      # (NSEQ, S, HD)
            kh = qkv3[:, :, H + h * HD:H + (h + 1) * HD]
            vh = qkv3[:, :, 2 * H + h * HD:2 * H + (h + 1) * HD]
            s = jnp.einsum('bqd,bkd->bqk', qh, kh,
                           preferred_element_type=jnp.float32)        # (NSEQ, S, S)
            s = s * scale + mask_add
            s = s - jnp.max(s, axis=-1, keepdims=True)
            p = jnp.exp(s)
            p = p * pl.reciprocal(jnp.sum(p, axis=-1, keepdims=True), approx=True)
            ctx_parts.append(jnp.einsum('bqk,bkd->bqd', p, vh,
                                        preferred_element_type=jnp.float32))
        ctx = jnp.concatenate(ctx_parts, axis=-1).reshape(N, H)       # (N, H)

        # single fused output projection instead of per-head accumulation
        attn = jnp.dot(ctx, wo_ref[l],
                       preferred_element_type=jnp.float32) + bo_ref[l]
        h1 = _layer_norm(x + attn, ln1g_ref[l], ln1b_ref[l])
        f = _gelu(jnp.dot(h1, w1_ref[l],
                          preferred_element_type=jnp.float32) + b1_ref[l])
        f = jnp.dot(f, w2_ref[l], preferred_element_type=jnp.float32) + b2_ref[l]
        x = _layer_norm(h1 + f, ln2g_ref[l], ln2b_ref[l])

    # ---- masked mean pooling (matches torch mean_pooling: clamp count >= 1e-9) ----
    mask_pool = mask_pool_ref[...]                                    # (NSEQ, S, 1)
    xs = x.reshape(NSEQ, S, H)
    summed = jnp.sum(xs * mask_pool, axis=1)                          # (NSEQ, H)
    counts = jnp.maximum(jnp.sum(mask_pool, axis=1), 1e-9)            # (NSEQ, 1)
    pooled = summed * pl.reciprocal(counts, approx=True)              # (NSEQ, H)

    # ---- cosine similarity between sentence-A pooled and sentence-B pooled ----
    p1 = pooled[0:B]                                                  # (B, H)
    p2 = pooled[B:2 * B]                                              # (B, H)
    dot = jnp.sum(p1 * p2, axis=-1, keepdims=True)                    # (B, 1)
    n1sq = jnp.sum(p1 * p1, axis=-1, keepdims=True)
    n2sq = jnp.sum(p2 * p2, axis=-1, keepdims=True)
    # torch.nn.CosineSimilarity clamps the *product* of norms by eps.
    denom = jnp.sqrt(jnp.maximum(n1sq * n2sq, COS_EPS * COS_EPS))
    cos = dot / denom                                                 # (B, 1)
    o_ref[...] = jnp.broadcast_to(cos, (B, 128))                      # lane-dense store


# ---------------------------------------------------------------------------
# Wrapper: packs per-layer weights (fused QKV, stacked over layers), builds the
# float masks, and launches the single fused pallas_call.
# ---------------------------------------------------------------------------
def pack_params(params):
    layers = params['layers']

    def stk(fn):
        return jnp.stack([fn(lp) for lp in layers], axis=0)

    word_emb = jnp.zeros((VOCAB_PAD, H), jnp.float32).at[:VOCAB].set(params['word_emb'])
    # pre-tile positional embeddings over the packed (2*B) sequences (one-time cost)
    pos_emb_tiled = jnp.tile(params['pos_emb'], (NSEQ, 1))            # (N, H)
    return {
        'word_emb': word_emb,
        'pos_emb': pos_emb_tiled,
        'emb_ln_g': params['emb_ln_g'].reshape(1, H),
        'emb_ln_b': params['emb_ln_b'].reshape(1, H),
        'wqkv': stk(lambda lp: jnp.concatenate([lp['wq'], lp['wk'], lp['wv']], axis=1)),
        'bqkv': stk(lambda lp: jnp.concatenate([lp['bq'], lp['bk'], lp['bv']]).reshape(1, 3 * H)),
        'wo': stk(lambda lp: lp['wo']),
        'bo': stk(lambda lp: lp['bo'].reshape(1, H)),
        'ln1_g': stk(lambda lp: lp['ln1_g'].reshape(1, H)),
        'ln1_b': stk(lambda lp: lp['ln1_b'].reshape(1, H)),
        'w1': stk(lambda lp: lp['w1']),
        'b1': stk(lambda lp: lp['b1'].reshape(1, FFN)),
        'w2': stk(lambda lp: lp['w2']),
        'b2': stk(lambda lp: lp['b2'].reshape(1, H)),
        'ln2_g': stk(lambda lp: lp['ln2_g'].reshape(1, H)),
        'ln2_b': stk(lambda lp: lp['ln2_b'].reshape(1, H)),
    }


def bi_model_forward(packed, input_ids, attention_mask):
    # input_ids / attention_mask: (2, B, S) -- index 0 = sentence A, 1 = sentence B.
    ids_flat = input_ids.reshape(N, 1).astype(jnp.int32)              # rows: [A0,A1,B0,B1]
    mask_f = attention_mask.astype(jnp.float32)
    mask_key = mask_f.reshape(NSEQ, 1, S)                             # key mask for attention
    mask_pool = mask_f.reshape(NSEQ, S, 1)                            # pooling mask

    out = pl.pallas_call(
        bi_model_kernel,
        out_shape=jax.ShapeDtypeStruct((B, 128), jnp.float32),
    )(ids_flat, mask_key, mask_pool,
      packed['word_emb'], packed['pos_emb'], packed['emb_ln_g'], packed['emb_ln_b'],
      packed['wqkv'], packed['bqkv'], packed['wo'], packed['bo'],
      packed['ln1_g'], packed['ln1_b'], packed['w1'], packed['b1'],
      packed['w2'], packed['b2'], packed['ln2_g'], packed['ln2_b'])
    return out[:, 0]                                                  # (B,) cosine sims


# ---------------------------------------------------------------------------
# Deterministic parameter init (synthetic stand-in for the pretrained weights)
# ---------------------------------------------------------------------------
def init_params(key):
    keys = iter(jax.random.split(key, 64))

    def nrm(shape, scale=0.02):
        return (scale * jax.random.normal(next(keys), shape)).astype(jnp.float32)

    params = {
        'word_emb': nrm((VOCAB, H)),
        'pos_emb': nrm((S, H)),
        'emb_ln_g': jnp.ones((H,), jnp.float32),
        'emb_ln_b': jnp.zeros((H,), jnp.float32),
        'layers': [],
    }
    for _ in range(NLAYERS):
        params['layers'].append({
            'wq': nrm((H, H)), 'bq': jnp.zeros((H,), jnp.float32),
            'wk': nrm((H, H)), 'bk': jnp.zeros((H,), jnp.float32),
            'wv': nrm((H, H)), 'bv': jnp.zeros((H,), jnp.float32),
            'wo': nrm((H, H)), 'bo': jnp.zeros((H,), jnp.float32),
            'ln1_g': jnp.ones((H,), jnp.float32), 'ln1_b': jnp.zeros((H,), jnp.float32),
            'w1': nrm((H, FFN)), 'b1': jnp.zeros((FFN,), jnp.float32),
            'w2': nrm((FFN, H)), 'b2': jnp.zeros((H,), jnp.float32),
            'ln2_g': jnp.ones((H,), jnp.float32), 'ln2_b': jnp.zeros((H,), jnp.float32),
        })
    return params


if __name__ == "__main__":
    key = jax.random.PRNGKey(0)
    kp, ki = jax.random.split(key)
    params = init_params(kp)
    packed = pack_params(params)

    # paired inputs: index 0 = sentence A batch, index 1 = sentence B batch
    input_ids = jax.random.randint(ki, (2, B, S), 0, VOCAB, dtype=jnp.int32)
    lengths = jnp.array([[S, S - 2], [S - 1, S]], dtype=jnp.int32)          # (2, B)
    pos = jnp.arange(S, dtype=jnp.int32)[None, None, :]
    attention_mask = (pos < lengths[:, :, None]).astype(jnp.int32)          # (2, B, S)

    fwd = jax.jit(bi_model_forward)
    pred = fwd(packed, input_ids, attention_mask)
    pred = jax.block_until_ready(pred)

    assert pred.shape == (B,) and pred.dtype == jnp.float32
    assert bool(jnp.all(jnp.isfinite(pred)))
    print("KERNEL_OK")
</pallas_src>

<mosaic_0001>
module attributes {stable_mosaic.version = 11 : i64} {
  func.func @bi_model_kernel(%arg0: memref<32x1xi32, #tpu.memory_space<vmem>>, %arg1: memref<4x1x8xf32, #tpu.memory_space<vmem>>, %arg2: memref<4x8x1xf32, #tpu.memory_space<vmem>>, %arg3: memref<128x32xf32, #tpu.memory_space<vmem>>, %arg4: memref<32x32xf32, #tpu.memory_space<vmem>>, %arg5: memref<1x32xf32, #tpu.memory_space<vmem>>, %arg6: memref<1x32xf32, #tpu.memory_space<vmem>>, %arg7: memref<2x32x96xf32, #tpu.memory_space<vmem>>, %arg8: memref<2x1x96xf32, #tpu.memory_space<vmem>>, %arg9: memref<2x32x32xf32, #tpu.memory_space<vmem>>, %arg10: memref<2x1x32xf32, #tpu.memory_space<vmem>>, %arg11: memref<2x1x32xf32, #tpu.memory_space<vmem>>, %arg12: memref<2x1x32xf32, #tpu.memory_space<vmem>>, %arg13: memref<2x32x128xf32, #tpu.memory_space<vmem>>, %arg14: memref<2x1x128xf32, #tpu.memory_space<vmem>>, %arg15: memref<2x128x32xf32, #tpu.memory_space<vmem>>, %arg16: memref<2x1x32xf32, #tpu.memory_space<vmem>>, %arg17: memref<2x1x32xf32, #tpu.memory_space<vmem>>, %arg18: memref<2x1x32xf32, #tpu.memory_space<vmem>>, %arg19: memref<2x128xf32, #tpu.memory_space<vmem>>) attributes {dimension_semantics = [], scalar_prefetch = 0 : i64, scratch_operands = 0 : i64, tpu.core_type = #tpu.core_type<tc>} {
    %c0 = arith.constant 0 : index
    %c0_0 = arith.constant 0 : index
    %0 = vector.load %arg0[%c0, %c0_0] : memref<32x1xi32, #tpu.memory_space<vmem>>, vector<32x1xi32>
    %1 = tpu.iota {dimensions = array<i32: 1>} : vector<32x128xi32>
    %2 = vector.broadcast %0 : vector<32x1xi32> to vector<32x128xi32>
    %3 = arith.cmpi eq, %2, %1 : vector<32x128xi32>
    %4 = arith.extui %3 : vector<32x128xi1> to vector<32x128xi32>
    %5 = arith.sitofp %4 : vector<32x128xi32> to vector<32x128xf32>
    %c0_1 = arith.constant 0 : index
    %c0_2 = arith.constant 0 : index
    %6 = vector.load %arg3[%c0_1, %c0_2] : memref<128x32xf32, #tpu.memory_space<vmem>>, vector<128x32xf32>
    %cst = arith.constant dense<0.000000e+00> : vector<32x32xf32>
    %7 = tpu.matmul %5, %6, %cst {dimension_numbers = #tpu.dot_dimension_numbers<[1], [0], [0], [1], [0, 0, 1, 1], [], []>} : vector<32x128xf32>, vector<128x32xf32>, vector<32x32xf32> -> vector<32x32xf32>
    %c0_3 = arith.constant 0 : index
    %c0_4 = arith.constant 0 : index
    %8 = vector.load %arg4[%c0_3, %c0_4] : memref<32x32xf32, #tpu.memory_space<vmem>>, vector<32x32xf32>
    %9 = arith.addf %7, %8 : vector<32x32xf32>
    %c0_5 = arith.constant 0 : index
    %c0_6 = arith.constant 0 : index
    %10 = vector.load %arg5[%c0_5, %c0_6] : memref<1x32xf32, #tpu.memory_space<vmem>>, vector<1x32xf32>
    %c0_7 = arith.constant 0 : index
    %c0_8 = arith.constant 0 : index
    %11 = vector.load %arg6[%c0_7, %c0_8] : memref<1x32xf32, #tpu.memory_space<vmem>>, vector<1x32xf32>
    %cst_9 = arith.constant dense<0.000000e+00> : vector<32xf32>
    %12 = vector.multi_reduction <add>, %9, %cst_9 [1] : vector<32x32xf32> to vector<32xf32>
    %13 = vector.shape_cast %12 : vector<32xf32> to vector<32x1xf32>
    %cst_10 = arith.constant 3.200000e+01 : f32
    %14 = vector.broadcast %cst_10 : f32 to vector<32x1xf32>
    %15 = arith.divf %13, %14 : vector<32x1xf32>
    %16 = vector.broadcast %15 : vector<32x1xf32> to vector<32x32xf32>
    %17 = arith.subf %9, %16 : vector<32x32xf32>
    %18 = arith.mulf %17, %17 : vector<32x32xf32>
    %cst_11 = arith.constant dense<0.000000e+00> : vector<32xf32>
    %19 = vector.multi_reduction <add>, %18, %cst_11 [1] : vector<32x32xf32> to vector<32xf32>
    %20 = vector.shape_cast %19 : vector<32xf32> to vector<32x1xf32>
    %cst_12 = arith.constant 3.200000e+01 : f32
    %21 = vector.broadcast %cst_12 : f32 to vector<32x1xf32>
    %22 = arith.divf %20, %21 : vector<32x1xf32>
    %23 = vector.broadcast %15 : vector<32x1xf32> to vector<32x32xf32>
    %24 = arith.subf %9, %23 : vector<32x32xf32>
    %cst_13 = arith.constant 9.99999974E-6 : f32
    %25 = vector.broadcast %cst_13 : f32 to vector<32x1xf32>
    %26 = arith.addf %22, %25 : vector<32x1xf32>
    %27 = math.rsqrt %26 : vector<32x1xf32>
    %28 = vector.broadcast %27 : vector<32x1xf32> to vector<32x32xf32>
    %29 = arith.mulf %24, %28 : vector<32x32xf32>
    %30 = vector.broadcast %10 : vector<1x32xf32> to vector<32x32xf32>
    %31 = arith.mulf %29, %30 : vector<32x32xf32>
    %32 = vector.broadcast %11 : vector<1x32xf32> to vector<32x32xf32>
    %33 = arith.addf %31, %32 : vector<32x32xf32>
    %c0_14 = arith.constant 0 : index
    %c0_15 = arith.constant 0 : index
    %c0_16 = arith.constant 0 : index
    %34 = vector.load %arg1[%c0_14, %c0_15, %c0_16] : memref<4x1x8xf32, #tpu.memory_space<vmem>>, vector<4x1x8xf32>
    %cst_17 = arith.constant 1.000000e+00 : f32
    %35 = vector.broadcast %cst_17 : f32 to vector<4x1x8xf32>
    %36 = arith.subf %35, %34 : vector<4x1x8xf32>
    %cst_18 = arith.constant -1.000000e+09 : f32
    %37 = vector.broadcast %cst_18 : f32 to vector<4x1x8xf32>
    %38 = arith.mulf %36, %37 : vector<4x1x8xf32>
    %c0_19 = arith.constant 0 : index
    %c0_20 = arith.constant 0 : index
    %c0_21 = arith.constant 0 : index
    %39 = vector.load %arg7[%c0_19, %c0_20, %c0_21] : memref<2x32x96xf32, #tpu.memory_space<vmem>>, vector<1x32x96xf32>
    %40 = vector.shape_cast %39 : vector<1x32x96xf32> to vector<32x96xf32>
    %cst_22 = arith.constant dense<0.000000e+00> : vector<32x96xf32>
    %41 = tpu.matmul %33, %40, %cst_22 {dimension_numbers = #tpu.dot_dimension_numbers<[1], [0], [0], [1], [0, 0, 1, 1], [], []>} : vector<32x32xf32>, vector<32x96xf32>, vector<32x96xf32> -> vector<32x96xf32>
    %c0_23 = arith.constant 0 : index
    %c0_24 = arith.constant 0 : index
    %c0_25 = arith.constant 0 : index
    %42 = vector.load %arg8[%c0_23, %c0_24, %c0_25] : memref<2x1x96xf32, #tpu.memory_space<vmem>>, vector<1x1x96xf32>
    %43 = vector.shape_cast %42 : vector<1x1x96xf32> to vector<1x96xf32>
    %44 = vector.broadcast %43 : vector<1x96xf32> to vector<32x96xf32>
    %45 = arith.addf %41, %44 : vector<32x96xf32>
    %46 = vector.shape_cast %45 : vector<32x96xf32> to vector<4x8x96xf32>
    %47 = vector.extract_strided_slice %46 {offsets = [0, 0, 0], sizes = [4, 8, 8], strides = [1, 1, 1]} : vector<4x8x96xf32> to vector<4x8x8xf32>
    %48 = vector.extract_strided_slice %46 {offsets = [0, 0, 32], sizes = [4, 8, 8], strides = [1, 1, 1]} : vector<4x8x96xf32> to vector<4x8x8xf32>
    %49 = vector.extract_strided_slice %46 {offsets = [0, 0, 64], sizes = [4, 8, 8], strides = [1, 1, 1]} : vector<4x8x96xf32> to vector<4x8x8xf32>
    "tpu.trace_start"() <{level = 10 : i32, message = "bqd,bkd->bqk"}> : () -> ()
    %cst_26 = arith.constant dense<0.000000e+00> : vector<4x8x8xf32>
    %50 = tpu.matmul %47, %48, %cst_26 {dimension_numbers = #tpu.dot_dimension_numbers<[2], [2], [1], [1], [0, 0, 0, 1, 1, 1], [0], [0]>} : vector<4x8x8xf32>, vector<4x8x8xf32>, vector<4x8x8xf32> -> vector<4x8x8xf32>
    "tpu.trace_stop"() : () -> ()
    %cst_27 = arith.constant 0.353553385 : f32
    %51 = vector.broadcast %cst_27 : f32 to vector<4x8x8xf32>
    %52 = arith.mulf %50, %51 : vector<4x8x8xf32>
    %53 = vector.broadcast %38 : vector<4x1x8xf32> to vector<4x8x8xf32>
    %54 = arith.addf %52, %53 : vector<4x8x8xf32>
    %cst_28 = arith.constant dense<0xFF800000> : vector<4x8xf32>
    %55 = vector.multi_reduction <maximumf>, %54, %cst_28 [2] : vector<4x8x8xf32> to vector<4x8xf32>
    %56 = vector.shape_cast %55 : vector<4x8xf32> to vector<4x8x1xf32>
    %57 = vector.broadcast %56 : vector<4x8x1xf32> to vector<4x8x8xf32>
    %58 = arith.subf %54, %57 : vector<4x8x8xf32>
    %59 = math.exp %58 : vector<4x8x8xf32>
    %cst_29 = arith.constant dense<0.000000e+00> : vector<4x8xf32>
    %60 = vector.multi_reduction <add>, %59, %cst_29 [2] : vector<4x8x8xf32> to vector<4x8xf32>
    %61 = vector.shape_cast %60 : vector<4x8xf32> to vector<4x8x1xf32>
    %62 = tpu.reciprocal %61 {approx = true} : vector<4x8x1xf32> -> vector<4x8x1xf32>
    %63 = vector.broadcast %62 : vector<4x8x1xf32> to vector<4x8x8xf32>
    %64 = arith.mulf %59, %63 : vector<4x8x8xf32>
    "tpu.trace_start"() <{level = 10 : i32, message = "bqk,bkd->bqd"}> : () -> ()
    %cst_30 = arith.constant dense<0.000000e+00> : vector<4x8x8xf32>
    %65 = tpu.matmul %64, %49, %cst_30 {dimension_numbers = #tpu.dot_dimension_numbers<[2], [1], [1], [2], [0, 0, 0, 1, 1, 2], [0], [0]>} : vector<4x8x8xf32>, vector<4x8x8xf32>, vector<4x8x8xf32> -> vector<4x8x8xf32>
    "tpu.trace_stop"() : () -> ()
    %66 = vector.extract_strided_slice %46 {offsets = [0, 0, 8], sizes = [4, 8, 8], strides = [1, 1, 1]} : vector<4x8x96xf32> to vector<4x8x8xf32>
    %67 = vector.extract_strided_slice %46 {offsets = [0, 0, 40], sizes = [4, 8, 8], strides = [1, 1, 1]} : vector<4x8x96xf32> to vector<4x8x8xf32>
    %68 = vector.extract_strided_slice %46 {offsets = [0, 0, 72], sizes = [4, 8, 8], strides = [1, 1, 1]} : vector<4x8x96xf32> to vector<4x8x8xf32>
    "tpu.trace_start"() <{level = 10 : i32, message = "bqd,bkd->bqk"}> : () -> ()
    %cst_31 = arith.constant dense<0.000000e+00> : vector<4x8x8xf32>
    %69 = tpu.matmul %66, %67, %cst_31 {dimension_numbers = #tpu.dot_dimension_numbers<[2], [2], [1], [1], [0, 0, 0, 1, 1, 1], [0], [0]>} : vector<4x8x8xf32>, vector<4x8x8xf32>, vector<4x8x8xf32> -> vector<4x8x8xf32>
    "tpu.trace_stop"() : () -> ()
    %cst_32 = arith.constant 0.353553385 : f32
    %70 = vector.broadcast %cst_32 : f32 to vector<4x8x8xf32>
    %71 = arith.mulf %69, %70 : vector<4x8x8xf32>
    %72 = vector.broadcast %38 : vector<4x1x8xf32> to vector<4x8x8xf32>
    %73 = arith.addf %71, %72 : vector<4x8x8xf32>
    %cst_33 = arith.constant dense<0xFF800000> : vector<4x8xf32>
    %74 = vector.multi_reduction <maximumf>, %73, %cst_33 [2] : vector<4x8x8xf32> to vector<4x8xf32>
    %75 = vector.shape_cast %74 : vector<4x8xf32> to vector<4x8x1xf32>
    %76 = vector.broadcast %75 : vector<4x8x1xf32> to vector<4x8x8xf32>
    %77 = arith.subf %73, %76 : vector<4x8x8xf32>
    %78 = math.exp %77 : vector<4x8x8xf32>
    %cst_34 = arith.constant dense<0.000000e+00> : vector<4x8xf32>
    %79 = vector.multi_reduction <add>, %78, %cst_34 [2] : vector<4x8x8xf32> to vector<4x8xf32>
    %80 = vector.shape_cast %79 : vector<4x8xf32> to vector<4x8x1xf32>
    %81 = tpu.reciprocal %80 {approx = true} : vector<4x8x1xf32> -> vector<4x8x1xf32>
    %82 = vector.broadcast %81 : vector<4x8x1xf32> to vector<4x8x8xf32>
    %83 = arith.mulf %78, %82 : vector<4x8x8xf32>
    "tpu.trace_start"() <{level = 10 : i32, message = "bqk,bkd->bqd"}> : () -> ()
    %cst_35 = arith.constant dense<0.000000e+00> : vector<4x8x8xf32>
    %84 = tpu.matmul %83, %68, %cst_35 {dimension_numbers = #tpu.dot_dimension_numbers<[2], [1], [1], [2], [0, 0, 0, 1, 1, 2], [0], [0]>} : vector<4x8x8xf32>, vector<4x8x8xf32>, vector<4x8x8xf32> -> vector<4x8x8xf32>
    "tpu.trace_stop"() : () -> ()
    %85 = vector.extract_strided_slice %46 {offsets = [0, 0, 16], sizes = [4, 8, 8], strides = [1, 1, 1]} : vector<4x8x96xf32> to vector<4x8x8xf32>
    %86 = vector.extract_strided_slice %46 {offsets = [0, 0, 48], sizes = [4, 8, 8], strides = [1, 1, 1]} : vector<4x8x96xf32> to vector<4x8x8xf32>
    %87 = vector.extract_strided_slice %46 {offsets = [0, 0, 80], sizes = [4, 8, 8], strides = [1, 1, 1]} : vector<4x8x96xf32> to vector<4x8x8xf32>
    "tpu.trace_start"() <{level = 10 : i32, message = "bqd,bkd->bqk"}> : () -> ()
    %cst_36 = arith.constant dense<0.000000e+00> : vector<4x8x8xf32>
    %88 = tpu.matmul %85, %86, %cst_36 {dimension_numbers = #tpu.dot_dimension_numbers<[2], [2], [1], [1], [0, 0, 0, 1, 1, 1], [0], [0]>} : vector<4x8x8xf32>, vector<4x8x8xf32>, vector<4x8x8xf32> -> vector<4x8x8xf32>
    "tpu.trace_stop"() : () -> ()
    %cst_37 = arith.constant 0.353553385 : f32
    %89 = vector.broadcast %cst_37 : f32 to vector<4x8x8xf32>
    %90 = arith.mulf %88, %89 : vector<4x8x8xf32>
    %91 = vector.broadcast %38 : vector<4x1x8xf32> to vector<4x8x8xf32>
    %92 = arith.addf %90, %91 : vector<4x8x8xf32>
    %cst_38 = arith.constant dense<0xFF800000> : vector<4x8xf32>
    %93 = vector.multi_reduction <maximumf>, %92, %cst_38 [2] : vector<4x8x8xf32> to vector<4x8xf32>
    %94 = vector.shape_cast %93 : vector<4x8xf32> to vector<4x8x1xf32>
    %95 = vector.broadcast %94 : vector<4x8x1xf32> to vector<4x8x8xf32>
    %96 = arith.subf %92, %95 : vector<4x8x8xf32>
    %97 = math.exp %96 : vector<4x8x8xf32>
    %cst_39 = arith.constant dense<0.000000e+00> : vector<4x8xf32>
    %98 = vector.multi_reduction <add>, %97, %cst_39 [2] : vector<4x8x8xf32> to vector<4x8xf32>
    %99 = vector.shape_cast %98 : vector<4x8xf32> to vector<4x8x1xf32>
    %100 = tpu.reciprocal %99 {approx = true} : vector<4x8x1xf32> -> vector<4x8x1xf32>
    %101 = vector.broadcast %100 : vector<4x8x1xf32> to vector<4x8x8xf32>
    %102 = arith.mulf %97, %101 : vector<4x8x8xf32>
    "tpu.trace_start"() <{level = 10 : i32, message = "bqk,bkd->bqd"}> : () -> ()
    %cst_40 = arith.constant dense<0.000000e+00> : vector<4x8x8xf32>
    %103 = tpu.matmul %102, %87, %cst_40 {dimension_numbers = #tpu.dot_dimension_numbers<[2], [1], [1], [2], [0, 0, 0, 1, 1, 2], [0], [0]>} : vector<4x8x8xf32>, vector<4x8x8xf32>, vector<4x8x8xf32> -> vector<4x8x8xf32>
    "tpu.trace_stop"() : () -> ()
    %104 = vector.extract_strided_slice %46 {offsets = [0, 0, 24], sizes = [4, 8, 8], strides = [1, 1, 1]} : vector<4x8x96xf32> to vector<4x8x8xf32>
    %105 = vector.extract_strided_slice %46 {offsets = [0, 0, 56], sizes = [4, 8, 8], strides = [1, 1, 1]} : vector<4x8x96xf32> to vector<4x8x8xf32>
    %106 = vector.extract_strided_slice %46 {offsets = [0, 0, 88], sizes = [4, 8, 8], strides = [1, 1, 1]} : vector<4x8x96xf32> to vector<4x8x8xf32>
    "tpu.trace_start"() <{level = 10 : i32, message = "bqd,bkd->bqk"}> : () -> ()
    %cst_41 = arith.constant dense<0.000000e+00> : vector<4x8x8xf32>
    %107 = tpu.matmul %104, %105, %cst_41 {dimension_numbers = #tpu.dot_dimension_numbers<[2], [2], [1], [1], [0, 0, 0, 1, 1, 1], [0], [0]>} : vector<4x8x8xf32>, vector<4x8x8xf32>, vector<4x8x8xf32> -> vector<4x8x8xf32>
    "tpu.trace_stop"() : () -> ()
    %cst_42 = arith.constant 0.353553385 : f32
    %108 = vector.broadcast %cst_42 : f32 to vector<4x8x8xf32>
    %109 = arith.mulf %107, %108 : vector<4x8x8xf32>
    %110 = vector.broadcast %38 : vector<4x1x8xf32> to vector<4x8x8xf32>
    %111 = arith.addf %109, %110 : vector<4x8x8xf32>
    %cst_43 = arith.constant dense<0xFF800000> : vector<4x8xf32>
    %112 = vector.multi_reduction <maximumf>, %111, %cst_43 [2] : vector<4x8x8xf32> to vector<4x8xf32>
    %113 = vector.shape_cast %112 : vector<4x8xf32> to vector<4x8x1xf32>
    %114 = vector.broadcast %113 : vector<4x8x1xf32> to vector<4x8x8xf32>
    %115 = arith.subf %111, %114 : vector<4x8x8xf32>
    %116 = math.exp %115 : vector<4x8x8xf32>
    %cst_44 = arith.constant dense<0.000000e+00> : vector<4x8xf32>
    %117 = vector.multi_reduction <add>, %116, %cst_44 [2] : vector<4x8x8xf32> to vector<4x8xf32>
    %118 = vector.shape_cast %117 : vector<4x8xf32> to vector<4x8x1xf32>
    %119 = tpu.reciprocal %118 {approx = true} : vector<4x8x1xf32> -> vector<4x8x1xf32>
    %120 = vector.broadcast %119 : vector<4x8x1xf32> to vector<4x8x8xf32>
    %121 = arith.mulf %116, %120 : vector<4x8x8xf32>
    "tpu.trace_start"() <{level = 10 : i32, message = "bqk,bkd->bqd"}> : () -> ()
    %cst_45 = arith.constant dense<0.000000e+00> : vector<4x8x8xf32>
    %122 = tpu.matmul %121, %106, %cst_45 {dimension_numbers = #tpu.dot_dimension_numbers<[2], [1], [1], [2], [0, 0, 0, 1, 1, 2], [0], [0]>} : vector<4x8x8xf32>, vector<4x8x8xf32>, vector<4x8x8xf32> -> vector<4x8x8xf32>
    "tpu.trace_stop"() : () -> ()
    %123 = tpu.concatenate %65, %84, %103, %122 in 2 : vector<4x8x8xf32>, vector<4x8x8xf32>, vector<4x8x8xf32>, vector<4x8x8xf32> -> vector<4x8x32xf32>
    %124 = vector.shape_cast %123 : vector<4x8x32xf32> to vector<32x32xf32>
    %c0_46 = arith.constant 0 : index
    %c0_47 = arith.constant 0 : index
    %c0_48 = arith.constant 0 : index
    %125 = vector.load %arg9[%c0_46, %c0_47, %c0_48] : memref<2x32x32xf32, #tpu.memory_space<vmem>>, vector<1x32x32xf32>
    %126 = vector.shape_cast %125 : vector<1x32x32xf32> to vector<32x32xf32>
    %cst_49 = arith.constant dense<0.000000e+00> : vector<32x32xf32>
    %127 = tpu.matmul %124, %126, %cst_49 {dimension_numbers = #tpu.dot_dimension_numbers<[1], [0], [0], [1], [0, 0, 1, 1], [], []>} : vector<32x32xf32>, vector<32x32xf32>, vector<32x32xf32> -> vector<32x32xf32>
    %c0_50 = arith.constant 0 : index
    %c0_51 = arith.constant 0 : index
    %c0_52 = arith.constant 0 : index
    %128 = vector.load %arg10[%c0_50, %c0_51, %c0_52] : memref<2x1x32xf32, #tpu.memory_space<vmem>>, vector<1x1x32xf32>
    %129 = vector.shape_cast %128 : vector<1x1x32xf32> to vector<1x32xf32>
    %130 = vector.broadcast %129 : vector<1x32xf32> to vector<32x32xf32>
    %131 = arith.addf %127, %130 : vector<32x32xf32>
    %132 = arith.addf %33, %131 : vector<32x32xf32>
    %c0_53 = arith.constant 0 : index
    %c0_54 = arith.constant 0 : index
    %c0_55 = arith.constant 0 : index
    %133 = vector.load %arg11[%c0_53, %c0_54, %c0_55] : memref<2x1x32xf32, #tpu.memory_space<vmem>>, vector<1x1x32xf32>
    %134 = vector.shape_cast %133 : vector<1x1x32xf32> to vector<1x32xf32>
    %c0_56 = arith.constant 0 : index
    %c0_57 = arith.constant 0 : index
    %c0_58 = arith.constant 0 : index
    %135 = vector.load %arg12[%c0_56, %c0_57, %c0_58] : memref<2x1x32xf32, #tpu.memory_space<vmem>>, vector<1x1x32xf32>
    %136 = vector.shape_cast %135 : vector<1x1x32xf32> to vector<1x32xf32>
    %cst_59 = arith.constant dense<0.000000e+00> : vector<32xf32>
    %137 = vector.multi_reduction <add>, %132, %cst_59 [1] : vector<32x32xf32> to vector<32xf32>
    %138 = vector.shape_cast %137 : vector<32xf32> to vector<32x1xf32>
    %cst_60 = arith.constant 3.200000e+01 : f32
    %139 = vector.broadcast %cst_60 : f32 to vector<32x1xf32>
    %140 = arith.divf %138, %139 : vector<32x1xf32>
    %141 = vector.broadcast %140 : vector<32x1xf32> to vector<32x32xf32>
    %142 = arith.subf %132, %141 : vector<32x32xf32>
    %143 = arith.mulf %142, %142 : vector<32x32xf32>
    %cst_61 = arith.constant dense<0.000000e+00> : vector<32xf32>
    %144 = vector.multi_reduction <add>, %143, %cst_61 [1] : vector<32x32xf32> to vector<32xf32>
    %145 = vector.shape_cast %144 : vector<32xf32> to vector<32x1xf32>
    %cst_62 = arith.constant 3.200000e+01 : f32
    %146 = vector.broadcast %cst_62 : f32 to vector<32x1xf32>
    %147 = arith.divf %145, %146 : vector<32x1xf32>
    %148 = vector.broadcast %140 : vector<32x1xf32> to vector<32x32xf32>
    %149 = arith.subf %132, %148 : vector<32x32xf32>
    %cst_63 = arith.constant 9.99999974E-6 : f32
    %150 = vector.broadcast %cst_63 : f32 to vector<32x1xf32>
    %151 = arith.addf %147, %150 : vector<32x1xf32>
    %152 = math.rsqrt %151 : vector<32x1xf32>
    %153 = vector.broadcast %152 : vector<32x1xf32> to vector<32x32xf32>
    %154 = arith.mulf %149, %153 : vector<32x32xf32>
    %155 = vector.broadcast %134 : vector<1x32xf32> to vector<32x32xf32>
    %156 = arith.mulf %154, %155 : vector<32x32xf32>
    %157 = vector.broadcast %136 : vector<1x32xf32> to vector<32x32xf32>
    %158 = arith.addf %156, %157 : vector<32x32xf32>
    %c0_64 = arith.constant 0 : index
    %c0_65 = arith.constant 0 : index
    %c0_66 = arith.constant 0 : index
    %159 = vector.load %arg13[%c0_64, %c0_65, %c0_66] : memref<2x32x128xf32, #tpu.memory_space<vmem>>, vector<1x32x128xf32>
    %160 = vector.shape_cast %159 : vector<1x32x128xf32> to vector<32x128xf32>
    %cst_67 = arith.constant dense<0.000000e+00> : vector<32x128xf32>
    %161 = tpu.matmul %158, %160, %cst_67 {dimension_numbers = #tpu.dot_dimension_numbers<[1], [0], [0], [1], [0, 0, 1, 1], [], []>} : vector<32x32xf32>, vector<32x128xf32>, vector<32x128xf32> -> vector<32x128xf32>
    %c0_68 = arith.constant 0 : index
    %c0_69 = arith.constant 0 : index
    %c0_70 = arith.constant 0 : index
    %162 = vector.load %arg14[%c0_68, %c0_69, %c0_70] : memref<2x1x128xf32, #tpu.memory_space<vmem>>, vector<1x1x128xf32>
    %163 = vector.shape_cast %162 : vector<1x1x128xf32> to vector<1x128xf32>
    %164 = vector.broadcast %163 : vector<1x128xf32> to vector<32x128xf32>
    %165 = arith.addf %161, %164 : vector<32x128xf32>
    %cst_71 = arith.constant 5.000000e-01 : f32
    %166 = vector.broadcast %cst_71 : f32 to vector<32x128xf32>
    %167 = arith.mulf %166, %165 : vector<32x128xf32>
    %cst_72 = arith.constant 4.471500e-02 : f32
    %168 = vector.broadcast %cst_72 : f32 to vector<32x128xf32>
    %169 = arith.mulf %168, %165 : vector<32x128xf32>
    %170 = arith.mulf %169, %165 : vector<32x128xf32>
    %171 = arith.mulf %170, %165 : vector<32x128xf32>
    %172 = arith.addf %165, %171 : vector<32x128xf32>
    %cst_73 = arith.constant 0.797884583 : f32
    %173 = vector.broadcast %cst_73 : f32 to vector<32x128xf32>
    %174 = arith.mulf %173, %172 : vector<32x128xf32>
    %175 = math.tanh %174 : vector<32x128xf32>
    %cst_74 = arith.constant 1.000000e+00 : f32
    %176 = vector.broadcast %cst_74 : f32 to vector<32x128xf32>
    %177 = arith.addf %176, %175 : vector<32x128xf32>
    %178 = arith.mulf %167, %177 : vector<32x128xf32>
    %c0_75 = arith.constant 0 : index
    %c0_76 = arith.constant 0 : index
    %c0_77 = arith.constant 0 : index
    %179 = vector.load %arg15[%c0_75, %c0_76, %c0_77] : memref<2x128x32xf32, #tpu.memory_space<vmem>>, vector<1x128x32xf32>
    %180 = vector.shape_cast %179 : vector<1x128x32xf32> to vector<128x32xf32>
    %cst_78 = arith.constant dense<0.000000e+00> : vector<32x32xf32>
    %181 = tpu.matmul %178, %180, %cst_78 {dimension_numbers = #tpu.dot_dimension_numbers<[1], [0], [0], [1], [0, 0, 1, 1], [], []>} : vector<32x128xf32>, vector<128x32xf32>, vector<32x32xf32> -> vector<32x32xf32>
    %c0_79 = arith.constant 0 : index
    %c0_80 = arith.constant 0 : index
    %c0_81 = arith.constant 0 : index
    %182 = vector.load %arg16[%c0_79, %c0_80, %c0_81] : memref<2x1x32xf32, #tpu.memory_space<vmem>>, vector<1x1x32xf32>
    %183 = vector.shape_cast %182 : vector<1x1x32xf32> to vector<1x32xf32>
    %184 = vector.broadcast %183 : vector<1x32xf32> to vector<32x32xf32>
    %185 = arith.addf %181, %184 : vector<32x32xf32>
    %186 = arith.addf %158, %185 : vector<32x32xf32>
    %c0_82 = arith.constant 0 : index
    %c0_83 = arith.constant 0 : index
    %c0_84 = arith.constant 0 : index
    %187 = vector.load %arg17[%c0_82, %c0_83, %c0_84] : memref<2x1x32xf32, #tpu.memory_space<vmem>>, vector<1x1x32xf32>
    %188 = vector.shape_cast %187 : vector<1x1x32xf32> to vector<1x32xf32>
    %c0_85 = arith.constant 0 : index
    %c0_86 = arith.constant 0 : index
    %c0_87 = arith.constant 0 : index
    %189 = vector.load %arg18[%c0_85, %c0_86, %c0_87] : memref<2x1x32xf32, #tpu.memory_space<vmem>>, vector<1x1x32xf32>
    %190 = vector.shape_cast %189 : vector<1x1x32xf32> to vector<1x32xf32>
    %cst_88 = arith.constant dense<0.000000e+00> : vector<32xf32>
    %191 = vector.multi_reduction <add>, %186, %cst_88 [1] : vector<32x32xf32> to vector<32xf32>
    %192 = vector.shape_cast %191 : vector<32xf32> to vector<32x1xf32>
    %cst_89 = arith.constant 3.200000e+01 : f32
    %193 = vector.broadcast %cst_89 : f32 to vector<32x1xf32>
    %194 = arith.divf %192, %193 : vector<32x1xf32>
    %195 = vector.broadcast %194 : vector<32x1xf32> to vector<32x32xf32>
    %196 = arith.subf %186, %195 : vector<32x32xf32>
    %197 = arith.mulf %196, %196 : vector<32x32xf32>
    %cst_90 = arith.constant dense<0.000000e+00> : vector<32xf32>
    %198 = vector.multi_reduction <add>, %197, %cst_90 [1] : vector<32x32xf32> to vector<32xf32>
    %199 = vector.shape_cast %198 : vector<32xf32> to vector<32x1xf32>
    %cst_91 = arith.constant 3.200000e+01 : f32
    %200 = vector.broadcast %cst_91 : f32 to vector<32x1xf32>
    %201 = arith.divf %199, %200 : vector<32x1xf32>
    %202 = vector.broadcast %194 : vector<32x1xf32> to vector<32x32xf32>
    %203 = arith.subf %186, %202 : vector<32x32xf32>
    %cst_92 = arith.constant 9.99999974E-6 : f32
    %204 = vector.broadcast %cst_92 : f32 to vector<32x1xf32>
    %205 = arith.addf %201, %204 : vector<32x1xf32>
    %206 = math.rsqrt %205 : vector<32x1xf32>
    %207 = vector.broadcast %206 : vector<32x1xf32> to vector<32x32xf32>
    %208 = arith.mulf %203, %207 : vector<32x32xf32>
    %209 = vector.broadcast %188 : vector<1x32xf32> to vector<32x32xf32>
    %210 = arith.mulf %208, %209 : vector<32x32xf32>
    %211 = vector.broadcast %190 : vector<1x32xf32> to vector<32x32xf32>
    %212 = arith.addf %210, %211 : vector<32x32xf32>
    %c1 = arith.constant 1 : index
    %c0_93 = arith.constant 0 : index
    %c0_94 = arith.constant 0 : index
    %213 = vector.load %arg7[%c1, %c0_93, %c0_94] : memref<2x32x96xf32, #tpu.memory_space<vmem>>, vector<1x32x96xf32>
    %214 = vector.shape_cast %213 : vector<1x32x96xf32> to vector<32x96xf32>
    %cst_95 = arith.constant dense<0.000000e+00> : vector<32x96xf32>
    %215 = tpu.matmul %212, %214, %cst_95 {dimension_numbers = #tpu.dot_dimension_numbers<[1], [0], [0], [1], [0, 0, 1, 1], [], []>} : vector<32x32xf32>, vector<32x96xf32>, vector<32x96xf32> -> vector<32x96xf32>
    %c1_96 = arith.constant 1 : index
    %c0_97 = arith.constant 0 : index
    %c0_98 = arith.constant 0 : index
    %216 = vector.load %arg8[%c1_96, %c0_97, %c0_98] : memref<2x1x96xf32, #tpu.memory_space<vmem>>, vector<1x1x96xf32>
    %217 = vector.shape_cast %216 : vector<1x1x96xf32> to vector<1x96xf32>
    %218 = vector.broadcast %217 : vector<1x96xf32> to vector<32x96xf32>
    %219 = arith.addf %215, %218 : vector<32x96xf32>
    %220 = vector.shape_cast %219 : vector<32x96xf32> to vector<4x8x96xf32>
    %221 = vector.extract_strided_slice %220 {offsets = [0, 0, 0], sizes = [4, 8, 8], strides = [1, 1, 1]} : vector<4x8x96xf32> to vector<4x8x8xf32>
    %222 = vector.extract_strided_slice %220 {offsets = [0, 0, 32], sizes = [4, 8, 8], strides = [1, 1, 1]} : vector<4x8x96xf32> to vector<4x8x8xf32>
    %223 = vector.extract_strided_slice %220 {offsets = [0, 0, 64], sizes = [4, 8, 8], strides = [1, 1, 1]} : vector<4x8x96xf32> to vector<4x8x8xf32>
    "tpu.trace_start"() <{level = 10 : i32, message = "bqd,bkd->bqk"}> : () -> ()
    %cst_99 = arith.constant dense<0.000000e+00> : vector<4x8x8xf32>
    %224 = tpu.matmul %221, %222, %cst_99 {dimension_numbers = #tpu.dot_dimension_numbers<[2], [2], [1], [1], [0, 0, 0, 1, 1, 1], [0], [0]>} : vector<4x8x8xf32>, vector<4x8x8xf32>, vector<4x8x8xf32> -> vector<4x8x8xf32>
    "tpu.trace_stop"() : () -> ()
    %cst_100 = arith.constant 0.353553385 : f32
    %225 = vector.broadcast %cst_100 : f32 to vector<4x8x8xf32>
    %226 = arith.mulf %224, %225 : vector<4x8x8xf32>
    %227 = vector.broadcast %38 : vector<4x1x8xf32> to vector<4x8x8xf32>
    %228 = arith.addf %226, %227 : vector<4x8x8xf32>
    %cst_101 = arith.constant dense<0xFF800000> : vector<4x8xf32>
    %229 = vector.multi_reduction <maximumf>, %228, %cst_101 [2] : vector<4x8x8xf32> to vector<4x8xf32>
    %230 = vector.shape_cast %229 : vector<4x8xf32> to vector<4x8x1xf32>
    %231 = vector.broadcast %230 : vector<4x8x1xf32> to vector<4x8x8xf32>
    %232 = arith.subf %228, %231 : vector<4x8x8xf32>
    %233 = math.exp %232 : vector<4x8x8xf32>
    %cst_102 = arith.constant dense<0.000000e+00> : vector<4x8xf32>
    %234 = vector.multi_reduction <add>, %233, %cst_102 [2] : vector<4x8x8xf32> to vector<4x8xf32>
    %235 = vector.shape_cast %234 : vector<4x8xf32> to vector<4x8x1xf32>
    %236 = tpu.reciprocal %235 {approx = true} : vector<4x8x1xf32> -> vector<4x8x1xf32>
    %237 = vector.broadcast %236 : vector<4x8x1xf32> to vector<4x8x8xf32>
    %238 = arith.mulf %233, %237 : vector<4x8x8xf32>
    "tpu.trace_start"() <{level = 10 : i32, message = "bqk,bkd->bqd"}> : () -> ()
    %cst_103 = arith.constant dense<0.000000e+00> : vector<4x8x8xf32>
    %239 = tpu.matmul %238, %223, %cst_103 {dimension_numbers = #tpu.dot_dimension_numbers<[2], [1], [1], [2], [0, 0, 0, 1, 1, 2], [0], [0]>} : vector<4x8x8xf32>, vector<4x8x8xf32>, vector<4x8x8xf32> -> vector<4x8x8xf32>
    "tpu.trace_stop"() : () -> ()
    %240 = vector.extract_strided_slice %220 {offsets = [0, 0, 8], sizes = [4, 8, 8], strides = [1, 1, 1]} : vector<4x8x96xf32> to vector<4x8x8xf32>
    %241 = vector.extract_strided_slice %220 {offsets = [0, 0, 40], sizes = [4, 8, 8], strides = [1, 1, 1]} : vector<4x8x96xf32> to vector<4x8x8xf32>
    %242 = vector.extract_strided_slice %220 {offsets = [0, 0, 72], sizes = [4, 8, 8], strides = [1, 1, 1]} : vector<4x8x96xf32> to vector<4x8x8xf32>
    "tpu.trace_start"() <{level = 10 : i32, message = "bqd,bkd->bqk"}> : () -> ()
    %cst_104 = arith.constant dense<0.000000e+00> : vector<4x8x8xf32>
    %243 = tpu.matmul %240, %241, %cst_104 {dimension_numbers = #tpu.dot_dimension_numbers<[2], [2], [1], [1], [0, 0, 0, 1, 1, 1], [0], [0]>} : vector<4x8x8xf32>, vector<4x8x8xf32>, vector<4x8x8xf32> -> vector<4x8x8xf32>
    "tpu.trace_stop"() : () -> ()
    %cst_105 = arith.constant 0.353553385 : f32
    %244 = vector.broadcast %cst_105 : f32 to vector<4x8x8xf32>
    %245 = arith.mulf %243, %244 : vector<4x8x8xf32>
    %246 = vector.broadcast %38 : vector<4x1x8xf32> to vector<4x8x8xf32>
    %247 = arith.addf %245, %246 : vector<4x8x8xf32>
    %cst_106 = arith.constant dense<0xFF800000> : vector<4x8xf32>
    %248 = vector.multi_reduction <maximumf>, %247, %cst_106 [2] : vector<4x8x8xf32> to vector<4x8xf32>
    %249 = vector.shape_cast %248 : vector<4x8xf32> to vector<4x8x1xf32>
    %250 = vector.broadcast %249 : vector<4x8x1xf32> to vector<4x8x8xf32>
    %251 = arith.subf %247, %250 : vector<4x8x8xf32>
    %252 = math.exp %251 : vector<4x8x8xf32>
    %cst_107 = arith.constant dense<0.000000e+00> : vector<4x8xf32>
    %253 = vector.multi_reduction <add>, %252, %cst_107 [2] : vector<4x8x8xf32> to vector<4x8xf32>
    %254 = vector.shape_cast %253 : vector<4x8xf32> to vector<4x8x1xf32>
    %255 = tpu.reciprocal %254 {approx = true} : vector<4x8x1xf32> -> vector<4x8x1xf32>
    %256 = vector.broadcast %255 : vector<4x8x1xf32> to vector<4x8x8xf32>
    %257 = arith.mulf %252, %256 : vector<4x8x8xf32>
    "tpu.trace_start"() <{level = 10 : i32, message = "bqk,bkd->bqd"}> : () -> ()
    %cst_108 = arith.constant dense<0.000000e+00> : vector<4x8x8xf32>
    %258 = tpu.matmul %257, %242, %cst_108 {dimension_numbers = #tpu.dot_dimension_numbers<[2], [1], [1], [2], [0, 0, 0, 1, 1, 2], [0], [0]>} : vector<4x8x8xf32>, vector<4x8x8xf32>, vector<4x8x8xf32> -> vector<4x8x8xf32>
    "tpu.trace_stop"() : () -> ()
    %259 = vector.extract_strided_slice %220 {offsets = [0, 0, 16], sizes = [4, 8, 8], strides = [1, 1, 1]} : vector<4x8x96xf32> to vector<4x8x8xf32>
    %260 = vector.extract_strided_slice %220 {offsets = [0, 0, 48], sizes = [4, 8, 8], strides = [1, 1, 1]} : vector<4x8x96xf32> to vector<4x8x8xf32>
    %261 = vector.extract_strided_slice %220 {offsets = [0, 0, 80], sizes = [4, 8, 8], strides = [1, 1, 1]} : vector<4x8x96xf32> to vector<4x8x8xf32>
    "tpu.trace_start"() <{level = 10 : i32, message = "bqd,bkd->bqk"}> : () -> ()
    %cst_109 = arith.constant dense<0.000000e+00> : vector<4x8x8xf32>
    %262 = tpu.matmul %259, %260, %cst_109 {dimension_numbers = #tpu.dot_dimension_numbers<[2], [2], [1], [1], [0, 0, 0, 1, 1, 1], [0], [0]>} : vector<4x8x8xf32>, vector<4x8x8xf32>, vector<4x8x8xf32> -> vector<4x8x8xf32>
    "tpu.trace_stop"() : () -> ()
    %cst_110 = arith.constant 0.353553385 : f32
    %263 = vector.broadcast %cst_110 : f32 to vector<4x8x8xf32>
    %264 = arith.mulf %262, %263 : vector<4x8x8xf32>
    %265 = vector.broadcast %38 : vector<4x1x8xf32> to vector<4x8x8xf32>
    %266 = arith.addf %264, %265 : vector<4x8x8xf32>
    %cst_111 = arith.constant dense<0xFF800000> : vector<4x8xf32>
    %267 = vector.multi_reduction <maximumf>, %266, %cst_111 [2] : vector<4x8x8xf32> to vector<4x8xf32>
    %268 = vector.shape_cast %267 : vector<4x8xf32> to vector<4x8x1xf32>
    %269 = vector.broadcast %268 : vector<4x8x1xf32> to vector<4x8x8xf32>
    %270 = arith.subf %266, %269 : vector<4x8x8xf32>
    %271 = math.exp %270 : vector<4x8x8xf32>
    %cst_112 = arith.constant dense<0.000000e+00> : vector<4x8xf32>
    %272 = vector.multi_reduction <add>, %271, %cst_112 [2] : vector<4x8x8xf32> to vector<4x8xf32>
    %273 = vector.shape_cast %272 : vector<4x8xf32> to vector<4x8x1xf32>
    %274 = tpu.reciprocal %273 {approx = true} : vector<4x8x1xf32> -> vector<4x8x1xf32>
    %275 = vector.broadcast %274 : vector<4x8x1xf32> to vector<4x8x8xf32>
    %276 = arith.mulf %271, %275 : vector<4x8x8xf32>
    "tpu.trace_start"() <{level = 10 : i32, message = "bqk,bkd->bqd"}> : () -> ()
    %cst_113 = arith.constant dense<0.000000e+00> : vector<4x8x8xf32>
    %277 = tpu.matmul %276, %261, %cst_113 {dimension_numbers = #tpu.dot_dimension_numbers<[2], [1], [1], [2], [0, 0, 0, 1, 1, 2], [0], [0]>} : vector<4x8x8xf32>, vector<4x8x8xf32>, vector<4x8x8xf32> -> vector<4x8x8xf32>
    "tpu.trace_stop"() : () -> ()
    %278 = vector.extract_strided_slice %220 {offsets = [0, 0, 24], sizes = [4, 8, 8], strides = [1, 1, 1]} : vector<4x8x96xf32> to vector<4x8x8xf32>
    %279 = vector.extract_strided_slice %220 {offsets = [0, 0, 56], sizes = [4, 8, 8], strides = [1, 1, 1]} : vector<4x8x96xf32> to vector<4x8x8xf32>
    %280 = vector.extract_strided_slice %220 {offsets = [0, 0, 88], sizes = [4, 8, 8], strides = [1, 1, 1]} : vector<4x8x96xf32> to vector<4x8x8xf32>
    "tpu.trace_start"() <{level = 10 : i32, message = "bqd,bkd->bqk"}> : () -> ()
    %cst_114 = arith.constant dense<0.000000e+00> : vector<4x8x8xf32>
    %281 = tpu.matmul %278, %279, %cst_114 {dimension_numbers = #tpu.dot_dimension_numbers<[2], [2], [1], [1], [0, 0, 0, 1, 1, 1], [0], [0]>} : vector<4x8x8xf32>, vector<4x8x8xf32>, vector<4x8x8xf32> -> vector<4x8x8xf32>
    "tpu.trace_stop"() : () -> ()
    %cst_115 = arith.constant 0.353553385 : f32
    %282 = vector.broadcast %cst_115 : f32 to vector<4x8x8xf32>
    %283 = arith.mulf %281, %282 : vector<4x8x8xf32>
    %284 = vector.broadcast %38 : vector<4x1x8xf32> to vector<4x8x8xf32>
    %285 = arith.addf %283, %284 : vector<4x8x8xf32>
    %cst_116 = arith.constant dense<0xFF800000> : vector<4x8xf32>
    %286 = vector.multi_reduction <maximumf>, %285, %cst_116 [2] : vector<4x8x8xf32> to vector<4x8xf32>
    %287 = vector.shape_cast %286 : vector<4x8xf32> to vector<4x8x1xf32>
    %288 = vector.broadcast %287 : vector<4x8x1xf32> to vector<4x8x8xf32>
    %289 = arith.subf %285, %288 : vector<4x8x8xf32>
    %290 = math.exp %289 : vector<4x8x8xf32>
    %cst_117 = arith.constant dense<0.000000e+00> : vector<4x8xf32>
    %291 = vector.multi_reduction <add>, %290, %cst_117 [2] : vector<4x8x8xf32> to vector<4x8xf32>
    %292 = vector.shape_cast %291 : vector<4x8xf32> to vector<4x8x1xf32>
    %293 = tpu.reciprocal %292 {approx = true} : vector<4x8x1xf32> -> vector<4x8x1xf32>
    %294 = vector.broadcast %293 : vector<4x8x1xf32> to vector<4x8x8xf32>
    %295 = arith.mulf %290, %294 : vector<4x8x8xf32>
    "tpu.trace_start"() <{level = 10 : i32, message = "bqk,bkd->bqd"}> : () -> ()
    %cst_118 = arith.constant dense<0.000000e+00> : vector<4x8x8xf32>
    %296 = tpu.matmul %295, %280, %cst_118 {dimension_numbers = #tpu.dot_dimension_numbers<[2], [1], [1], [2], [0, 0, 0, 1, 1, 2], [0], [0]>} : vector<4x8x8xf32>, vector<4x8x8xf32>, vector<4x8x8xf32> -> vector<4x8x8xf32>
    "tpu.trace_stop"() : () -> ()
    %297 = tpu.concatenate %239, %258, %277, %296 in 2 : vector<4x8x8xf32>, vector<4x8x8xf32>, vector<4x8x8xf32>, vector<4x8x8xf32> -> vector<4x8x32xf32>
    %298 = vector.shape_cast %297 : vector<4x8x32xf32> to vector<32x32xf32>
    %c1_119 = arith.constant 1 : index
    %c0_120 = arith.constant 0 : index
    %c0_121 = arith.constant 0 : index
    %299 = vector.load %arg9[%c1_119, %c0_120, %c0_121] : memref<2x32x32xf32, #tpu.memory_space<vmem>>, vector<1x32x32xf32>
    %300 = vector.shape_cast %299 : vector<1x32x32xf32> to vector<32x32xf32>
    %cst_122 = arith.constant dense<0.000000e+00> : vector<32x32xf32>
    %301 = tpu.matmul %298, %300, %cst_122 {dimension_numbers = #tpu.dot_dimension_numbers<[1], [0], [0], [1], [0, 0, 1, 1], [], []>} : vector<32x32xf32>, vector<32x32xf32>, vector<32x32xf32> -> vector<32x32xf32>
    %c1_123 = arith.constant 1 : index
    %c0_124 = arith.constant 0 : index
    %c0_125 = arith.constant 0 : index
    %302 = vector.load %arg10[%c1_123, %c0_124, %c0_125] : memref<2x1x32xf32, #tpu.memory_space<vmem>>, vector<1x1x32xf32>
    %303 = vector.shape_cast %302 : vector<1x1x32xf32> to vector<1x32xf32>
    %304 = vector.broadcast %303 : vector<1x32xf32> to vector<32x32xf32>
    %305 = arith.addf %301, %304 : vector<32x32xf32>
    %306 = arith.addf %212, %305 : vector<32x32xf32>
    %c1_126 = arith.constant 1 : index
    %c0_127 = arith.constant 0 : index
    %c0_128 = arith.constant 0 : index
    %307 = vector.load %arg11[%c1_126, %c0_127, %c0_128] : memref<2x1x32xf32, #tpu.memory_space<vmem>>, vector<1x1x32xf32>
    %308 = vector.shape_cast %307 : vector<1x1x32xf32> to vector<1x32xf32>
    %c1_129 = arith.constant 1 : index
    %c0_130 = arith.constant 0 : index
    %c0_131 = arith.constant 0 : index
    %309 = vector.load %arg12[%c1_129, %c0_130, %c0_131] : memref<2x1x32xf32, #tpu.memory_space<vmem>>, vector<1x1x32xf32>
    %310 = vector.shape_cast %309 : vector<1x1x32xf32> to vector<1x32xf32>
    %cst_132 = arith.constant dense<0.000000e+00> : vector<32xf32>
    %311 = vector.multi_reduction <add>, %306, %cst_132 [1] : vector<32x32xf32> to vector<32xf32>
    %312 = vector.shape_cast %311 : vector<32xf32> to vector<32x1xf32>
    %cst_133 = arith.constant 3.200000e+01 : f32
    %313 = vector.broadcast %cst_133 : f32 to vector<32x1xf32>
    %314 = arith.divf %312, %313 : vector<32x1xf32>
    %315 = vector.broadcast %314 : vector<32x1xf32> to vector<32x32xf32>
    %316 = arith.subf %306, %315 : vector<32x32xf32>
    %317 = arith.mulf %316, %316 : vector<32x32xf32>
    %cst_134 = arith.constant dense<0.000000e+00> : vector<32xf32>
    %318 = vector.multi_reduction <add>, %317, %cst_134 [1] : vector<32x32xf32> to vector<32xf32>
    %319 = vector.shape_cast %318 : vector<32xf32> to vector<32x1xf32>
    %cst_135 = arith.constant 3.200000e+01 : f32
    %320 = vector.broadcast %cst_135 : f32 to vector<32x1xf32>
    %321 = arith.divf %319, %320 : vector<32x1xf32>
    %322 = vector.broadcast %314 : vector<32x1xf32> to vector<32x32xf32>
    %323 = arith.subf %306, %322 : vector<32x32xf32>
    %cst_136 = arith.constant 9.99999974E-6 : f32
    %324 = vector.broadcast %cst_136 : f32 to vector<32x1xf32>
    %325 = arith.addf %321, %324 : vector<32x1xf32>
    %326 = math.rsqrt %325 : vector<32x1xf32>
    %327 = vector.broadcast %326 : vector<32x1xf32> to vector<32x32xf32>
    %328 = arith.mulf %323, %327 : vector<32x32xf32>
    %329 = vector.broadcast %308 : vector<1x32xf32> to vector<32x32xf32>
    %330 = arith.mulf %328, %329 : vector<32x32xf32>
    %331 = vector.broadcast %310 : vector<1x32xf32> to vector<32x32xf32>
    %332 = arith.addf %330, %331 : vector<32x32xf32>
    %c1_137 = arith.constant 1 : index
    %c0_138 = arith.constant 0 : index
    %c0_139 = arith.constant 0 : index
    %333 = vector.load %arg13[%c1_137, %c0_138, %c0_139] : memref<2x32x128xf32, #tpu.memory_space<vmem>>, vector<1x32x128xf32>
    %334 = vector.shape_cast %333 : vector<1x32x128xf32> to vector<32x128xf32>
    %cst_140 = arith.constant dense<0.000000e+00> : vector<32x128xf32>
    %335 = tpu.matmul %332, %334, %cst_140 {dimension_numbers = #tpu.dot_dimension_numbers<[1], [0], [0], [1], [0, 0, 1, 1], [], []>} : vector<32x32xf32>, vector<32x128xf32>, vector<32x128xf32> -> vector<32x128xf32>
    %c1_141 = arith.constant 1 : index
    %c0_142 = arith.constant 0 : index
    %c0_143 = arith.constant 0 : index
    %336 = vector.load %arg14[%c1_141, %c0_142, %c0_143] : memref<2x1x128xf32, #tpu.memory_space<vmem>>, vector<1x1x128xf32>
    %337 = vector.shape_cast %336 : vector<1x1x128xf32> to vector<1x128xf32>
    %338 = vector.broadcast %337 : vector<1x128xf32> to vector<32x128xf32>
    %339 = arith.addf %335, %338 : vector<32x128xf32>
    %cst_144 = arith.constant 5.000000e-01 : f32
    %340 = vector.broadcast %cst_144 : f32 to vector<32x128xf32>
    %341 = arith.mulf %340, %339 : vector<32x128xf32>
    %cst_145 = arith.constant 4.471500e-02 : f32
    %342 = vector.broadcast %cst_145 : f32 to vector<32x128xf32>
    %343 = arith.mulf %342, %339 : vector<32x128xf32>
    %344 = arith.mulf %343, %339 : vector<32x128xf32>
    %345 = arith.mulf %344, %339 : vector<32x128xf32>
    %346 = arith.addf %339, %345 : vector<32x128xf32>
    %cst_146 = arith.constant 0.797884583 : f32
    %347 = vector.broadcast %cst_146 : f32 to vector<32x128xf32>
    %348 = arith.mulf %347, %346 : vector<32x128xf32>
    %349 = math.tanh %348 : vector<32x128xf32>
    %cst_147 = arith.constant 1.000000e+00 : f32
    %350 = vector.broadcast %cst_147 : f32 to vector<32x128xf32>
    %351 = arith.addf %350, %349 : vector<32x128xf32>
    %352 = arith.mulf %341, %351 : vector<32x128xf32>
    %c1_148 = arith.constant 1 : index
    %c0_149 = arith.constant 0 : index
    %c0_150 = arith.constant 0 : index
    %353 = vector.load %arg15[%c1_148, %c0_149, %c0_150] : memref<2x128x32xf32, #tpu.memory_space<vmem>>, vector<1x128x32xf32>
    %354 = vector.shape_cast %353 : vector<1x128x32xf32> to vector<128x32xf32>
    %cst_151 = arith.constant dense<0.000000e+00> : vector<32x32xf32>
    %355 = tpu.matmul %352, %354, %cst_151 {dimension_numbers = #tpu.dot_dimension_numbers<[1], [0], [0], [1], [0, 0, 1, 1], [], []>} : vector<32x128xf32>, vector<128x32xf32>, vector<32x32xf32> -> vector<32x32xf32>
    %c1_152 = arith.constant 1 : index
    %c0_153 = arith.constant 0 : index
    %c0_154 = arith.constant 0 : index
    %356 = vector.load %arg16[%c1_152, %c0_153, %c0_154] : memref<2x1x32xf32, #tpu.memory_space<vmem>>, vector<1x1x32xf32>
    %357 = vector.shape_cast %356 : vector<1x1x32xf32> to vector<1x32xf32>
    %358 = vector.broadcast %357 : vector<1x32xf32> to vector<32x32xf32>
    %359 = arith.addf %355, %358 : vector<32x32xf32>
    %360 = arith.addf %332, %359 : vector<32x32xf32>
    %c1_155 = arith.constant 1 : index
    %c0_156 = arith.constant 0 : index
    %c0_157 = arith.constant 0 : index
    %361 = vector.load %arg17[%c1_155, %c0_156, %c0_157] : memref<2x1x32xf32, #tpu.memory_space<vmem>>, vector<1x1x32xf32>
    %362 = vector.shape_cast %361 : vector<1x1x32xf32> to vector<1x32xf32>
    %c1_158 = arith.constant 1 : index
    %c0_159 = arith.constant 0 : index
    %c0_160 = arith.constant 0 : index
    %363 = vector.load %arg18[%c1_158, %c0_159, %c0_160] : memref<2x1x32xf32, #tpu.memory_space<vmem>>, vector<1x1x32xf32>
    %364 = vector.shape_cast %363 : vector<1x1x32xf32> to vector<1x32xf32>
    %cst_161 = arith.constant dense<0.000000e+00> : vector<32xf32>
    %365 = vector.multi_reduction <add>, %360, %cst_161 [1] : vector<32x32xf32> to vector<32xf32>
    %366 = vector.shape_cast %365 : vector<32xf32> to vector<32x1xf32>
    %cst_162 = arith.constant 3.200000e+01 : f32
    %367 = vector.broadcast %cst_162 : f32 to vector<32x1xf32>
    %368 = arith.divf %366, %367 : vector<32x1xf32>
    %369 = vector.broadcast %368 : vector<32x1xf32> to vector<32x32xf32>
    %370 = arith.subf %360, %369 : vector<32x32xf32>
    %371 = arith.mulf %370, %370 : vector<32x32xf32>
    %cst_163 = arith.constant dense<0.000000e+00> : vector<32xf32>
    %372 = vector.multi_reduction <add>, %371, %cst_163 [1] : vector<32x32xf32> to vector<32xf32>
    %373 = vector.shape_cast %372 : vector<32xf32> to vector<32x1xf32>
    %cst_164 = arith.constant 3.200000e+01 : f32
    %374 = vector.broadcast %cst_164 : f32 to vector<32x1xf32>
    %375 = arith.divf %373, %374 : vector<32x1xf32>
    %376 = vector.broadcast %368 : vector<32x1xf32> to vector<32x32xf32>
    %377 = arith.subf %360, %376 : vector<32x32xf32>
    %cst_165 = arith.constant 9.99999974E-6 : f32
    %378 = vector.broadcast %cst_165 : f32 to vector<32x1xf32>
    %379 = arith.addf %375, %378 : vector<32x1xf32>
    %380 = math.rsqrt %379 : vector<32x1xf32>
    %381 = vector.broadcast %380 : vector<32x1xf32> to vector<32x32xf32>
    %382 = arith.mulf %377, %381 : vector<32x32xf32>
    %383 = vector.broadcast %362 : vector<1x32xf32> to vector<32x32xf32>
    %384 = arith.mulf %382, %383 : vector<32x32xf32>
    %385 = vector.broadcast %364 : vector<1x32xf32> to vector<32x32xf32>
    %386 = arith.addf %384, %385 : vector<32x32xf32>
    %c0_166 = arith.constant 0 : index
    %c0_167 = arith.constant 0 : index
    %c0_168 = arith.constant 0 : index
    %387 = vector.load %arg2[%c0_166, %c0_167, %c0_168] : memref<4x8x1xf32, #tpu.memory_space<vmem>>, vector<4x8x1xf32>
    %388 = vector.shape_cast %386 : vector<32x32xf32> to vector<4x8x32xf32>
    %389 = vector.broadcast %387 : vector<4x8x1xf32> to vector<4x8x32xf32>
    %390 = arith.mulf %388, %389 : vector<4x8x32xf32>
    %cst_169 = arith.constant dense<0.000000e+00> : vector<4x32xf32>
    %391 = vector.multi_reduction <add>, %390, %cst_169 [1] : vector<4x8x32xf32> to vector<4x32xf32>
    %cst_170 = arith.constant dense<0.000000e+00> : vector<4x1xf32>
    %392 = vector.multi_reduction <add>, %387, %cst_170 [1] : vector<4x8x1xf32> to vector<4x1xf32>
    %cst_171 = arith.constant 9.99999971E-10 : f32
    %393 = vector.broadcast %cst_171 : f32 to vector<4x1xf32>
    %394 = arith.maximumf %392, %393 : vector<4x1xf32>
    %395 = tpu.reciprocal %394 {approx = true} : vector<4x1xf32> -> vector<4x1xf32>
    %396 = vector.broadcast %395 : vector<4x1xf32> to vector<4x32xf32>
    %397 = arith.mulf %391, %396 : vector<4x32xf32>
    %398 = vector.extract_strided_slice %397 {offsets = [0, 0], sizes = [2, 32], strides = [1, 1]} : vector<4x32xf32> to vector<2x32xf32>
    %399 = vector.extract_strided_slice %397 {offsets = [2, 0], sizes = [2, 32], strides = [1, 1]} : vector<4x32xf32> to vector<2x32xf32>
    %400 = arith.mulf %398, %399 : vector<2x32xf32>
    %cst_172 = arith.constant dense<0.000000e+00> : vector<2xf32>
    %401 = vector.multi_reduction <add>, %400, %cst_172 [1] : vector<2x32xf32> to vector<2xf32>
    %402 = vector.shape_cast %401 : vector<2xf32> to vector<2x1xf32>
    %403 = arith.mulf %398, %398 : vector<2x32xf32>
    %cst_173 = arith.constant dense<0.000000e+00> : vector<2xf32>
    %404 = vector.multi_reduction <add>, %403, %cst_173 [1] : vector<2x32xf32> to vector<2xf32>
    %405 = vector.shape_cast %404 : vector<2xf32> to vector<2x1xf32>
    %406 = arith.mulf %399, %399 : vector<2x32xf32>
    %cst_174 = arith.constant dense<0.000000e+00> : vector<2xf32>
    %407 = vector.multi_reduction <add>, %406, %cst_174 [1] : vector<2x32xf32> to vector<2xf32>
    %408 = vector.shape_cast %407 : vector<2xf32> to vector<2x1xf32>
    %409 = arith.mulf %405, %408 : vector<2x1xf32>
    %cst_175 = arith.constant 9.99999993E-9 : f32
    %410 = vector.broadcast %cst_175 : f32 to vector<2x1xf32>
    %411 = arith.maximumf %409, %410 : vector<2x1xf32>
    %412 = math.sqrt %411 : vector<2x1xf32>
    %413 = arith.divf %402, %412 : vector<2x1xf32>
    %414 = vector.shape_cast %413 : vector<2x1xf32> to vector<2x1xf32>
    %415 = vector.broadcast %414 : vector<2x1xf32> to vector<2x128xf32>
    %c0_176 = arith.constant 0 : index
    %c0_177 = arith.constant 0 : index
    %416 = vector.load %arg19[%c0_176, %c0_177] : memref<2x128xf32, #tpu.memory_space<vmem>>, vector<2x128xf32>
    tpu.vector_store %arg19[%c0_176, %c0_177], %415 {strides = array<i32>} : memref<2x128xf32, #tpu.memory_space<vmem>>, vector<2x128xf32>,
    return
  }
}

</mosaic_0001>

<bundles_post_ra>
// kernel: bi_model_forward.1
= control target key start
LH: loop header
LB: loop body
LE: loop exit
PB: predicated region body
PF: predicated region fallthrough
CT: control target
= control target key end

     0   :  { %v8342_v0 = vmov 0   ;;  %v66_v21 = vlaneseq  ;;  %v8343_v25 = vmov 1.0   ;;  %vm199_vm4 = vcmask 261120   ;;  %s8349_s30 = smov 120   ;;  %s8350_s21 = smov 56   ;;  %s9661_s0 = inlined_call_operand.vmem [shape: s32[32,1], index: 0, kind: input, shape index: {}]   ;;  %s9662_s3 = inlined_call_operand.vmem [shape: f32[128,32], index: 3, kind: input, shape index: {}]   ;;  %s9663_s4 = inlined_call_operand.vmem [shape: f32[32,32], index: 4, kind: input, shape index: {}]   ;;  %s9664_s7 = inlined_call_operand.vmem [shape: f32[2,32,96], index: 7, kind: input, shape index: {}]   ;;  %s9665_s5 = inlined_call_operand.vmem [shape: f32[1,32], index: 5, kind: input, shape index: {}]   ;;  %s9666_s6 = inlined_call_operand.vmem [shape: f32[1,32], index: 6, kind: input, shape index: {}]   ;;  %s9667_s8 = inlined_call_operand.vmem [shape: f32[2,1,96], index: 8, kind: input, shape index: {}]   ;;  %s9668_s1 = inlined_call_operand.vmem [shape: f32[4,1,8], index: 1, kind: input, shape index: {}]   ;;  %s9669_s9 = inlined_call_operand.vmem [shape: f32[2,32,32], index: 9, kind: input, shape index: {}]   ;;  %s9670_s10 = inlined_call_operand.vmem [shape: f32[2,1,32], index: 10, kind: input, shape index: {}]   ;;  %s9671_s13 = inlined_call_operand.vmem [shape: f32[2,32,128], index: 13, kind: input, shape index: {}]   ;;  %s9672_s11 = inlined_call_operand.vmem [shape: f32[2,1,32], index: 11, kind: input, shape index: {}]   ;;  %s9673_s12 = inlined_call_operand.vmem [shape: f32[2,1,32], index: 12, kind: input, shape index: {}]   ;;  %s9674_s15 = inlined_call_operand.vmem [shape: f32[2,128,32], index: 15, kind: input, shape index: {}]   ;;  %s9675_s14 = inlined_call_operand.vmem [shape: f32[2,1,128], index: 14, kind: input, shape index: {}]   ;;  %s9676_s16 = inlined_call_operand.vmem [shape: f32[2,1,32], index: 16, kind: input, shape index: {}]   ;;  %s9677_s17 = inlined_call_operand.vmem [shape: f32[2,1,32], index: 17, kind: input, shape index: {}]   ;;  %s9678_s18 = inlined_call_operand.vmem [shape: f32[2,1,32], index: 18, kind: input, shape index: {}]   ;;  %s9679_s2 = inlined_call_operand.vmem [shape: f32[4,8,1], index: 2, kind: input, shape index: {}]   ;;  %s9680_s19 = inlined_call_operand.vmem [shape: f32[2,128], index: 19, kind: output, shape index: {}]  }
   0x1   :  { %9695 = sst [smem:[#allocation2_spill]] %s9661_s0  ;;  %8144 = vset.pattern.permute.xlu0 %v8342_v0  ;;  %8145 = vset.pattern.permute.xlu1 %v8342_v0  ;;  %vm8345_vm5 = vmmov 0   ;;  %vm396_vm6 = vcmask 64512   ;;  %s8352_s22 = smov 112   ;;  %vm3138_vm7 = vcmask 130048   ;;  %vm3143_vm8 = vcmask 195584  }
   0x2   :  { %9696 = sst [smem:[#allocation3_spill]] %s9662_s3  ;;  %v67_v22 = vand.u32 127, %v66_v21  ;;  %s8351_s3 = smov 80   ;;  %vm7084_vm9 = vcmask 7168   ;;  %vm7149_vm10 = vcmask 1041409   ;;  %vm7152_vm11 = vcmask 254976  }
   0x3   :  { %9697 = sst [smem:[#allocation4_spill]] %s9663_s4  ;;  %s9689_s4 = smov 104  }
   0x4   :  { %9698 = sst [smem:[#allocation5_spill]] %s9664_s7  ;;  %s9687_s24 = smov 40  }
   0x5   :  { %s9699_s20 = sld [smem:[#allocation2_spill]]  ;;  %s9685_s25 = smov 8  }
   0x6   :  { %s9700_s23 = sld [smem:[#allocation3_spill]]  ;;  %s8358_s26 = smov 16  }
   0x7   :  { %s9701_s0 = sld [smem:[#allocation4_spill]]  ;;  %s9693_s27 = smov 24  }
   0x8   :  { %s9702_s7 = sld [smem:[#allocation5_spill]] }
   0xb   :  { %v62_v1 = vld [vmem:[%s9699_s20] sm:$0xff]  ;;  %v64_v2 = vld [vmem:[%s9699_s20 + $0x10] sm:$0xff]  ;;  %v63_v5 = vld [vmem:[%s9699_s20 + $0x8] sm:$0xff] }
   0xc   :  { %69 = vperm.xlu0 %8144, %v62_v1   ;;  %75 = vperm.xlu1 %8145, %v64_v2   ;;  %v107_v3 = vld [vmem:[%s9700_s23 + $0x78] sm:$0xff]  ;;  %v106_v4 = vld [vmem:[%s9700_s23 + $0x70] sm:$0xff]  ;;  %v105_v7 = vld [vmem:[%s9700_s23 + $0x68] sm:$0xff] }
   0xd   :  { %v65_v6 = vld [vmem:[%s9699_s20 + $0x18] sm:$0xff]  ;;  %7608 = vmatprep.subr.mxu0 %v107_v3  ;;  %v104_v8 = vld [vmem:[%s9700_s23 + $0x60] sm:$0xff]  ;;  %v102_v10 = vld [vmem:[%s9700_s23 + $0x50] sm:$0xff]  ;;  %s8346_s20 = smov 96  }
   0xe   :  { %7609 = vmatpush3.msra.mxu0 %v107_v3  ;;  %v103_v9 = vld [vmem:[%s9700_s23 + $0x58] sm:$0xff]  ;;  %v101_v11 = vld [vmem:[%s9700_s23 + $0x48] sm:$0xff]  ;;  %v100_v12 = vld [vmem:[%s9700_s23 + $0x40] sm:$0xff] }
   0xf   :  { %7610 = vmatprep.subr.mxu0 %v106_v4  ;;  %v99_v13 = vld [vmem:[%s9700_s23 + $0x38] sm:$0xff]  ;;  %v98_v14 = vld [vmem:[%s9700_s23 + $0x30] sm:$0xff]  ;;  %v97_v15 = vld [vmem:[%s9700_s23 + $0x28] sm:$0xff] }
  0x10   :  { %72 = vperm.xlu0 %8144, %v63_v5   ;;  %78 = vperm.xlu1 %8145, %v65_v6   ;;  %v96_v16 = vld [vmem:[%s9700_s23 + $0x20] sm:$0xff]  ;;  %v95_v17 = vld [vmem:[%s9700_s23 + $0x18] sm:$0xff]  ;;  %v94_v18 = vld [vmem:[%s9700_s23 + $0x10] sm:$0xff] }
  0x11   :  { %7611 = vmatpush3.msra.mxu0 %v106_v4  ;;  %v93_v19 = vld [vmem:[%s9700_s23 + $0x8] sm:$0xff]  ;;  %v92_v20 = vld [vmem:[%s9700_s23] sm:$0xff]  ;;  %v110_v36 = vld [vmem:[%s9701_s0 + $0x10] sm:$0xff] }
  0x12   :  { %7612 = vmatprep.subr.mxu0 %v105_v7  ;;  %v109_v28 = vld [vmem:[%s9701_s0 + $0x8] sm:$0xff]  ;;  %v108_v30 = vld [vmem:[%s9701_s0] sm:$0xff]  ;;  %v111_v38 = vld [vmem:[%s9701_s0 + $0x18] sm:$0xff]  ;;  %s8348_s0 = smov 88  }
  0x13   :  { %7613 = vmatpush3.msra.mxu0 %v105_v7  ;;  %v288_v0 = vld [vmem:[%s9702_s7 + $0x18] sm:$0xff]  ;;  %v287_v1 = vld [vmem:[%s9702_s7 + $0x10] sm:$0xff]  ;;  %v286_v2 = vld [vmem:[%s9702_s7 + $0x8] sm:$0xff] }
  0x14   :  { %7614 = vmatprep.subr.mxu0 %v104_v8  ;;  %7646 = vmatprep.subr.mxu1 %v288_v0  ;;  %v285_v3 = vld [vmem:[%s9702_s7] sm:$0xff] }
  0x15   :  { %7615 = vmatpush3.msra.mxu0 %v104_v8  ;;  %7647 = vmatpush3.msra.mxu1 %v288_v0 }
  0x16   :  { %7616 = vmatprep.subr.mxu0 %v103_v9  ;;  %7648 = vmatprep.subr.mxu1 %v287_v1 }
  0x17   :  { %7617 = vmatpush3.msra.mxu0 %v103_v9  ;;  %7649 = vmatpush3.msra.mxu1 %v287_v1 }
  0x18   :  { %7618 = vmatprep.subr.mxu0 %v102_v10  ;;  %7650 = vmatprep.subr.mxu1 %v286_v2 }
  0x19   :  { %7619 = vmatpush3.msra.mxu0 %v102_v10  ;;  %7651 = vmatpush3.msra.mxu1 %v286_v2 }
  0x1a   :  { %7620 = vmatprep.subr.mxu0 %v101_v11  ;;  %7652 = vmatprep.subr.mxu1 %v285_v3 }
  0x1b   :  { %7621 = vmatpush3.msra.mxu0 %v101_v11  ;;  %7653 = vmatpush3.msra.mxu1 %v285_v3 }
  0x1c   :  { %7622 = vmatprep.subr.mxu0 %v100_v12 }
  0x1d   :  { %7623 = vmatpush3.msra.mxu0 %v100_v12 }
  0x1e   :  { %7624 = vmatprep.subr.mxu0 %v99_v13 }
  0x1f   :  { %7625 = vmatpush3.msra.mxu0 %v99_v13 }
  0x20   :  { %7626 = vmatprep.subr.mxu0 %v98_v14 }
  0x21   :  { %7627 = vmatpush3.msra.mxu0 %v98_v14 }
  0x22   :  { %7628 = vmatprep.subr.mxu0 %v97_v15 }
  0x23   :  { %7629 = vmatpush3.msra.mxu0 %v97_v15 }
  0x24   :  { %7630 = vmatprep.subr.mxu0 %v96_v16 }
  0x25   :  { %7631 = vmatpush3.msra.mxu0 %v96_v16 }
  0x26   :  { %7632 = vmatprep.subr.mxu0 %v95_v17 }
  0x27   :  { %7633 = vmatpush3.msra.mxu0 %v95_v17  ;;  %v7198_v17 = vld [vmem:[%s9665_s5] ss:$0 sm:$0xff]  ;;  %s8353_s5 = smov 48  }
  0x28   :  { %7634 = vmatprep.subr.mxu0 %v94_v18 }
  0x29   :  { %7635 = vmatpush3.msra.mxu0 %v94_v18 }
  0x2a   :  { %7636 = vmatprep.subr.mxu0 %v93_v19 }
  0x2b   :  { %7637 = vmatpush3.msra.mxu0 %v93_v19 }
  0x2c   :  { %7638 = vmatprep.subr.mxu0 %v92_v20 }
  0x2d   :  { %7639 = vmatpush3.msra.mxu0 %v92_v20 }
  0x87   :  { %v70_v23 = vpop.permute.xlu0 %69  ;;  %v76_v24 = vpop.permute.xlu1 %75 }
  0x88   :  { %vm80_vm0 = vcmp.eq.s32.totalorder %v70_v23, %v67_v22  ;;  %vm82_vm1 = vcmp.eq.s32.totalorder %v76_v24, %v67_v22  ;;  %v7199_v23 = vld [vmem:[%s9666_s6] ss:$0 sm:$0xff]  ;;  %s9691_s6 = smov 72  }
  0x89   :  { %7640 = vmatprep.mubr.msk.f32.mxu0 %vm80_vm0, %v8343_v25 }
  0x8b   :  { %v73_v26 = vpop.permute.xlu0 %72  ;;  %v79_v27 = vpop.permute.xlu1 %78 }
  0x8c   :  { %vm81_vm2 = vcmp.eq.s32.totalorder %v73_v26, %v67_v22  ;;  %vm83_vm3 = vcmp.eq.s32.totalorder %v79_v27, %v67_v22 }
  0x8d   :  { %7641 = vmatmul.mubr.msk.f32.vlgmr.msra.gmra.mxu0 %vm81_vm2, %v8343_v25 }
  0x8e   :  { %7643 = vmatprep.mubr.msk.f32.mxu0 %vm82_vm1, %v8343_v25 }
  0x91   :  { %7644 = vmatmul.mubr.msk.f32.gmra.mxu0 %vm83_vm3, %v8343_v25 }
 0x14d   :  { %v7642_v29 = vpop.f32.mrf.mxu0 }
 0x14e   :  { %v184_v31 = vadd.f32 %v7642_v29, %v109_v28 }
 0x14f   :  { %v178_v32 = vpop.f32.mrf.mxu0 }
 0x150   :  { %v179_v33 = vadd.f32 %v178_v32, %v108_v30  ;;  %v203_v34 = vsel %vm199_vm4, %v184_v31, 0.0 }
 0x151   :  { %204 = vadd.xlane.f32.xlu1 %v203_v34  ;;  %v7645_v35 = vpop.f32.mrf.mxu0 }
 0x152   :  { %v200_v37 = vsel %vm199_vm4, %v179_v33, 0.0  ;;  %v194_v41 = vadd.f32 %v7645_v35, %v111_v38  ;;  %v8344_v35 = vmov 0.0  }
 0x153   :  { %v188_v39 = vpop.f32.mrf.mxu0  ;;  %201 = vadd.xlane.f32.xlu0 %v200_v37  ;;  %7660 = vmatprep.subr.mxu1 %v8344_v35 }
 0x154   :  { %v189_v40 = vadd.f32 %v188_v39, %v110_v36  ;;  %v209_v43 = vsel %vm199_vm4, %v194_v41, 0.0  ;;  %7690 = vmatprep.subr.mxu0 %v8344_v35  ;;  %7692 = vmatprep.mubr.msk.f32.mxu0 %vm8345_vm5, %v8344_v35  ;;  %v7200_v36 = vld [vmem:[%s9667_s8] ss:$0 sm:$0xff] }
 0x156   :  { %v206_v42 = vsel %vm199_vm4, %v189_v40, 0.0 }
 0x157   :  { %207 = vadd.xlane.f32.xlu0 %v206_v42 }
 0x15b   :  { %210 = vadd.xlane.f32.xlu0 %v209_v43 }
 0x1da   :  { %v205_v44 = vpop.xlane.xlu1 %204 }
 0x1db   :  { %v214_v45 = vmul.f32 0.03125, %v205_v44 }
 0x1dc   :  { %v202_v46 = vpop.xlane.xlu0 %201 }
 0x1dd   :  { %v218_v47 = vsub.f32 %v184_v31, %v214_v45  ;;  %v213_v48 = vmul.f32 0.03125, %v202_v46 }
 0x1df   :  { %v217_v49 = vsub.f32 %v179_v33, %v213_v48  ;;  %v222_v50 = vmul.f32 %v218_v47, %v218_v47 }
 0x1e0   :  { %v208_v51 = vpop.xlane.xlu0 %207 }
 0x1e1   :  { %v215_v52 = vmul.f32 0.03125, %v208_v51  ;;  %v228_v53 = vsel %vm199_vm4, %v222_v50, 0.0  ;;  %v221_v54 = vmul.f32 %v217_v49, %v217_v49  ;;  %v711_v51 = vshrl.u32 %v66_v21, 7 }
 0x1e2   :  { %229 = vadd.xlane.f32.xlu0 %v228_v53 }
 0x1e3   :  { %v219_v55 = vsub.f32 %v189_v40, %v215_v52  ;;  %v225_v56 = vsel %vm199_vm4, %v221_v54, 0.0  ;;  %v274_v52 = vld [vmem:[%s9668_s1 + $0x1] sm:$0x1] }
 0x1e4   :  { %226 = vadd.xlane.f32.xlu1 %v225_v56  ;;  %v211_v57 = vpop.xlane.xlu0 %210  ;;  %v278_v53 = vsub.f32 1.0, %v274_v52  ;;  %v275_v56 = vld [vmem:[%s9668_s1 + $0x2] sm:$0x1] }
 0x1e5   :  { %v216_v58 = vmul.f32 0.03125, %v211_v57  ;;  %v223_v59 = vmul.f32 %v219_v55, %v219_v55  ;;  %v279_v57 = vsub.f32 1.0, %v275_v56 }
 0x1e7   :  { %v220_v60 = vsub.f32 %v194_v41, %v216_v58  ;;  %v231_v61 = vsel %vm199_vm4, %v223_v59, 0.0  ;;  %v282_v58 = vmul.f32 -1e+09, %v278_v53  ;;  %v283_v0 = vmul.f32 -1e+09, %v279_v57 }
 0x1e8   :  { %232 = vadd.xlane.f32.xlu1 %v231_v61 }
 0x1e9   :  { %v224_v62 = vmul.f32 %v220_v60, %v220_v60 }
 0x1eb   :  { %v234_v63 = vsel %vm199_vm4, %v224_v62, 0.0 }
 0x1ec   :  { %235 = vadd.xlane.f32.xlu0 %v234_v63 }
 0x26b   :  { %v230_v4 = vpop.xlane.xlu0 %229 }
 0x26c   :  { %v238_v5 = vmul.f32 0.03125, %v230_v4 }
 0x26d   :  { %v227_v6 = vpop.xlane.xlu1 %226 }
 0x26e   :  { %v242_v7 = vadd.f32 1e-05, %v238_v5  ;;  %v237_v8 = vmul.f32 0.03125, %v227_v6 }
 0x270   :  { %8146 = vrsqrt.f32 %v242_v7  ;;  %v241_v9 = vadd.f32 1e-05, %v237_v8 }
 0x271   :  { %v233_v10 = vpop.xlane.xlu1 %232 }
 0x272   :  { %8148 = vrsqrt.f32 %v241_v9  ;;  %v239_v11 = vmul.f32 0.03125, %v233_v10 }
 0x274   :  { %v243_v12 = vadd.f32 1e-05, %v239_v11 }
 0x275   :  { %v236_v13 = vpop.xlane.xlu0 %235 }
 0x276   :  { %8150 = vrsqrt.f32 %v243_v12  ;;  %v240_v14 = vmul.f32 0.03125, %v236_v13 }
 0x278   :  { %v244_v15 = vadd.f32 1e-05, %v240_v14 }
 0x27a   :  { %8152 = vrsqrt.f32 %v244_v15 }
 0x27d   :  { %v8147_v16 = vpop.eup %8146 }
 0x27e   :  { %v250_v18 = vmul.f32 %v8147_v16, %v218_v47 }
 0x27f   :  { %v8149_v19 = vpop.eup %8148 }
 0x280   :  { %v249_v20 = vmul.f32 %v8149_v19, %v217_v49  ;;  %v260_v22 = vmul.f32 %v7198_v17, %v250_v18  ;;  %v273_v49 = vld [vmem:[%s9668_s1] sm:$0x1] }
 0x281   :  { %v277_v50 = vsub.f32 1.0, %v273_v49 }
 0x282   :  { %v259_v24 = vmul.f32 %v7198_v17, %v249_v20  ;;  %v8561_v28 = vadd.f32 %v7199_v23, %v260_v22 }
 0x283   :  { %v8151_v25 = vpop.eup %8150  ;;  %v281_v54 = vmul.f32 -1e+09, %v277_v50 }
 0x284   :  { %v8559_v26 = vadd.f32 %v7199_v23, %v259_v24  ;;  %v251_v27 = vmul.f32 %v8151_v25, %v219_v55  ;;  %v712_v55 = vsub.s32 0, %v711_v51 }
 0x286   :  { %7654 = vmatprep.mubr.msk.f32.mxu1 %vm199_vm4, %v8559_v26  ;;  %v261_v29 = vmul.f32 %v7198_v17, %v251_v27  ;;  %v8634_v59 = vrot.slane %v281_v54, %v712_v55  ;;  %v8639_v1 = vrot.slane %v282_v58, %v712_v55  ;;  %v8643_v8 = vrot.slane %v283_v0, %v712_v55 }
 0x287   :  { %v8153_v30 = vpop.eup %8152  ;;  %7655 = vmatmul.mubr.msk.f32.vlgmr.msra.gmra.mxu1 %vm199_vm4, %v8561_v28 }
 0x288   :  { %v8567_v31 = vadd.f32 %v7199_v23, %v261_v29  ;;  %v252_v32 = vmul.f32 %v8153_v30, %v220_v60  ;;  %v276_v60 = vld [vmem:[%s9668_s1 + $0x3] sm:$0x1]  ;;  %s8347_s1 = smov 64  }
 0x289   :  { %v280_v63 = vsub.f32 1.0, %v276_v60 }
 0x28a   :  { %7657 = vmatprep.mubr.msk.f32.mxu1 %vm199_vm4, %v8567_v31  ;;  %v262_v33 = vmul.f32 %v7198_v17, %v252_v32 }
 0x28b   :  { %v284_v7 = vmul.f32 -1e+09, %v280_v63 }
 0x28c   :  { %v8571_v34 = vadd.f32 %v7199_v23, %v262_v33 }
 0x28d   :  { %v8647_v14 = vrot.slane %v284_v7, %v712_v55 }
 0x28e   :  { %7658 = vmatmul.mubr.msk.f32.gmra.mxu1 %vm199_vm4, %v8571_v34 }
 0x28f   :  { %7662 = vmatprep.mubr.msk.f32.mxu1 %vm8345_vm5, %v8344_v35 }
 0x347   :  { %v7656_v37 = vpop.f32.mrf.mxu1 }
 0x348   :  { %v8584_v38 = vadd.f32 %v7656_v37, %v7200_v36 }
 0x349   :  { %v374_v39 = vpop.f32.mrf.mxu1 }
 0x34a   :  { %v8586_v40 = vadd.f32 %v7200_v36, %v374_v39  ;;  %472 = vrot.lane.b32.xlu0 %v8584_v38, %s8346_s20 }
 0x34c   :  { %394 = vrot.lane.b32.xlu1 %v8586_v40, %s8346_s20 }
 0x34e   :  { %v7659_v41 = vpop.f32.mrf.mxu1 }
 0x34f   :  { %v8596_v44 = vadd.f32 %v7659_v41, %v7200_v36 }
 0x350   :  { %v384_v42 = vpop.f32.mrf.mxu1 }
 0x351   :  { %v8592_v43 = vadd.f32 %v7200_v36, %v384_v42 }
 0x353   :  { %549 = vrot.lane.b32.xlu1 %v8592_v43, %s8346_s20 }
 0x357   :  { %626 = vrot.lane.b32.xlu1 %v8596_v44, %s8346_s20 }
 0x3bc   :  { %v473_v46 = vpop.permute.xlu0 %472 }
 0x3be   :  { %v395_v45 = vpop.permute.xlu1 %394 }
 0x3bf   :  { %7661 = vmatpush3.xpose.msk.msra.mxu1 %vm396_vm6, %v395_v45 }
 0x3c0   :  { %7665 = vmatprep.subr.mxu1 %v8344_v35 }
 0x3c2   :  { %7663 = vmatmul.mubr.msk.f32.vlgmr.msra.gmra.mxu1 %vm396_vm6, %v8586_v40 }
 0x3c3   :  { %7666 = vmatpush3.xpose.msk.msra.mxu1 %vm396_vm6, %v473_v46  ;;  %7667 = vmatprep.mubr.msk.f32.mxu1 %vm8345_vm5, %v8344_v35 }
 0x3c4   :  { %7670 = vmatprep.subr.mxu1 %v8344_v35 }
 0x3c5   :  { %v550_v47 = vpop.permute.xlu1 %549 }
 0x3c6   :  { %7668 = vmatmul.mubr.msk.f32.vlgmr.msra.gmra.mxu1 %vm396_vm6, %v8584_v38 }
 0x3c7   :  { %7671 = vmatpush3.xpose.msk.msra.mxu1 %vm396_vm6, %v550_v47  ;;  %7672 = vmatprep.mubr.msk.f32.mxu1 %vm8345_vm5, %v8344_v35 }
 0x3c8   :  { %7675 = vmatprep.subr.mxu1 %v8344_v35 }
 0x3c9   :  { %v627_v48 = vpop.permute.xlu1 %626 }
 0x3ca   :  { %7673 = vmatmul.mubr.msk.f32.vlgmr.msra.gmra.mxu1 %vm396_vm6, %v8592_v43 }
 0x3cb   :  { %7676 = vmatpush3.xpose.msk.msra.mxu1 %vm396_vm6, %v627_v48  ;;  %7677 = vmatprep.mubr.msk.f32.mxu1 %vm8345_vm5, %v8344_v35 }
 0x3cc   :  { %7680 = vmatprep.subr.mxu1 %v8344_v35 }
 0x3ce   :  { %7678 = vmatmul.mubr.msk.f32.vlgmr.msra.gmra.mxu1 %vm396_vm6, %v8596_v44 }
 0x3cf   :  { %7682 = vmatprep.mubr.msk.f32.mxu1 %vm8345_vm5, %v8344_v35 }
 0x482   :  { %v467_v21 = vpop.f32.mrf.mxu1 }
 0x483   :  { %v702_v61 = vmul.f32 0.35355338, %v467_v21 }
 0x484   :  { %v7664_v62 = vpop.f32.mrf.mxu1 }
 0x485   :  { %v730_v2 = vadd.f32 %v8634_v59, %v702_v61 }
 0x486   :  { %v544_v3 = vpop.f32.mrf.mxu1 }
 0x487   :  { %v703_v4 = vmul.f32 0.35355338, %v544_v3  ;;  %v734_v5 = vsel %vm396_vm6, %v730_v2, -inf }
 0x488   :  { %735 = vmax.xlane.f32.xlu0 %v734_v5  ;;  %v7669_v6 = vpop.f32.mrf.mxu1 }
 0x489   :  { %v731_v9 = vadd.f32 %v8639_v1, %v703_v4 }
 0x48a   :  { %v621_v10 = vpop.f32.mrf.mxu1 }
 0x48b   :  { %v704_v11 = vmul.f32 0.35355338, %v621_v10  ;;  %v737_v12 = vsel %vm396_vm6, %v731_v9, -inf }
 0x48c   :  { %738 = vmax.xlane.f32.xlu1 %v737_v12  ;;  %v7674_v13 = vpop.f32.mrf.mxu1 }
 0x48d   :  { %v732_v15 = vadd.f32 %v8643_v8, %v704_v11 }
 0x48e   :  { %v698_v16 = vpop.f32.mrf.mxu1 }
 0x48f   :  { %v705_v17 = vmul.f32 0.35355338, %v698_v16  ;;  %v740_v18 = vsel %vm396_vm6, %v732_v15, -inf }
 0x490   :  { %741 = vmax.xlane.f32.xlu0 %v740_v18  ;;  %v7679_v19 = vpop.f32.mrf.mxu1 }
 0x491   :  { %v733_v20 = vadd.f32 %v8647_v14, %v705_v17 }
 0x493   :  { %v743_v22 = vsel %vm396_vm6, %v733_v20, -inf }
 0x494   :  { %744 = vmax.xlane.f32.xlu0 %v743_v22 }
 0x49d   :  { %778 = vrot.lane.b32.xlu1 %v8586_v40, %s8347_s1 }
 0x4a1   :  { %930 = vrot.lane.b32.xlu1 %v8592_v43, %s8347_s1 }
 0x4a5   :  { %1006 = vrot.lane.b32.xlu1 %v8596_v44, %s8347_s1 }
 0x4a9   :  { %1162 = vrot.lane.b32.xlu1 %v8584_v38, %s8348_s0 }
 0x4aa   :  { %854 = vrot.lane.b32.xlu0 %v8584_v38, %s8347_s1 }
 0x4ad   :  { %1160 = vrot.lane.b32.xlu1 %v8584_v38, %s8349_s30 }
 0x4ae   :  { %1084 = vrot.lane.b32.xlu0 %v8586_v40, %s8348_s0 }
 0x4b2   :  { %1082 = vrot.lane.b32.xlu0 %v8586_v40, %s8349_s30 }
 0x511   :  { %v736_v23 = vpop.xlane.xlu0 %735 }
 0x512   :  { %v746_v24 = vsub.f32 %v730_v2, %v736_v23 }
 0x514   :  { %v750_v25 = vmul.f32 1.442695, %v746_v24 }
 0x515   :  { %v739_v27 = vpop.xlane.xlu1 %738 }
 0x516   :  { %8154 = vpow2.f32 %v750_v25  ;;  %v747_v29 = vsub.f32 %v731_v9, %v739_v27 }
 0x518   :  { %v752_v30 = vmul.f32 1.442695, %v747_v29 }
 0x519   :  { %v779_v32 = vpop.permute.xlu1 %778  ;;  %v742_v33 = vpop.xlane.xlu0 %741 }
 0x51a   :  { %8156 = vpow2.f32 %v752_v30  ;;  %v748_v36 = vsub.f32 %v732_v15, %v742_v33  ;;  %7681 = vmatpush3.msra.mxu1 %v779_v32 }
 0x51b   :  { %7685 = vmatprep.subr.mxu1 %v8344_v35 }
 0x51c   :  { %v754_v37 = vmul.f32 1.442695, %v748_v36 }
 0x51d   :  { %v931_v39 = vpop.permute.xlu1 %930  ;;  %v745_v41 = vpop.xlane.xlu0 %744 }
 0x51e   :  { %8158 = vpow2.f32 %v754_v37  ;;  %v749_v42 = vsub.f32 %v733_v20, %v745_v41  ;;  %7691 = vmatpush3.msra.mxu0 %v931_v39 }
 0x51f   :  { %7700 = vmatprep.subr.mxu0 %v8344_v35 }
 0x520   :  { %v756_v45 = vmul.f32 1.442695, %v749_v42 }
 0x521   :  { %v1007_v54 = vpop.permute.xlu1 %1006  ;;  %v855_v55 = vpop.permute.xlu0 %854 }
 0x522   :  { %8160 = vpow2.f32 %v756_v45 }
 0x523   :  { %v8155_v46 = vpop.eup %8154 }
 0x524   :  { %v758_v47 = vsel %vm396_vm6, %v8155_v46, 0.0 }
 0x525   :  { %759 = vadd.xlane.f32.xlu1 %v758_v47  ;;  %v1163_v56 = vpop.permute.xlu1 %1162  ;;  %v1085_v57 = vpop.permute.xlu0 %1084 }
 0x527   :  { %v8157_v48 = vpop.eup %8156 }
 0x528   :  { %v761_v49 = vsel %vm396_vm6, %v8157_v48, 0.0 }
 0x529   :  { %762 = vadd.xlane.f32.xlu0 %v761_v49  ;;  %v1161_v58 = vpop.permute.xlu1 %1160  ;;  %v1083_v60 = vpop.permute.xlu0 %1082 }
 0x52b   :  { %v8159_v50 = vpop.eup %8158 }
 0x52c   :  { %v764_v51 = vsel %vm396_vm6, %v8159_v50, 0.0 }
 0x52d   :  { %765 = vadd.xlane.f32.xlu1 %v764_v51 }
 0x52f   :  { %v8161_v52 = vpop.eup %8160 }
 0x530   :  { %v767_v53 = vsel %vm396_vm6, %v8161_v52, 0.0 }
 0x531   :  { %768 = vadd.xlane.f32.xlu0 %v767_v53 }
 0x53e   :  { %1318 = vrot.lane.b32.xlu1 %v8596_v44, %s8348_s0 }
 0x542   :  { %1316 = vrot.lane.b32.xlu1 %v8596_v44, %s8349_s30 }
 0x547   :  { %1240 = vrot.lane.b32.xlu0 %v8592_v43, %s8348_s0 }
 0x54b   :  { %1238 = vrot.lane.b32.xlu0 %v8592_v43, %s8349_s30 }
 0x5ae   :  { %v760_v21 = vpop.xlane.xlu1 %759 }
 0x5af   :  { %8162 = vrcp.f32 %v760_v21 }
 0x5b2   :  { %v763_v61 = vpop.xlane.xlu0 %762 }
 0x5b3   :  { %8164 = vrcp.f32 %v763_v61 }
 0x5b6   :  { %v766_v62 = vpop.xlane.xlu1 %765 }
 0x5b7   :  { %8166 = vrcp.f32 %v766_v62 }
 0x5ba   :  { %v769_v63 = vpop.xlane.xlu0 %768  ;;  %v1319_v11 = vpop.permute.xlu1 %1318 }
 0x5bb   :  { %8168 = vrcp.f32 %v769_v63 }
 0x5bc   :  { %v8163_v0 = vpop.eup %8162 }
 0x5bd   :  { %v774_v2 = vmul.f32 %v8163_v0, %v8155_v46 }
 0x5be   :  { %v1241_v9 = vpop.permute.xlu0 %1240  ;;  %v1317_v13 = vpop.permute.xlu1 %1316 }
 0x5bf   :  { %7683 = vmatmul.mubr.msk.f32.vlgmr.msra.gmra.mxu1 %vm396_vm6, %v774_v2 }
 0x5c0   :  { %v8165_v3 = vpop.eup %8164  ;;  %7686 = vmatpush3.msra.mxu1 %v855_v55  ;;  %7687 = vmatprep.mubr.msk.f32.mxu1 %vm8345_vm5, %v8344_v35 }
 0x5c1   :  { %7695 = vmatprep.subr.mxu1 %v8344_v35  ;;  %v775_v4 = vmul.f32 %v8165_v3, %v8157_v48 }
 0x5c2   :  { %v1239_v12 = vpop.permute.xlu0 %1238 }
 0x5c3   :  { %7688 = vmatmul.mubr.msk.f32.vlgmr.msra.gmra.mxu1 %vm396_vm6, %v775_v4 }
 0x5c4   :  { %v8167_v5 = vpop.eup %8166  ;;  %7696 = vmatpush3.msra.mxu1 %v1007_v54  ;;  %7697 = vmatprep.mubr.msk.f32.mxu1 %vm8345_vm5, %v8344_v35 }
 0x5c5   :  { %v776_v6 = vmul.f32 %v8167_v5, %v8159_v50  ;;  %7705 = vmatprep.subr.mxu1 %v8344_v35 }
 0x5c7   :  { %7693 = vmatmul.mubr.msk.f32.vlgmr.msra.gmra.mxu0 %vm396_vm6, %v776_v6 }
 0x5c8   :  { %v8169_v7 = vpop.eup %8168  ;;  %7701 = vmatpush3.xpose.msk.msra.mxu0 %vm396_vm6, %v1085_v57  ;;  %7702 = vmatprep.mubr.msk.f32.mxu0 %vm8345_vm5, %v8344_v35 }
 0x5c9   :  { %7710 = vmatprep.subr.mxu0 %v8344_v35  ;;  %v777_v10 = vmul.f32 %v8169_v7, %v8161_v52 }
 0x5cb   :  { %7698 = vmatmul.mubr.msk.f32.vlgmr.msra.gmra.mxu1 %vm396_vm6, %v777_v10  ;;  %7703 = vmatmul.mubr.msk.f32.vlgmr.msra.gmra.mxu0 %vm396_vm6, %v1083_v60 }
 0x5cc   :  { %7706 = vmatpush3.xpose.msk.msra.mxu1 %vm396_vm6, %v1163_v56  ;;  %7711 = vmatpush3.xpose.msk.msra.mxu0 %vm396_vm6, %v1241_v9 }
 0x5cd   :  { %7707 = vmatprep.mubr.msk.f32.mxu1 %vm8345_vm5, %v8344_v35  ;;  %7712 = vmatprep.mubr.msk.f32.mxu0 %vm8345_vm5, %v8344_v35 }
 0x5ce   :  { %7715 = vmatprep.subr.mxu1 %v8344_v35  ;;  %7720 = vmatprep.subr.mxu0 %v8344_v35 }
 0x5cf   :  { %7708 = vmatmul.mubr.msk.f32.vlgmr.msra.gmra.mxu1 %vm396_vm6, %v1161_v58  ;;  %7713 = vmatmul.mubr.msk.f32.vlgmr.msra.gmra.mxu0 %vm396_vm6, %v1239_v12 }
 0x5d0   :  { %7716 = vmatpush3.xpose.msk.msra.mxu1 %vm396_vm6, %v1319_v11  ;;  %7717 = vmatprep.mubr.msk.f32.mxu1 %vm8345_vm5, %v8344_v35 }
 0x5d1   :  { %7725 = vmatprep.subr.mxu1 %v8344_v35  ;;  %7722 = vmatprep.mubr.msk.f32.mxu0 %vm8345_vm5, %v8344_v35 }
 0x5d3   :  { %7718 = vmatmul.mubr.msk.f32.vlgmr.msra.gmra.mxu1 %vm396_vm6, %v1317_v13 }
 0x5d4   :  { %7727 = vmatprep.mubr.msk.f32.mxu1 %vm8345_vm5, %v8344_v35 }
 0x67f   :  { %v8717_v15 = vpop.f32.mrf.mxu1 }
 0x681   :  { %v7684_v16 = vpop.f32.mrf.mxu1 }
 0x683   :  { %v8719_v17 = vpop.f32.mrf.mxu1 }
 0x685   :  { %v7689_v18 = vpop.f32.mrf.mxu1 }
 0x687   :  { %v8721_v19 = vpop.f32.mrf.mxu0 }
 0x689   :  { %v7694_v20 = vpop.f32.mrf.mxu0 }
 0x68b   :  { %v8723_v22 = vpop.f32.mrf.mxu1  ;;  %v1156_v23 = vpop.f32.mrf.mxu0 }
 0x68c   :  { %v1394_v24 = vmul.f32 0.35355338, %v1156_v23 }
 0x68d   :  { %v7699_v25 = vpop.f32.mrf.mxu1  ;;  %v7704_v27 = vpop.f32.mrf.mxu0 }
 0x68e   :  { %v1398_v29 = vadd.f32 %v1394_v24, %v8634_v59 }
 0x68f   :  { %v1234_v30 = vpop.f32.mrf.mxu1  ;;  %v1312_v32 = vpop.f32.mrf.mxu0 }
 0x690   :  { %v1395_v33 = vmul.f32 0.35355338, %v1234_v30  ;;  %v1396_v36 = vmul.f32 0.35355338, %v1312_v32  ;;  %v1402_v37 = vsel %vm396_vm6, %v1398_v29, -inf }
 0x691   :  { %1403 = vmax.xlane.f32.xlu0 %v1402_v37  ;;  %v7709_v39 = vpop.f32.mrf.mxu1  ;;  %v7714_v41 = vpop.f32.mrf.mxu0 }
 0x692   :  { %v1399_v42 = vadd.f32 %v1395_v33, %v8639_v1  ;;  %v1400_v45 = vadd.f32 %v1396_v36, %v8643_v8 }
 0x693   :  { %v1390_v46 = vpop.f32.mrf.mxu1 }
 0x694   :  { %v1397_v47 = vmul.f32 0.35355338, %v1390_v46  ;;  %v1405_v48 = vsel %vm396_vm6, %v1399_v42, -inf  ;;  %v1408_v49 = vsel %vm396_vm6, %v1400_v45, -inf }
 0x695   :  { %1406 = vmax.xlane.f32.xlu1 %v1405_v48  ;;  %v7719_v50 = vpop.f32.mrf.mxu1  ;;  %1409 = vmax.xlane.f32.xlu0 %v1408_v49 }
 0x696   :  { %v1401_v51 = vadd.f32 %v1397_v47, %v8647_v14 }
 0x698   :  { %v1411_v52 = vsel %vm396_vm6, %v1401_v51, -inf }
 0x699   :  { %1412 = vmax.xlane.f32.xlu0 %v1411_v52 }
 0x6a6   :  { %1446 = vrot.lane.b32.xlu1 %v8586_v40, %s8350_s21 }
 0x6aa   :  { %1598 = vrot.lane.b32.xlu1 %v8592_v43, %s8350_s21 }
 0x6ae   :  { %1674 = vrot.lane.b32.xlu1 %v8596_v44, %s8350_s21 }
 0x6af   :  { %1522 = vrot.lane.b32.xlu0 %v8584_v38, %s8350_s21 }
 0x6b2   :  { %1830 = vrot.lane.b32.xlu1 %v8584_v38, %s8351_s3 }
 0x6b3   :  { %1752 = vrot.lane.b32.xlu0 %v8586_v40, %s8351_s3 }
 0x6b6   :  { %1828 = vrot.lane.b32.xlu1 %v8584_v38, %s8352_s22 }
 0x6b7   :  { %1750 = vrot.lane.b32.xlu0 %v8586_v40, %s8352_s22 }
 0x71a   :  { %v1404_v53 = vpop.xlane.xlu0 %1403 }
 0x71b   :  { %v1414_v54 = vsub.f32 %v1398_v29, %v1404_v53 }
 0x71d   :  { %v1418_v55 = vmul.f32 1.442695, %v1414_v54 }
 0x71e   :  { %v1407_v56 = vpop.xlane.xlu1 %1406  ;;  %v1410_v57 = vpop.xlane.xlu0 %1409 }
 0x71f   :  { %8170 = vpow2.f32 %v1418_v55  ;;  %v1415_v58 = vsub.f32 %v1399_v42, %v1407_v56  ;;  %v1416_v60 = vsub.f32 %v1400_v45, %v1410_v57 }
 0x721   :  { %v1420_v21 = vmul.f32 1.442695, %v1415_v58  ;;  %v1422_v61 = vmul.f32 1.442695, %v1416_v60 }
 0x722   :  { %v1447_v62 = vpop.permute.xlu1 %1446  ;;  %v1413_v63 = vpop.xlane.xlu0 %1412 }
 0x723   :  { %8172 = vpow2.f32 %v1420_v21  ;;  %v1417_v0 = vsub.f32 %v1401_v51, %v1413_v63  ;;  %7721 = vmatpush3.msra.mxu0 %v1447_v62 }
 0x724   :  { %8174 = vpow2.f32 %v1422_v61  ;;  %7730 = vmatprep.subr.mxu0 %v8344_v35 }
 0x725   :  { %v1424_v2 = vmul.f32 1.442695, %v1417_v0 }
 0x726   :  { %v1523_v3 = vpop.permute.xlu0 %1522  ;;  %v1599_v13 = vpop.permute.xlu1 %1598 }
 0x727   :  { %8176 = vpow2.f32 %v1424_v2  ;;  %7726 = vmatpush3.msra.mxu1 %v1523_v3 }
 0x728   :  { %7735 = vmatprep.subr.mxu1 %v8344_v35 }
 0x72a   :  { %v1675_v16 = vpop.permute.xlu1 %1674  ;;  %v1753_v20 = vpop.permute.xlu0 %1752 }
 0x72c   :  { %v8171_v4 = vpop.eup %8170 }
 0x72d   :  { %v1426_v5 = vsel %vm396_vm6, %v8171_v4, 0.0 }
 0x72e   :  { %1427 = vadd.xlane.f32.xlu1 %v1426_v5  ;;  %v1831_v18 = vpop.permute.xlu1 %1830  ;;  %v1751_v24 = vpop.permute.xlu0 %1750 }
 0x730   :  { %v8173_v6 = vpop.eup %8172 }
 0x731   :  { %v8175_v7 = vpop.eup %8174  ;;  %v1429_v9 = vsel %vm396_vm6, %v8173_v6, 0.0 }
 0x732   :  { %1430 = vadd.xlane.f32.xlu0 %v1429_v9  ;;  %v1432_v10 = vsel %vm396_vm6, %v8175_v7, 0.0  ;;  %v1829_v23 = vpop.permute.xlu1 %1828 }
 0x733   :  { %1433 = vadd.xlane.f32.xlu1 %v1432_v10 }
 0x734   :  { %v8177_v11 = vpop.eup %8176 }
 0x735   :  { %v1435_v12 = vsel %vm396_vm6, %v8177_v11, 0.0 }
 0x736   :  { %1436 = vadd.xlane.f32.xlu0 %v1435_v12 }
 0x744   :  { %1986 = vrot.lane.b32.xlu1 %v8596_v44, %s8351_s3 }
 0x748   :  { %1984 = vrot.lane.b32.xlu1 %v8596_v44, %s8352_s22 }
 0x74c   :  { %1908 = vrot.lane.b32.xlu0 %v8592_v43, %s8351_s3 }
 0x750   :  { %1906 = vrot.lane.b32.xlu0 %v8592_v43, %s8352_s22 }
 0x7b7   :  { %v1428_v25 = vpop.xlane.xlu1 %1427 }
 0x7b8   :  { %8178 = vrcp.f32 %v1428_v25 }
 0x7bb   :  { %v1431_v27 = vpop.xlane.xlu0 %1430 }
 0x7bc   :  { %v1434_v29 = vpop.xlane.xlu1 %1433  ;;  %8180 = vrcp.f32 %v1431_v27 }
 0x7bd   :  { %8182 = vrcp.f32 %v1434_v29 }
 0x7bf   :  { %v1437_v30 = vpop.xlane.xlu0 %1436 }
 0x7c0   :  { %8184 = vrcp.f32 %v1437_v30  ;;  %v1987_v47 = vpop.permute.xlu1 %1986 }
 0x7c3   :  { %v1909_v45 = vpop.permute.xlu0 %1908 }
 0x7c4   :  { %v1985_v49 = vpop.permute.xlu1 %1984 }
 0x7c5   :  { %v8179_v32 = vpop.eup %8178 }
 0x7c6   :  { %v1442_v33 = vmul.f32 %v8179_v32, %v8171_v4 }
 0x7c7   :  { %v1907_v48 = vpop.permute.xlu0 %1906 }
 0x7c8   :  { %7723 = vmatmul.mubr.msk.f32.vlgmr.msra.gmra.mxu0 %vm396_vm6, %v1442_v33 }
 0x7c9   :  { %v8181_v36 = vpop.eup %8180  ;;  %7731 = vmatpush3.msra.mxu0 %v1599_v13  ;;  %7732 = vmatprep.mubr.msk.f32.mxu0 %vm8345_vm5, %v8344_v35 }
 0x7ca   :  { %v8183_v37 = vpop.eup %8182  ;;  %7740 = vmatprep.subr.mxu0 %v8344_v35  ;;  %v1443_v39 = vmul.f32 %v8181_v36, %v8173_v6 }
 0x7cb   :  { %v1444_v41 = vmul.f32 %v8183_v37, %v8175_v7 }
 0x7cc   :  { %7728 = vmatmul.mubr.msk.f32.vlgmr.msra.gmra.mxu1 %vm396_vm6, %v1443_v39 }
 0x7cd   :  { %v8185_v42 = vpop.eup %8184  ;;  %7733 = vmatmul.mubr.msk.f32.vlgmr.msra.gmra.mxu0 %vm396_vm6, %v1444_v41  ;;  %7736 = vmatpush3.msra.mxu1 %v1675_v16 }
 0x7ce   :  { %7741 = vmatpush3.xpose.msk.msra.mxu0 %vm396_vm6, %v1753_v20  ;;  %7737 = vmatprep.mubr.msk.f32.mxu1 %vm8345_vm5, %v8344_v35  ;;  %v1445_v46 = vmul.f32 %v8185_v42, %v8177_v11 }
 0x7cf   :  { %7742 = vmatprep.mubr.msk.f32.mxu0 %vm8345_vm5, %v8344_v35  ;;  %7745 = vmatprep.subr.mxu1 %v8344_v35 }
 0x7d0   :  { %7750 = vmatprep.subr.mxu0 %v8344_v35  ;;  %7738 = vmatmul.mubr.msk.f32.vlgmr.msra.gmra.mxu1 %vm396_vm6, %v1445_v46 }
 0x7d1   :  { %7743 = vmatmul.mubr.msk.f32.vlgmr.msra.gmra.mxu0 %vm396_vm6, %v1751_v24  ;;  %7746 = vmatpush3.xpose.msk.msra.mxu1 %vm396_vm6, %v1831_v18 }
 0x7d2   :  { %7751 = vmatpush3.xpose.msk.msra.mxu0 %vm396_vm6, %v1909_v45  ;;  %7747 = vmatprep.mubr.msk.f32.mxu1 %vm8345_vm5, %v8344_v35 }
 0x7d3   :  { %7752 = vmatprep.mubr.msk.f32.mxu0 %vm8345_vm5, %v8344_v35  ;;  %7755 = vmatprep.subr.mxu1 %v8344_v35 }
 0x7d4   :  { %7748 = vmatmul.mubr.msk.f32.vlgmr.msra.gmra.mxu1 %vm396_vm6, %v1829_v23  ;;  %7760 = vmatprep.subr.mxu0 %v8344_v35 }
 0x7d5   :  { %7753 = vmatmul.mubr.msk.f32.vlgmr.msra.gmra.mxu0 %vm396_vm6, %v1907_v48  ;;  %7756 = vmatpush3.xpose.msk.msra.mxu1 %vm396_vm6, %v1987_v47 }
 0x7d6   :  { %7757 = vmatprep.mubr.msk.f32.mxu1 %vm8345_vm5, %v8344_v35  ;;  %7765 = vmatprep.subr.mxu1 %v8344_v35 }
 0x7d7   :  { %7762 = vmatprep.mubr.msk.f32.mxu0 %vm8345_vm5, %v8344_v35 }
 0x7d8   :  { %7758 = vmatmul.mubr.msk.f32.vlgmr.msra.gmra.mxu1 %vm396_vm6, %v1985_v49 }
 0x7d9   :  { %7767 = vmatprep.mubr.msk.f32.mxu1 %vm8345_vm5, %v8344_v35 }
 0x888   :  { %v8797_v50 = vpop.f32.mrf.mxu0 }
 0x88a   :  { %v7724_v51 = vpop.f32.mrf.mxu0 }
 0x88c   :  { %v8799_v52 = vpop.f32.mrf.mxu1 }
 0x88d   :  { %v8801_v53 = vpop.f32.mrf.mxu0 }
 0x88e   :  { %v7729_v54 = vpop.f32.mrf.mxu1 }
 0x88f   :  { %v7734_v55 = vpop.f32.mrf.mxu0 }
 0x890   :  { %v8803_v56 = vpop.f32.mrf.mxu1 }
 0x891   :  { %v1824_v57 = vpop.f32.mrf.mxu0 }
 0x892   :  { %v2062_v58 = vmul.f32 0.35355338, %v1824_v57  ;;  %v7739_v60 = vpop.f32.mrf.mxu1 }
 0x893   :  { %v7744_v21 = vpop.f32.mrf.mxu0 }
 0x894   :  { %v1902_v61 = vpop.f32.mrf.mxu1  ;;  %v2066_v62 = vadd.f32 %v2062_v58, %v8634_v59 }
 0x895   :  { %v2063_v63 = vmul.f32 0.35355338, %v1902_v61  ;;  %v1980_v0 = vpop.f32.mrf.mxu0 }
 0x896   :  { %v2064_v2 = vmul.f32 0.35355338, %v1980_v0  ;;  %v2070_v3 = vsel %vm396_vm6, %v2066_v62, -inf  ;;  %v7749_v4 = vpop.f32.mrf.mxu1 }
 0x897   :  { %2071 = vmax.xlane.f32.xlu0 %v2070_v3  ;;  %v7754_v5 = vpop.f32.mrf.mxu0  ;;  %v2067_v6 = vadd.f32 %v2063_v63, %v8639_v1 }
 0x898   :  { %v2058_v7 = vpop.f32.mrf.mxu1  ;;  %v2068_v9 = vadd.f32 %v2064_v2, %v8643_v8 }
 0x899   :  { %v2065_v10 = vmul.f32 0.35355338, %v2058_v7  ;;  %v2073_v11 = vsel %vm396_vm6, %v2067_v6, -inf }
 0x89a   :  { %2074 = vmax.xlane.f32.xlu1 %v2073_v11  ;;  %v7759_v12 = vpop.f32.mrf.mxu1  ;;  %v2076_v13 = vsel %vm396_vm6, %v2068_v9, -inf }
 0x89b   :  { %2077 = vmax.xlane.f32.xlu0 %v2076_v13  ;;  %v2069_v16 = vadd.f32 %v2065_v10, %v8647_v14 }
 0x89d   :  { %v2079_v18 = vsel %vm396_vm6, %v2069_v16, -inf }
 0x89f   :  { %2080 = vmax.xlane.f32.xlu0 %v2079_v18 }
 0x8ab   :  { %2114 = vrot.lane.b32.xlu1 %v8586_v40, %s8353_s5 }
 0x8af   :  { %2266 = vrot.lane.b32.xlu1 %v8592_v43, %s8353_s5 }
 0x8b3   :  { %2342 = vrot.lane.b32.xlu1 %v8596_v44, %s8353_s5 }
 0x8b5   :  { %2190 = vrot.lane.b32.xlu0 %v8584_v38, %s8353_s5 }
 0x8b7   :  { %2498 = vrot.lane.b32.xlu1 %v8584_v38, %s9691_s6 }
 0x8b9   :  { %2420 = vrot.lane.b32.xlu0 %v8586_v40, %s9691_s6 }
 0x920   :  { %v2072_v20 = vpop.xlane.xlu0 %2071 }
 0x921   :  { %v2082_v23 = vsub.f32 %v2066_v62, %v2072_v20 }
 0x923   :  { %v2086_v24 = vmul.f32 1.442695, %v2082_v23  ;;  %v2075_v25 = vpop.xlane.xlu1 %2074 }
 0x924   :  { %v2083_v27 = vsub.f32 %v2067_v6, %v2075_v25  ;;  %v2078_v29 = vpop.xlane.xlu0 %2077 }
 0x925   :  { %8186 = vpow2.f32 %v2086_v24  ;;  %v2084_v30 = vsub.f32 %v2068_v9, %v2078_v29 }
 0x926   :  { %v2088_v32 = vmul.f32 1.442695, %v2083_v27 }
 0x927   :  { %v2090_v33 = vmul.f32 1.442695, %v2084_v30  ;;  %v2115_v36 = vpop.permute.xlu1 %2114 }
 0x928   :  { %8188 = vpow2.f32 %v2088_v32  ;;  %v2081_v37 = vpop.xlane.xlu0 %2080  ;;  %7761 = vmatpush3.msra.mxu0 %v2115_v36 }
 0x929   :  { %8190 = vpow2.f32 %v2090_v33  ;;  %v2085_v39 = vsub.f32 %v2069_v16, %v2081_v37  ;;  %7770 = vmatprep.subr.mxu0 %v8344_v35 }
 0x92b   :  { %v2092_v41 = vmul.f32 1.442695, %v2085_v39  ;;  %v2267_v57 = vpop.permute.xlu1 %2266 }
 0x92c   :  { %v2191_v42 = vpop.permute.xlu0 %2190 }
 0x92d   :  { %8192 = vpow2.f32 %v2092_v41  ;;  %7766 = vmatpush3.msra.mxu1 %v2191_v42 }
 0x92e   :  { %7775 = vmatprep.subr.mxu1 %v8344_v35 }
 0x92f   :  { %v2343_v58 = vpop.permute.xlu1 %2342 }
 0x930   :  { %v2421_v21 = vpop.permute.xlu0 %2420 }
 0x932   :  { %v8187_v45 = vpop.eup %8186 }
 0x933   :  { %v2094_v46 = vsel %vm396_vm6, %v8187_v45, 0.0  ;;  %v2499_v60 = vpop.permute.xlu1 %2498 }
 0x934   :  { %2095 = vadd.xlane.f32.xlu1 %v2094_v46 }
 0x935   :  { %v8189_v47 = vpop.eup %8188 }
 0x936   :  { %v8191_v48 = vpop.eup %8190  ;;  %v2097_v49 = vsel %vm396_vm6, %v8189_v47, 0.0 }
 0x937   :  { %2098 = vadd.xlane.f32.xlu0 %v2097_v49  ;;  %v2100_v51 = vsel %vm396_vm6, %v8191_v48, 0.0 }
 0x938   :  { %2101 = vadd.xlane.f32.xlu1 %v2100_v51 }
 0x93a   :  { %v8193_v54 = vpop.eup %8192 }
 0x93b   :  { %v2103_v55 = vsel %vm396_vm6, %v8193_v54, 0.0 }
 0x93c   :  { %2104 = vadd.xlane.f32.xlu0 %v2103_v55 }
 0x949   :  { %2496 = vrot.lane.b32.xlu1 %v8584_v38, %s9689_s4 }
 0x94d   :  { %2654 = vrot.lane.b32.xlu1 %v8596_v44, %s9691_s6 }
 0x951   :  { %2652 = vrot.lane.b32.xlu1 %v8596_v44, %s9689_s4 }
 0x952   :  { %2418 = vrot.lane.b32.xlu0 %v8586_v40, %s9689_s4 }
 0x956   :  { %2576 = vrot.lane.b32.xlu0 %v8592_v43, %s9691_s6 }
 0x95a   :  { %2574 = vrot.lane.b32.xlu0 %v8592_v43, %s9689_s4  ;;  %s9707_s4 = smov 24  }
 0x9bd   :  { %v2096_v61 = vpop.xlane.xlu1 %2095 }
 0x9be   :  { %8194 = vrcp.f32 %v2096_v61 }
 0x9c0   :  { %v2099_v62 = vpop.xlane.xlu0 %2098 }
 0x9c1   :  { %v2102_v63 = vpop.xlane.xlu1 %2101  ;;  %8196 = vrcp.f32 %v2099_v62 }
 0x9c2   :  { %8198 = vrcp.f32 %v2102_v63 }
 0x9c5   :  { %v2105_v0 = vpop.xlane.xlu0 %2104  ;;  %v2497_v10 = vpop.permute.xlu1 %2496 }
 0x9c6   :  { %8200 = vrcp.f32 %v2105_v0 }
 0x9c9   :  { %v2419_v4 = vpop.permute.xlu0 %2418  ;;  %v2655_v16 = vpop.permute.xlu1 %2654 }
 0x9cb   :  { %v8195_v2 = vpop.eup %8194 }
 0x9cc   :  { %v2110_v3 = vmul.f32 %v8195_v2, %v8187_v45 }
 0x9cd   :  { %v2577_v12 = vpop.permute.xlu0 %2576  ;;  %v2653_v20 = vpop.permute.xlu1 %2652 }
 0x9ce   :  { %v8197_v5 = vpop.eup %8196  ;;  %7763 = vmatmul.mubr.msk.f32.vlgmr.msra.gmra.mxu0 %vm396_vm6, %v2110_v3 }
 0x9cf   :  { %v8199_v6 = vpop.eup %8198  ;;  %7771 = vmatpush3.msra.mxu0 %v2267_v57  ;;  %7772 = vmatprep.mubr.msk.f32.mxu0 %vm8345_vm5, %v8344_v35  ;;  %v2111_v7 = vmul.f32 %v8197_v5, %v8189_v47 }
 0x9d0   :  { %7780 = vmatprep.subr.mxu0 %v8344_v35  ;;  %v2112_v9 = vmul.f32 %v8199_v6, %v8191_v48 }
 0x9d1   :  { %7768 = vmatmul.mubr.msk.f32.vlgmr.msra.gmra.mxu1 %vm396_vm6, %v2111_v7  ;;  %v2575_v18 = vpop.permute.xlu0 %2574 }
 0x9d2   :  { %7773 = vmatmul.mubr.msk.f32.vlgmr.msra.gmra.mxu0 %vm396_vm6, %v2112_v9  ;;  %7776 = vmatpush3.msra.mxu1 %v2343_v58 }
 0x9d3   :  { %v8201_v11 = vpop.eup %8200  ;;  %7781 = vmatpush3.xpose.msk.msra.mxu0 %vm396_vm6, %v2421_v21  ;;  %7777 = vmatprep.mubr.msk.f32.mxu1 %vm8345_vm5, %v8344_v35 }
 0x9d4   :  { %7782 = vmatprep.mubr.msk.f32.mxu0 %vm8345_vm5, %v8344_v35  ;;  %7785 = vmatprep.subr.mxu1 %v8344_v35  ;;  %v2113_v13 = vmul.f32 %v8201_v11, %v8193_v54 }
 0x9d5   :  { %7790 = vmatprep.subr.mxu0 %v8344_v35 }
 0x9d6   :  { %7778 = vmatmul.mubr.msk.f32.vlgmr.msra.gmra.mxu1 %vm396_vm6, %v2113_v13  ;;  %7783 = vmatmul.mubr.msk.f32.vlgmr.msra.gmra.mxu0 %vm396_vm6, %v2419_v4 }
 0x9d7   :  { %7786 = vmatpush3.xpose.msk.msra.mxu1 %vm396_vm6, %v2499_v60  ;;  %7791 = vmatpush3.xpose.msk.msra.mxu0 %vm396_vm6, %v2577_v12 }
 0x9d8   :  { %7787 = vmatprep.mubr.msk.f32.mxu1 %vm8345_vm5, %v8344_v35  ;;  %7792 = vmatprep.mubr.msk.f32.mxu0 %vm8345_vm5, %v8344_v35 }
 0x9d9   :  { %7795 = vmatprep.subr.mxu1 %v8344_v35  ;;  %7800 = vmatprep.subr.mxu0 %v8344_v35 }
 0x9da   :  { %7788 = vmatmul.mubr.msk.f32.vlgmr.msra.gmra.mxu1 %vm396_vm6, %v2497_v10  ;;  %7793 = vmatmul.mubr.msk.f32.vlgmr.msra.gmra.mxu0 %vm396_vm6, %v2575_v18 }
 0x9db   :  { %7796 = vmatpush3.xpose.msk.msra.mxu1 %vm396_vm6, %v2655_v16  ;;  %7797 = vmatprep.mubr.msk.f32.mxu1 %vm8345_vm5, %v8344_v35 }
 0x9dc   :  { %7805 = vmatprep.subr.mxu1 %v8344_v35  ;;  %7802 = vmatprep.mubr.msk.f32.mxu0 %vm8345_vm5, %v8344_v35 }
 0x9de   :  { %7798 = vmatmul.mubr.msk.f32.vlgmr.msra.gmra.mxu1 %vm396_vm6, %v2653_v20 }
 0x9df   :  { %7807 = vmatprep.mubr.msk.f32.mxu1 %vm8345_vm5, %v8344_v35 }
 0xa8e   :  { %v8877_v23 = vpop.f32.mrf.mxu0 }
 0xa90   :  { %v7764_v24 = vpop.f32.mrf.mxu0 }
 0xa91   :  { %v8879_v25 = vpop.f32.mrf.mxu1 }
 0xa92   :  { %v8881_v27 = vpop.f32.mrf.mxu0 }
 0xa93   :  { %v7769_v29 = vpop.f32.mrf.mxu1 }
 0xa94   :  { %v7774_v30 = vpop.f32.mrf.mxu0 }
 0xa96   :  { %v8883_v32 = vpop.f32.mrf.mxu1  ;;  %v2492_v33 = vpop.f32.mrf.mxu0 }
 0xa97   :  { %v2730_v36 = vmul.f32 0.35355338, %v2492_v33 }
 0xa98   :  { %v7779_v37 = vpop.f32.mrf.mxu1  ;;  %v7784_v39 = vpop.f32.mrf.mxu0 }
 0xa99   :  { %v2734_v41 = vadd.f32 %v2730_v36, %v8634_v59 }
 0xa9a   :  { %v2570_v42 = vpop.f32.mrf.mxu1  ;;  %v2648_v45 = vpop.f32.mrf.mxu0 }
 0xa9b   :  { %v2731_v46 = vmul.f32 0.35355338, %v2570_v42  ;;  %v2732_v47 = vmul.f32 0.35355338, %v2648_v45  ;;  %v2738_v48 = vsel %vm396_vm6, %v2734_v41, -inf }
 0xa9c   :  { %v7789_v49 = vpop.f32.mrf.mxu1  ;;  %2739 = vmax.xlane.f32.xlu0 %v2738_v48  ;;  %v7794_v51 = vpop.f32.mrf.mxu0  ;;  %v3150_v48 = vld [vmem:[%s9669_s9 + $0x10] sm:$0xff] }
 0xa9d   :  { %v2735_v54 = vadd.f32 %v2731_v46, %v8639_v1  ;;  %v2736_v55 = vadd.f32 %v2732_v47, %v8643_v8  ;;  %v3151_v47 = vld [vmem:[%s9669_s9 + $0x18] sm:$0xff]  ;;  %v3149_v49 = vld [vmem:[%s9669_s9 + $0x8] sm:$0xff]  ;;  %v3148_v51 = vld [vmem:[%s9669_s9] sm:$0xff] }
 0xa9e   :  { %v2726_v57 = vpop.f32.mrf.mxu1 }
 0xa9f   :  { %v2733_v58 = vmul.f32 0.35355338, %v2726_v57  ;;  %v2741_v60 = vsel %vm396_vm6, %v2735_v54, -inf  ;;  %v2744_v21 = vsel %vm396_vm6, %v2736_v55, -inf }
 0xaa0   :  { %2742 = vmax.xlane.f32.xlu1 %v2741_v60  ;;  %v7799_v61 = vpop.f32.mrf.mxu1  ;;  %2745 = vmax.xlane.f32.xlu0 %v2744_v21 }
 0xaa1   :  { %v2737_v62 = vadd.f32 %v2733_v58, %v8647_v14 }
 0xaa3   :  { %v2747_v63 = vsel %vm396_vm6, %v2737_v62, -inf }
 0xaa4   :  { %2748 = vmax.xlane.f32.xlu0 %v2747_v63 }
 0xab1   :  { %2782 = vrot.lane.b32.xlu1 %v8586_v40, %s9687_s24 }
 0xb25   :  { %v2740_v0 = vpop.xlane.xlu0 %2739 }
 0xb26   :  { %v2750_v2 = vsub.f32 %v2734_v41, %v2740_v0 }
 0xb28   :  { %v2754_v3 = vmul.f32 1.442695, %v2750_v2 }
 0xb29   :  { %v2743_v4 = vpop.xlane.xlu1 %2742  ;;  %v2746_v5 = vpop.xlane.xlu0 %2745 }
 0xb2a   :  { %8202 = vpow2.f32 %v2754_v3  ;;  %v2751_v6 = vsub.f32 %v2735_v54, %v2743_v4  ;;  %v2752_v7 = vsub.f32 %v2736_v55, %v2746_v5 }
 0xb2c   :  { %v2756_v9 = vmul.f32 1.442695, %v2751_v6  ;;  %v2758_v10 = vmul.f32 1.442695, %v2752_v7 }
 0xb2d   :  { %v2783_v11 = vpop.permute.xlu1 %2782  ;;  %v2749_v12 = vpop.xlane.xlu0 %2748 }
 0xb2e   :  { %8204 = vpow2.f32 %v2756_v9  ;;  %v2753_v13 = vsub.f32 %v2737_v62, %v2749_v12  ;;  %7801 = vmatpush3.msra.mxu0 %v2783_v11 }
 0xb2f   :  { %8206 = vpow2.f32 %v2758_v10  ;;  %7810 = vmatprep.subr.mxu0 %v8344_v35 }
 0xb30   :  { %v2760_v16 = vmul.f32 1.442695, %v2753_v13 }
 0xb32   :  { %8208 = vpow2.f32 %v2760_v16 }
 0xb37   :  { %v8203_v40 = vpop.eup %8202 }
 0xb38   :  { %v2762_v18 = vsel %vm396_vm6, %v8203_v40, 0.0 }
 0xb39   :  { %2763 = vadd.xlane.f32.xlu1 %v2762_v18 }
 0xb3b   :  { %v8205_v20 = vpop.eup %8204 }
 0xb3c   :  { %v8207_v24 = vpop.eup %8206  ;;  %v2765_v29 = vsel %vm396_vm6, %v8205_v20, 0.0 }
 0xb3d   :  { %2766 = vadd.xlane.f32.xlu0 %v2765_v29  ;;  %v2768_v30 = vsel %vm396_vm6, %v8207_v24, 0.0 }
 0xb3e   :  { %2769 = vadd.xlane.f32.xlu1 %v2768_v30 }
 0xb3f   :  { %v8209_v33 = vpop.eup %8208 }
 0xb40   :  { %v2771_v36 = vsel %vm396_vm6, %v8209_v33, 0.0 }
 0xb41   :  { %2772 = vadd.xlane.f32.xlu0 %v2771_v36 }
 0xb4f   :  { %2934 = vrot.lane.b32.xlu1 %v8592_v43, %s9687_s24 }
 0xb53   :  { %3010 = vrot.lane.b32.xlu1 %v8596_v44, %s9687_s24 }
 0xb57   :  { %3092 = vrot.lane.b32.xlu1 %v8799_v52, %s9685_s25  ;;  %2858 = vrot.lane.b32.xlu0 %v8584_v38, %s9687_s24 }
 0xb5b   :  { %3108 = vrot.lane.b32.xlu1 %v8879_v25, %s8358_s26  ;;  %3090 = vrot.lane.b32.xlu0 %v8797_v50, %s9685_s25 }
 0xb5f   :  { %3096 = vrot.lane.b32.xlu1 %v8803_v56, %s9685_s25  ;;  %3106 = vrot.lane.b32.xlu0 %v8877_v23, %s8358_s26 }
 0xb63   :  { %3094 = vrot.lane.b32.xlu0 %v8801_v53, %s9685_s25 }
 0xbc2   :  { %v2764_v43 = vpop.xlane.xlu1 %2763 }
 0xbc3   :  { %8210 = vrcp.f32 %v2764_v43 }
 0xbc6   :  { %v2767_v44 = vpop.xlane.xlu0 %2766 }
 0xbc7   :  { %v2770_v38 = vpop.xlane.xlu1 %2769  ;;  %8212 = vrcp.f32 %v2767_v44 }
 0xbc8   :  { %8214 = vrcp.f32 %v2770_v38 }
 0xbca   :  { %v2773_v52 = vpop.xlane.xlu0 %2772 }
 0xbcb   :  { %8216 = vrcp.f32 %v2773_v52  ;;  %v2935_v56 = vpop.permute.xlu1 %2934 }
 0xbce   :  { %v2859_v25 = vpop.permute.xlu0 %2858 }
 0xbcf   :  { %7806 = vmatpush3.msra.mxu1 %v2859_v25  ;;  %v3011_v42 = vpop.permute.xlu1 %3010 }
 0xbd0   :  { %v8211_v50 = vpop.eup %8210  ;;  %7815 = vmatprep.subr.mxu1 %v8344_v35 }
 0xbd1   :  { %v2778_v37 = vmul.f32 %v8211_v50, %v8203_v40 }
 0xbd2   :  { %v3091_v63 = vpop.permute.xlu0 %3090 }
 0xbd3   :  { %7803 = vmatmul.mubr.msk.f32.vlgmr.msra.gmra.mxu0 %vm396_vm6, %v2778_v37  ;;  %v3093_v0 = vpop.permute.xlu1 %3092 }
 0xbd4   :  { %v8213_v23 = vpop.eup %8212  ;;  %7811 = vmatpush3.msra.mxu0 %v2935_v56  ;;  %7812 = vmatprep.mubr.msk.f32.mxu0 %vm8345_vm5, %v8344_v35 }
 0xbd5   :  { %v8215_v53 = vpop.eup %8214  ;;  %v2779_v39 = vmul.f32 %v8213_v23, %v8205_v20 }
 0xbd6   :  { %v2780_v41 = vmul.f32 %v8215_v53, %v8207_v24  ;;  %v3107_v2 = vpop.permute.xlu0 %3106 }
 0xbd7   :  { %7808 = vmatmul.mubr.msk.f32.vlgmr.msra.gmra.mxu1 %vm396_vm6, %v2779_v39  ;;  %v3109_v3 = vpop.permute.xlu1 %3108 }
 0xbd8   :  { %v8217_v45 = vpop.eup %8216  ;;  %7813 = vmatmul.mubr.msk.f32.vlgmr.msra.gmra.mxu0 %vm396_vm6, %v2780_v41  ;;  %7816 = vmatpush3.msra.mxu1 %v3011_v42 }
 0xbd9   :  { %7817 = vmatprep.mubr.msk.f32.mxu1 %vm8345_vm5, %v8344_v35  ;;  %v2781_v46 = vmul.f32 %v8217_v45, %v8209_v33  ;;  %7820 = vmatprep.subr.mxu1 %v3151_v47 }
 0xbda   :  { %v3095_v4 = vpop.permute.xlu0 %3094 }
 0xbdb   :  { %7818 = vmatmul.mubr.msk.f32.vlgmr.msra.gmra.mxu1 %vm396_vm6, %v2781_v46  ;;  %v3097_v6 = vpop.permute.xlu1 %3096 }
 0xbdc   :  { %7821 = vmatpush3.msra.mxu1 %v3151_v47 }
 0xbdd   :  { %7822 = vmatprep.subr.mxu1 %v3150_v48 }
 0xbde   :  { %7823 = vmatpush3.msra.mxu1 %v3150_v48 }
 0xbdf   :  { %7824 = vmatprep.subr.mxu1 %v3149_v49 }
 0xbe0   :  { %7825 = vmatpush3.msra.mxu1 %v3149_v49 }
 0xbe1   :  { %7826 = vmatprep.subr.mxu1 %v3148_v51 }
 0xbe2   :  { %7827 = vmatpush3.msra.mxu1 %v3148_v51 }
 0xc93   :  { %v2854_v54 = vpop.f32.mrf.mxu0 }
 0xc94   :  { %3122 = vrot.lane.b32.xlu0 %v2854_v54, %s9693_s27 }
 0xc95   :  { %v7804_v55 = vpop.f32.mrf.mxu0 }
 0xc97   :  { %v2930_v57 = vpop.f32.mrf.mxu1 }
 0xc98   :  { %v3006_v58 = vpop.f32.mrf.mxu0  ;;  %3110 = vrot.lane.b32.xlu0 %v8881_v27, %s8358_s26  ;;  %3124 = vrot.lane.b32.xlu1 %v2930_v57, %s9693_s27  ;;  %v3134_v27 = vsel %vm396_vm6, %v8717_v15, %v3091_v63  ;;  %v3136_v15 = vsel %vm396_vm6, %v8721_v19, %v3095_v4  ;;  %v7253_v19 = vld [vmem:[%s9670_s10] ss:$0 sm:$0xff]  ;;  %v3335_v4 = vld [vmem:[%s9671_s13 + $0x8] sm:$0xff] }
 0xc99   :  { %v7809_v60 = vpop.f32.mrf.mxu1  ;;  %v3139_v5 = vsel %vm3138_vm7, %v3134_v27, %v3107_v2  ;;  %v3337_v2 = vld [vmem:[%s9671_s13 + $0x18] sm:$0xff]  ;;  %v3334_v27 = vld [vmem:[%s9671_s13] sm:$0xff] }
 0xc9a   :  { %v7814_v21 = vpop.f32.mrf.mxu0  ;;  %7834 = vmatprep.subr.mxu1 %v3337_v2 }
 0xc9b   :  { %v3082_v61 = vpop.f32.mrf.mxu1 }
 0xc9c   :  { %3126 = vrot.lane.b32.xlu0 %v3006_v58, %s9693_s27  ;;  %3112 = vrot.lane.b32.xlu1 %v8883_v32, %s8358_s26  ;;  %v3135_v32 = vsel %vm396_vm6, %v8719_v17, %v3093_v0  ;;  %v3137_v17 = vsel %vm396_vm6, %v8723_v22, %v3097_v6 }
 0xc9d   :  { %v7819_v62 = vpop.f32.mrf.mxu1  ;;  %v3140_v10 = vsel %vm3138_vm7, %v3135_v32, %v3109_v3  ;;  %v3336_v3 = vld [vmem:[%s9671_s13 + $0x10] sm:$0xff] }
 0xca0   :  { %3128 = vrot.lane.b32.xlu1 %v3082_v61, %s9693_s27 }
 0xd06   :  { %v3123_v7 = vpop.permute.xlu0 %3122 }
 0xd07   :  { %v3144_v9 = vsel %vm3143_vm8, %v3139_v5, %v3123_v7 }
 0xd08   :  { %7828 = vmatprep.mubr.msk.f32.mxu1 %vm199_vm4, %v3144_v9 }
 0xd0a   :  { %v3125_v11 = vpop.permute.xlu1 %3124  ;;  %v3111_v12 = vpop.permute.xlu0 %3110 }
 0xd0b   :  { %v3145_v13 = vsel %vm3143_vm8, %v3140_v10, %v3125_v11  ;;  %v3141_v16 = vsel %vm3138_vm7, %v3136_v15, %v3111_v12 }
 0xd0c   :  { %7829 = vmatmul.mubr.msk.f32.vlgmr.msra.gmra.mxu1 %vm199_vm4, %v3145_v13 }
 0xd0d   :  { %7835 = vmatpush3.msra.mxu1 %v3337_v2 }
 0xd0e   :  { %v3113_v40 = vpop.permute.xlu1 %3112  ;;  %v3127_v18 = vpop.permute.xlu0 %3126  ;;  %7836 = vmatprep.subr.mxu1 %v3336_v3 }
 0xd0f   :  { %v3146_v20 = vsel %vm3143_vm8, %v3141_v16, %v3127_v18  ;;  %v3142_v24 = vsel %vm3138_vm7, %v3137_v17, %v3113_v40  ;;  %7837 = vmatpush3.msra.mxu1 %v3336_v3  ;;  %v7258_v17 = vld [vmem:[%s9672_s11] ss:$0 sm:$0xff] }
 0xd10   :  { %7831 = vmatprep.mubr.msk.f32.mxu1 %vm199_vm4, %v3146_v20  ;;  %7838 = vmatprep.subr.mxu1 %v3335_v4 }
 0xd11   :  { %7839 = vmatpush3.msra.mxu1 %v3335_v4 }
 0xd12   :  { %v3129_v29 = vpop.permute.xlu1 %3128  ;;  %7840 = vmatprep.subr.mxu1 %v3334_v27 }
 0xd13   :  { %v3147_v30 = vsel %vm3143_vm8, %v3142_v24, %v3129_v29  ;;  %7841 = vmatpush3.msra.mxu1 %v3334_v27 }
 0xd14   :  { %7832 = vmatmul.mubr.msk.f32.gmra.mxu1 %vm199_vm4, %v3147_v30 }
 0xdcc   :  { %v7830_v33 = vpop.f32.mrf.mxu1 }
 0xdcd   :  { %v3243_v36 = vadd.f32 %v7830_v33, %v7253_v19 }
 0xdce   :  { %v3237_v43 = vpop.f32.mrf.mxu1 }
 0xdcf   :  { %v3257_v44 = vadd.f32 %v3243_v36, %v8561_v28  ;;  %v3238_v38 = vadd.f32 %v7253_v19, %v3237_v43 }
 0xdd1   :  { %v3256_v52 = vadd.f32 %v3238_v38, %v8559_v26  ;;  %v3265_v22 = vsel %vm199_vm4, %v3257_v44, 0.0 }
 0xdd2   :  { %3266 = vadd.xlane.f32.xlu1 %v3265_v22 }
 0xdd3   :  { %v3262_v25 = vsel %vm199_vm4, %v3256_v52, 0.0 }
 0xdd4   :  { %3263 = vadd.xlane.f32.xlu0 %v3262_v25  ;;  %v7833_v50 = vpop.f32.mrf.mxu1 }
 0xdd5   :  { %v3253_v37 = vadd.f32 %v7833_v50, %v7253_v19 }
 0xdd6   :  { %v3247_v56 = vpop.f32.mrf.mxu1 }
 0xdd7   :  { %v3248_v23 = vadd.f32 %v7253_v19, %v3247_v56  ;;  %v3259_v39 = vadd.f32 %v3253_v37, %v8571_v34  ;;  %v7259_v19 = vld [vmem:[%s9673_s12] ss:$0 sm:$0xff] }
 0xdd9   :  { %v3258_v53 = vadd.f32 %v3248_v23, %v8567_v31  ;;  %v3271_v28 = vsel %vm199_vm4, %v3259_v39, 0.0  ;;  %v3493_v23 = vld [vmem:[%s9674_s15 + $0x78] sm:$0xff] }
 0xdda   :  { %7848 = vmatprep.subr.mxu0 %v3493_v23 }
 0xddb   :  { %v3268_v41 = vsel %vm199_vm4, %v3258_v53, 0.0  ;;  %7849 = vmatpush3.msra.mxu0 %v3493_v23 }
 0xddc   :  { %3269 = vadd.xlane.f32.xlu0 %v3268_v41  ;;  %v3490_v41 = vld [vmem:[%s9674_s15 + $0x60] sm:$0xff] }
 0xde0   :  { %3272 = vadd.xlane.f32.xlu0 %v3271_v28  ;;  %v3489_v28 = vld [vmem:[%s9674_s15 + $0x58] sm:$0xff] }
 0xe5b   :  { %v3267_v26 = vpop.xlane.xlu1 %3266 }
 0xe5c   :  { %v3275_v42 = vmul.f32 0.03125, %v3267_v26  ;;  %v3488_v26 = vld [vmem:[%s9674_s15 + $0x50] sm:$0xff] }
 0xe5d   :  { %v3264_v45 = vpop.xlane.xlu0 %3263 }
 0xe5e   :  { %v3279_v46 = vsub.f32 %v3257_v44, %v3275_v42  ;;  %v3274_v47 = vmul.f32 0.03125, %v3264_v45  ;;  %v3487_v42 = vld [vmem:[%s9674_s15 + $0x48] sm:$0xff]  ;;  %v3486_v45 = vld [vmem:[%s9674_s15 + $0x40] sm:$0xff] }
 0xe60   :  { %v3278_v48 = vsub.f32 %v3256_v52, %v3274_v47  ;;  %v3283_v49 = vmul.f32 %v3279_v46, %v3279_v46  ;;  %v3484_v47 = vld [vmem:[%s9674_s15 + $0x30] sm:$0xff] }
 0xe62   :  { %v3289_v51 = vsel %vm199_vm4, %v3283_v49, 0.0  ;;  %v3282_v54 = vmul.f32 %v3278_v48, %v3278_v48  ;;  %v3482_v49 = vld [vmem:[%s9674_s15 + $0x20] sm:$0xff] }
 0xe63   :  { %3290 = vadd.xlane.f32.xlu0 %v3289_v51  ;;  %v3481_v51 = vld [vmem:[%s9674_s15 + $0x18] sm:$0xff] }
 0xe64   :  { %v3286_v31 = vsel %vm199_vm4, %v3282_v54, 0.0  ;;  %v3480_v54 = vld [vmem:[%s9674_s15 + $0x10] sm:$0xff] }
 0xe65   :  { %3287 = vadd.xlane.f32.xlu1 %v3286_v31  ;;  %v3270_v34 = vpop.xlane.xlu0 %3269  ;;  %v3479_v31 = vld [vmem:[%s9674_s15 + $0x8] sm:$0xff] }
 0xe66   :  { %v3276_v55 = vmul.f32 0.03125, %v3270_v34  ;;  %v3478_v34 = vld [vmem:[%s9674_s15] sm:$0xff] }
 0xe68   :  { %v3280_v57 = vsub.f32 %v3258_v53, %v3276_v55  ;;  %v3492_v53 = vld [vmem:[%s9674_s15 + $0x70] sm:$0xff]  ;;  %v7260_v55 = vld [vmem:[%s9675_s14] ss:$0 sm:$0xff] }
 0xe69   :  { %v3273_v58 = vpop.xlane.xlu0 %3272  ;;  %7850 = vmatprep.subr.mxu0 %v3492_v53 }
 0xe6a   :  { %v3277_v60 = vmul.f32 0.03125, %v3273_v58  ;;  %v3284_v21 = vmul.f32 %v3280_v57, %v3280_v57  ;;  %7851 = vmatpush3.msra.mxu0 %v3492_v53 }
 0xe6c   :  { %v3281_v61 = vsub.f32 %v3259_v39, %v3277_v60  ;;  %v3292_v62 = vsel %vm199_vm4, %v3284_v21, 0.0  ;;  %v3491_v39 = vld [vmem:[%s9674_s15 + $0x68] sm:$0xff] }
 0xe6d   :  { %3293 = vadd.xlane.f32.xlu1 %v3292_v62  ;;  %7852 = vmatprep.subr.mxu0 %v3491_v39 }
 0xe6e   :  { %v3285_v63 = vmul.f32 %v3281_v61, %v3281_v61  ;;  %7853 = vmatpush3.msra.mxu0 %v3491_v39 }
 0xe6f   :  { %7854 = vmatprep.subr.mxu0 %v3490_v41 }
 0xe70   :  { %v3295_v0 = vsel %vm199_vm4, %v3285_v63, 0.0  ;;  %7855 = vmatpush3.msra.mxu0 %v3490_v41 }
 0xe71   :  { %3296 = vadd.xlane.f32.xlu0 %v3295_v0  ;;  %7856 = vmatprep.subr.mxu0 %v3489_v28 }
 0xe72   :  { %7857 = vmatpush3.msra.mxu0 %v3489_v28 }
 0xe73   :  { %7858 = vmatprep.subr.mxu0 %v3488_v26 }
 0xe74   :  { %7859 = vmatpush3.msra.mxu0 %v3488_v26 }
 0xe75   :  { %7860 = vmatprep.subr.mxu0 %v3487_v42 }
 0xe76   :  { %7861 = vmatpush3.msra.mxu0 %v3487_v42  ;;  %v7265_v42 = vld [vmem:[%s9676_s16] ss:$0 sm:$0xff] }
 0xe77   :  { %7862 = vmatprep.subr.mxu0 %v3486_v45 }
 0xe78   :  { %7863 = vmatpush3.msra.mxu0 %v3486_v45 }
 0xeec   :  { %v3291_v5 = vpop.xlane.xlu0 %3290 }
 0xeed   :  { %v3299_v6 = vmul.f32 0.03125, %v3291_v5 }
 0xeee   :  { %v3288_v7 = vpop.xlane.xlu1 %3287 }
 0xeef   :  { %v3303_v9 = vadd.f32 1e-05, %v3299_v6  ;;  %v3298_v32 = vmul.f32 0.03125, %v3288_v7 }
 0xef1   :  { %8218 = vrsqrt.f32 %v3303_v9  ;;  %v3302_v10 = vadd.f32 1e-05, %v3298_v32 }
 0xef3   :  { %8220 = vrsqrt.f32 %v3302_v10 }
 0xef6   :  { %v3294_v11 = vpop.xlane.xlu1 %3293 }
 0xef7   :  { %v3300_v12 = vmul.f32 0.03125, %v3294_v11 }
 0xef9   :  { %v3304_v13 = vadd.f32 1e-05, %v3300_v12 }
 0xefa   :  { %v3297_v15 = vpop.xlane.xlu0 %3296 }
 0xefb   :  { %8222 = vrsqrt.f32 %v3304_v13  ;;  %v3301_v16 = vmul.f32 0.03125, %v3297_v15 }
 0xefd   :  { %v3305_v40 = vadd.f32 1e-05, %v3301_v16 }
 0xefe   :  { %v8219_v18 = vpop.eup %8218 }
 0xeff   :  { %v3311_v20 = vmul.f32 %v8219_v18, %v3279_v46  ;;  %8224 = vrsqrt.f32 %v3305_v40  ;;  %v3485_v46 = vld [vmem:[%s9674_s15 + $0x38] sm:$0xff] }
 0xf00   :  { %v8221_v24 = vpop.eup %8220  ;;  %7864 = vmatprep.subr.mxu0 %v3485_v46 }
 0xf01   :  { %v3310_v29 = vmul.f32 %v8221_v24, %v3278_v48  ;;  %v3321_v30 = vmul.f32 %v7258_v17, %v3311_v20  ;;  %7865 = vmatpush3.msra.mxu0 %v3485_v46  ;;  %v3483_v48 = vld [vmem:[%s9674_s15 + $0x28] sm:$0xff] }
 0xf02   :  { %7866 = vmatprep.subr.mxu0 %v3484_v47 }
 0xf03   :  { %v3320_v33 = vmul.f32 %v7258_v17, %v3310_v29  ;;  %v9002_v43 = vadd.f32 %v7259_v19, %v3321_v30  ;;  %7867 = vmatpush3.msra.mxu0 %v3484_v47 }
 0xf04   :  { %7868 = vmatprep.subr.mxu0 %v3483_v48 }
 0xf05   :  { %v9000_v36 = vadd.f32 %v7259_v19, %v3320_v33  ;;  %7869 = vmatpush3.msra.mxu0 %v3483_v48 }
 0xf06   :  { %7870 = vmatprep.subr.mxu0 %v3482_v49 }
 0xf07   :  { %7842 = vmatprep.mubr.msk.f32.mxu1 %vm199_vm4, %v9000_v36  ;;  %7871 = vmatpush3.msra.mxu0 %v3482_v49 }
 0xf08   :  { %v8223_v44 = vpop.eup %8222  ;;  %7843 = vmatmul.mubr.msk.f32.vlgmr.msra.gmra.mxu1 %vm199_vm4, %v9002_v43  ;;  %7872 = vmatprep.subr.mxu0 %v3481_v51 }
 0xf09   :  { %v3312_v38 = vmul.f32 %v8223_v44, %v3280_v57  ;;  %7873 = vmatpush3.msra.mxu0 %v3481_v51 }
 0xf0a   :  { %7874 = vmatprep.subr.mxu0 %v3480_v54 }
 0xf0b   :  { %v3322_v52 = vmul.f32 %v7258_v17, %v3312_v38  ;;  %7875 = vmatpush3.msra.mxu0 %v3480_v54 }
 0xf0c   :  { %v8225_v22 = vpop.eup %8224  ;;  %7876 = vmatprep.subr.mxu0 %v3479_v31 }
 0xf0d   :  { %v9008_v25 = vadd.f32 %v7259_v19, %v3322_v52  ;;  %v3313_v50 = vmul.f32 %v8225_v22, %v3281_v61  ;;  %7877 = vmatpush3.msra.mxu0 %v3479_v31 }
 0xf0e   :  { %7878 = vmatprep.subr.mxu0 %v3478_v34 }
 0xf0f   :  { %7845 = vmatprep.mubr.msk.f32.mxu1 %vm199_vm4, %v9008_v25  ;;  %v3323_v56 = vmul.f32 %v7258_v17, %v3313_v50  ;;  %7879 = vmatpush3.msra.mxu0 %v3478_v34 }
 0xf10   :  { %7930 = vmatprep.subr.mxu0 %v8344_v35 }
 0xf11   :  { %v9012_v37 = vadd.f32 %v7259_v19, %v3323_v56 }
 0xf13   :  { %7846 = vmatmul.mubr.msk.f32.gmra.mxu1 %vm199_vm4, %v9012_v37 }
 0xfc8   :  { %v7844_v57 = vpop.f32.mrf.mxu1 }
 0xfc9   :  { %v3429_v58 = vadd.f32 %v7844_v57, %v7260_v55 }
 0xfca   :  { %v3423_v60 = vpop.f32.mrf.mxu1 }
 0xfcb   :  { %v3447_v21 = vmul.f32 0.044715, %v3429_v58  ;;  %v3424_v61 = vadd.f32 %v7260_v55, %v3423_v60  ;;  %v3443_v38 = vmul.f32 0.5, %v3429_v58 }
 0xfcd   :  { %v3451_v62 = vmul.f32 %v3447_v21, %v3429_v58  ;;  %v3446_v63 = vmul.f32 0.044715, %v3424_v61  ;;  %v3442_v33 = vmul.f32 0.5, %v3424_v61 }
 0xfcf   :  { %v3455_v0 = vmul.f32 %v3451_v62, %v3429_v58  ;;  %v3450_v2 = vmul.f32 %v3446_v63, %v3424_v61 }
 0xfd1   :  { %v3459_v3 = vadd.f32 %v3455_v0, %v3429_v58  ;;  %v3454_v4 = vmul.f32 %v3450_v2, %v3424_v61 }
 0xfd3   :  { %v7847_v27 = vpop.f32.mrf.mxu1  ;;  %v3458_v5 = vadd.f32 %v3454_v4, %v3424_v61  ;;  %v3463_v6 = vmul.f32 0.7978846, %v3459_v3 }
 0xfd4   :  { %v3439_v7 = vadd.f32 %v7847_v27, %v7260_v55 }
 0xfd5   :  { %v3433_v9 = vpop.f32.mrf.mxu1  ;;  %v3462_v32 = vmul.f32 0.7978846, %v3458_v5  ;;  %8226 = vtanh.f32 %v3463_v6 }
 0xfd6   :  { %v3449_v10 = vmul.f32 0.044715, %v3439_v7  ;;  %v3434_v11 = vadd.f32 %v7260_v55, %v3433_v9  ;;  %v3445_v41 = vmul.f32 0.5, %v3439_v7 }
 0xfd7   :  { %8228 = vtanh.f32 %v3462_v32 }
 0xfd8   :  { %v3453_v12 = vmul.f32 %v3449_v10, %v3439_v7  ;;  %v3448_v13 = vmul.f32 0.044715, %v3434_v11  ;;  %v3444_v53 = vmul.f32 0.5, %v3434_v11 }
 0xfda   :  { %v3452_v15 = vmul.f32 %v3448_v13, %v3434_v11  ;;  %v3457_v16 = vmul.f32 %v3453_v12, %v3439_v7 }
 0xfdc   :  { %v3456_v40 = vmul.f32 %v3452_v15, %v3434_v11  ;;  %v3461_v18 = vadd.f32 %v3457_v16, %v3439_v7  ;;  %v7271_v16 = vld [vmem:[%s9702_s7 + $0x38] sm:$0xff] }
 0xfdd   :  { %7886 = vmatprep.subr.mxu1 %v7271_v16 }
 0xfde   :  { %v3460_v20 = vadd.f32 %v3456_v40, %v3434_v11  ;;  %v3465_v17 = vmul.f32 0.7978846, %v3461_v18  ;;  %v7270_v40 = vld [vmem:[%s9702_s7 + $0x30] sm:$0xff]  ;;  %7887 = vmatpush3.msra.mxu1 %v7271_v16  ;;  %v7269_v18 = vld [vmem:[%s9702_s7 + $0x28] sm:$0xff] }
 0xfdf   :  { %7888 = vmatprep.subr.mxu1 %v7270_v40 }
 0xfe0   :  { %v3464_v24 = vmul.f32 0.7978846, %v3460_v20  ;;  %8230 = vtanh.f32 %v3465_v17  ;;  %7889 = vmatpush3.msra.mxu1 %v7270_v40  ;;  %v7268_v20 = vld [vmem:[%s9702_s7 + $0x20] sm:$0xff] }
 0xfe1   :  { %7890 = vmatprep.subr.mxu1 %v7269_v18 }
 0xfe2   :  { %v8227_v29 = vpop.eup %8226  ;;  %8232 = vtanh.f32 %v3464_v24  ;;  %7891 = vmatpush3.msra.mxu1 %v7269_v18 }
 0xfe3   :  { %v3471_v19 = vadd.f32 1.0, %v8227_v29  ;;  %7892 = vmatprep.subr.mxu1 %v7268_v20 }
 0xfe4   :  { %v8229_v30 = vpop.eup %8228  ;;  %7893 = vmatpush3.msra.mxu1 %v7268_v20 }
 0xfe5   :  { %v3470_v44 = vadd.f32 1.0, %v8229_v30  ;;  %v3475_v22 = vmul.f32 %v3471_v19, %v3443_v38  ;;  %7900 = vmatprep.subr.mxu1 %v8344_v35 }
 0xfe7   :  { %v3474_v52 = vmul.f32 %v3470_v44, %v3442_v33 }
 0xfe9   :  { %7880 = vmatprep.mubr.f32.mxu0 %v3474_v52 }
 0xfea   :  { %7881 = vmatmul.mubr.f32.vlgmr.msra.gmra.mxu0 %v3475_v22 }
 0xfed   :  { %v8231_v50 = vpop.eup %8230 }
 0xfee   :  { %v3473_v23 = vadd.f32 1.0, %v8231_v50 }
 0xfef   :  { %v8233_v56 = vpop.eup %8232 }
 0xff0   :  { %v3472_v39 = vadd.f32 1.0, %v8233_v56  ;;  %v3477_v26 = vmul.f32 %v3473_v23, %v3445_v41 }
 0xff2   :  { %v3476_v28 = vmul.f32 %v3472_v39, %v3444_v53  ;;  %v7266_v39 = vld [vmem:[%s9677_s17] ss:$0 sm:$0xff] }
 0xff4   :  { %7883 = vmatprep.mubr.f32.mxu0 %v3476_v28 }
 0xff5   :  { %7884 = vmatmul.mubr.f32.gmra.mxu0 %v3477_v26 }
 0xff6   :  { %7932 = vmatprep.mubr.msk.f32.mxu0 %vm8345_vm5, %v8344_v35 }
0x10aa   :  { %v7882_v45 = vpop.f32.mrf.mxu0 }
0x10ab   :  { %v3573_v46 = vadd.f32 %v7882_v45, %v7265_v42 }
0x10ac   :  { %v3567_v47 = vpop.f32.mrf.mxu0 }
0x10ad   :  { %v3587_v48 = vadd.f32 %v3573_v46, %v9002_v43  ;;  %v3568_v49 = vadd.f32 %v7265_v42, %v3567_v47 }
0x10af   :  { %v3586_v51 = vadd.f32 %v3568_v49, %v9000_v36  ;;  %v3595_v54 = vsel %vm199_vm4, %v3587_v48, 0.0 }
0x10b0   :  { %3596 = vadd.xlane.f32.xlu0 %v3595_v54 }
0x10b1   :  { %v3592_v31 = vsel %vm199_vm4, %v3586_v51, 0.0 }
0x10b2   :  { %3593 = vadd.xlane.f32.xlu1 %v3592_v31 }
0x10b5   :  { %v7885_v34 = vpop.f32.mrf.mxu0 }
0x10b6   :  { %v3583_v55 = vadd.f32 %v7885_v34, %v7265_v42 }
0x10b7   :  { %v3577_v57 = vpop.f32.mrf.mxu0 }
0x10b8   :  { %v3589_v58 = vadd.f32 %v3583_v55, %v9012_v37  ;;  %v3578_v60 = vadd.f32 %v7265_v42, %v3577_v57  ;;  %v7267_v42 = vld [vmem:[%s9678_s18] ss:$0 sm:$0xff] }
0x10ba   :  { %v3588_v21 = vadd.f32 %v3578_v60, %v9008_v25  ;;  %v3601_v61 = vsel %vm199_vm4, %v3589_v58, 0.0 }
0x10bb   :  { %3602 = vadd.xlane.f32.xlu0 %v3601_v61 }
0x10bc   :  { %v3598_v43 = vsel %vm199_vm4, %v3588_v21, 0.0 }
0x10bd   :  { %3599 = vadd.xlane.f32.xlu1 %v3598_v43 }
0x1139   :  { %v3597_v36 = vpop.xlane.xlu0 %3596 }
0x113a   :  { %v3605_v62 = vmul.f32 0.03125, %v3597_v36 }
0x113b   :  { %v3594_v63 = vpop.xlane.xlu1 %3593 }
0x113c   :  { %v3609_v0 = vsub.f32 %v3587_v48, %v3605_v62  ;;  %v3604_v2 = vmul.f32 0.03125, %v3594_v63 }
0x113e   :  { %v3608_v3 = vsub.f32 %v3586_v51, %v3604_v2  ;;  %v3613_v4 = vmul.f32 %v3609_v0, %v3609_v0 }
0x1140   :  { %v3619_v27 = vsel %vm199_vm4, %v3613_v4, 0.0  ;;  %v3612_v5 = vmul.f32 %v3608_v3, %v3608_v3 }
0x1141   :  { %3620 = vadd.xlane.f32.xlu0 %v3619_v27 }
0x1142   :  { %v3616_v37 = vsel %vm199_vm4, %v3612_v5, 0.0 }
0x1143   :  { %3617 = vadd.xlane.f32.xlu1 %v3616_v37 }
0x1144   :  { %v3603_v25 = vpop.xlane.xlu0 %3602 }
0x1145   :  { %v3607_v6 = vmul.f32 0.03125, %v3603_v25 }
0x1146   :  { %v3600_v7 = vpop.xlane.xlu1 %3599 }
0x1147   :  { %v3611_v9 = vsub.f32 %v3589_v58, %v3607_v6  ;;  %v3606_v32 = vmul.f32 0.03125, %v3600_v7  ;;  %v7273_v58 = vld [vmem:[%s9667_s8 + $0x1] ss:$0 sm:$0xff]  ;;  %s9703_s8 = smov 72  }
0x1149   :  { %v3610_v10 = vsub.f32 %v3588_v21, %v3606_v32  ;;  %v3615_v11 = vmul.f32 %v3611_v9, %v3611_v9 }
0x114b   :  { %v3625_v12 = vsel %vm199_vm4, %v3615_v11, 0.0  ;;  %v3614_v13 = vmul.f32 %v3610_v10, %v3610_v10 }
0x114c   :  { %3626 = vadd.xlane.f32.xlu0 %v3625_v12 }
0x114d   :  { %v3622_v15 = vsel %vm199_vm4, %v3614_v13, 0.0 }
0x114e   :  { %3623 = vadd.xlane.f32.xlu1 %v3622_v15 }
0x11ca   :  { %v3621_v17 = vpop.xlane.xlu0 %3620 }
0x11cb   :  { %v3629_v24 = vmul.f32 0.03125, %v3621_v17 }
0x11cc   :  { %v3618_v29 = vpop.xlane.xlu1 %3617 }
0x11cd   :  { %v3633_v30 = vadd.f32 1e-05, %v3629_v24  ;;  %v3628_v19 = vmul.f32 0.03125, %v3618_v29 }
0x11cf   :  { %8234 = vrsqrt.f32 %v3633_v30  ;;  %v3632_v33 = vadd.f32 1e-05, %v3628_v19 }
0x11d1   :  { %8236 = vrsqrt.f32 %v3632_v33 }
0x11d5   :  { %v3627_v44 = vpop.xlane.xlu0 %3626 }
0x11d6   :  { %v3631_v38 = vmul.f32 0.03125, %v3627_v44 }
0x11d7   :  { %v3624_v52 = vpop.xlane.xlu1 %3623 }
0x11d8   :  { %v3635_v22 = vadd.f32 1e-05, %v3631_v38  ;;  %v3630_v50 = vmul.f32 0.03125, %v3624_v52 }
0x11da   :  { %8238 = vrsqrt.f32 %v3635_v22  ;;  %v3634_v56 = vadd.f32 1e-05, %v3630_v50 }
0x11dc   :  { %v8235_v23 = vpop.eup %8234  ;;  %8240 = vrsqrt.f32 %v3634_v56 }
0x11dd   :  { %v3641_v53 = vmul.f32 %v8235_v23, %v3609_v0 }
0x11de   :  { %v8237_v41 = vpop.eup %8236 }
0x11df   :  { %v3640_v28 = vmul.f32 %v8237_v41, %v3608_v3  ;;  %v3651_v26 = vmul.f32 %v7266_v39, %v3641_v53 }
0x11e1   :  { %v3650_v45 = vmul.f32 %v7266_v39, %v3640_v28  ;;  %v9106_v47 = vadd.f32 %v7267_v42, %v3651_v26 }
0x11e3   :  { %v9104_v46 = vadd.f32 %v7267_v42, %v3650_v45 }
0x11e5   :  { %7894 = vmatprep.mubr.msk.f32.mxu1 %vm199_vm4, %v9104_v46 }
0x11e6   :  { %7895 = vmatmul.mubr.msk.f32.vlgmr.msra.gmra.mxu1 %vm199_vm4, %v9106_v47 }
0x11e7   :  { %v8239_v48 = vpop.eup %8238 }
0x11e8   :  { %v3643_v49 = vmul.f32 %v8239_v48, %v3611_v9 }
0x11e9   :  { %v8241_v51 = vpop.eup %8240 }
0x11ea   :  { %v3642_v54 = vmul.f32 %v8241_v51, %v3610_v10  ;;  %v3653_v31 = vmul.f32 %v7266_v39, %v3643_v49 }
0x11ec   :  { %v3652_v34 = vmul.f32 %v7266_v39, %v3642_v54  ;;  %v9114_v57 = vadd.f32 %v7267_v42, %v3653_v31 }
0x11ee   :  { %v9112_v55 = vadd.f32 %v7267_v42, %v3652_v34 }
0x11f0   :  { %7897 = vmatprep.mubr.msk.f32.mxu1 %vm199_vm4, %v9112_v55 }
0x11f1   :  { %7898 = vmatmul.mubr.msk.f32.gmra.mxu1 %vm199_vm4, %v9114_v57 }
0x11f2   :  { %7902 = vmatprep.mubr.msk.f32.mxu1 %vm8345_vm5, %v8344_v35 }
0x12a6   :  { %v7896_v60 = vpop.f32.mrf.mxu1 }
0x12a7   :  { %v9125_v21 = vadd.f32 %v7896_v60, %v7273_v58 }
0x12a8   :  { %v3755_v61 = vpop.f32.mrf.mxu1 }
0x12a9   :  { %v9127_v43 = vadd.f32 %v7273_v58, %v3755_v61  ;;  %3852 = vrot.lane.b32.xlu0 %v9125_v21, %s8346_s20 }
0x12ab   :  { %3775 = vrot.lane.b32.xlu1 %v9127_v43, %s8346_s20 }
0x12b1   :  { %v7899_v36 = vpop.f32.mrf.mxu1 }
0x12b2   :  { %v9137_v0 = vadd.f32 %v7899_v36, %v7273_v58 }
0x12b3   :  { %v3765_v62 = vpop.f32.mrf.mxu1 }
0x12b4   :  { %v9133_v63 = vadd.f32 %v7273_v58, %v3765_v62 }
0x12b6   :  { %3929 = vrot.lane.b32.xlu1 %v9133_v63, %s8346_s20 }
0x12ba   :  { %4006 = vrot.lane.b32.xlu1 %v9137_v0, %s8346_s20  ;;  %s9704_s20 = smov 104  }
0x131b   :  { %v3853_v3 = vpop.permute.xlu0 %3852 }
0x131d   :  { %v3776_v2 = vpop.permute.xlu1 %3775 }
0x131e   :  { %7901 = vmatpush3.xpose.msk.msra.mxu1 %vm396_vm6, %v3776_v2 }
0x131f   :  { %7905 = vmatprep.subr.mxu1 %v8344_v35 }
0x1321   :  { %7903 = vmatmul.mubr.msk.f32.vlgmr.msra.gmra.mxu1 %vm396_vm6, %v9127_v43 }
0x1322   :  { %7906 = vmatpush3.xpose.msk.msra.mxu1 %vm396_vm6, %v3853_v3  ;;  %7907 = vmatprep.mubr.msk.f32.mxu1 %vm8345_vm5, %v8344_v35 }
0x1323   :  { %7910 = vmatprep.subr.mxu1 %v8344_v35 }
0x1325   :  { %7908 = vmatmul.mubr.msk.f32.vlgmr.msra.gmra.mxu1 %vm396_vm6, %v9125_v21 }
0x1326   :  { %7912 = vmatprep.mubr.msk.f32.mxu1 %vm8345_vm5, %v8344_v35 }
0x1328   :  { %v3930_v4 = vpop.permute.xlu1 %3929 }
0x1329   :  { %7911 = vmatpush3.xpose.msk.msra.mxu1 %vm396_vm6, %v3930_v4 }
0x132a   :  { %7915 = vmatprep.subr.mxu1 %v8344_v35 }
0x132c   :  { %v4007_v27 = vpop.permute.xlu1 %4006  ;;  %7913 = vmatmul.mubr.msk.f32.vlgmr.msra.gmra.mxu1 %vm396_vm6, %v9133_v63 }
0x132d   :  { %7916 = vmatpush3.xpose.msk.msra.mxu1 %vm396_vm6, %v4007_v27  ;;  %7917 = vmatprep.mubr.msk.f32.mxu1 %vm8345_vm5, %v8344_v35 }
0x132e   :  { %7920 = vmatprep.subr.mxu1 %v8344_v35 }
0x1330   :  { %7918 = vmatmul.mubr.msk.f32.vlgmr.msra.gmra.mxu1 %vm396_vm6, %v9137_v0 }
0x1331   :  { %7922 = vmatprep.mubr.msk.f32.mxu1 %vm8345_vm5, %v8344_v35 }
0x13e1   :  { %v3847_v5 = vpop.f32.mrf.mxu1 }
0x13e2   :  { %v4082_v37 = vmul.f32 0.35355338, %v3847_v5 }
0x13e3   :  { %v7904_v25 = vpop.f32.mrf.mxu1 }
0x13e4   :  { %v4086_v6 = vadd.f32 %v4082_v37, %v8634_v59 }
0x13e5   :  { %v3924_v7 = vpop.f32.mrf.mxu1 }
0x13e6   :  { %v4083_v9 = vmul.f32 0.35355338, %v3924_v7  ;;  %v4090_v32 = vsel %vm396_vm6, %v4086_v6, -inf }
0x13e7   :  { %4091 = vmax.xlane.f32.xlu0 %v4090_v32  ;;  %v7909_v10 = vpop.f32.mrf.mxu1 }
0x13e8   :  { %v4087_v11 = vadd.f32 %v4083_v9, %v8639_v1 }
0x13ea   :  { %v4093_v12 = vsel %vm396_vm6, %v4087_v11, -inf }
0x13eb   :  { %4094 = vmax.xlane.f32.xlu1 %v4093_v12 }
0x13ec   :  { %v4001_v13 = vpop.f32.mrf.mxu1 }
0x13ed   :  { %v4084_v15 = vmul.f32 0.35355338, %v4001_v13 }
0x13ee   :  { %v7914_v16 = vpop.f32.mrf.mxu1 }
0x13ef   :  { %v4088_v40 = vadd.f32 %v4084_v15, %v8643_v8 }
0x13f0   :  { %v4078_v18 = vpop.f32.mrf.mxu1 }
0x13f1   :  { %v4085_v20 = vmul.f32 0.35355338, %v4078_v18  ;;  %v4096_v17 = vsel %vm396_vm6, %v4088_v40, -inf }
0x13f2   :  { %4097 = vmax.xlane.f32.xlu0 %v4096_v17  ;;  %v7919_v24 = vpop.f32.mrf.mxu1 }
0x13f3   :  { %v4089_v29 = vadd.f32 %v4085_v20, %v8647_v14 }
0x13f5   :  { %v4099_v30 = vsel %vm396_vm6, %v4089_v29, -inf }
0x13f6   :  { %4100 = vmax.xlane.f32.xlu0 %v4099_v30 }
0x13fc   :  { %4134 = vrot.lane.b32.xlu1 %v9127_v43, %s8347_s1 }
0x1400   :  { %4286 = vrot.lane.b32.xlu1 %v9133_v63, %s8347_s1 }
0x1404   :  { %4362 = vrot.lane.b32.xlu1 %v9137_v0, %s8347_s1 }
0x1408   :  { %4518 = vrot.lane.b32.xlu1 %v9125_v21, %s8348_s0 }
0x140c   :  { %4516 = vrot.lane.b32.xlu1 %v9125_v21, %s8349_s30  ;;  %4210 = vrot.lane.b32.xlu0 %v9125_v21, %s8347_s1  ;;  %s9705_s1 = smov 40  }
0x1410   :  { %4440 = vrot.lane.b32.xlu0 %v9127_v43, %s8348_s0 }
0x1414   :  { %4438 = vrot.lane.b32.xlu0 %v9127_v43, %s8349_s30 }
0x1470   :  { %v4092_v19 = vpop.xlane.xlu0 %4091 }
0x1471   :  { %v4102_v33 = vsub.f32 %v4086_v6, %v4092_v19 }
0x1473   :  { %v4106_v44 = vmul.f32 1.442695, %v4102_v33 }
0x1474   :  { %v4095_v38 = vpop.xlane.xlu1 %4094 }
0x1475   :  { %8242 = vpow2.f32 %v4106_v44  ;;  %v4103_v52 = vsub.f32 %v4087_v11, %v4095_v38 }
0x1477   :  { %v4108_v22 = vmul.f32 1.442695, %v4103_v52 }
0x1478   :  { %v4135_v50 = vpop.permute.xlu1 %4134 }
0x1479   :  { %8244 = vpow2.f32 %v4108_v22  ;;  %7921 = vmatpush3.msra.mxu1 %v4135_v50 }
0x147a   :  { %7925 = vmatprep.subr.mxu1 %v8344_v35 }
0x147b   :  { %v4098_v56 = vpop.xlane.xlu0 %4097 }
0x147c   :  { %v4104_v23 = vsub.f32 %v4088_v40, %v4098_v56  ;;  %v4287_v53 = vpop.permute.xlu1 %4286 }
0x147d   :  { %7931 = vmatpush3.msra.mxu0 %v4287_v53 }
0x147e   :  { %v4110_v39 = vmul.f32 1.442695, %v4104_v23  ;;  %7940 = vmatprep.subr.mxu0 %v8344_v35 }
0x147f   :  { %v4101_v41 = vpop.xlane.xlu0 %4100 }
0x1480   :  { %8246 = vpow2.f32 %v4110_v39  ;;  %v4105_v28 = vsub.f32 %v4089_v29, %v4101_v41  ;;  %v4363_v58 = vpop.permute.xlu1 %4362 }
0x1482   :  { %v8243_v26 = vpop.eup %8242  ;;  %v4112_v42 = vmul.f32 1.442695, %v4105_v28 }
0x1483   :  { %v4114_v45 = vsel %vm396_vm6, %v8243_v26, 0.0  ;;  %v4211_v60 = vpop.permute.xlu0 %4210 }
0x1484   :  { %8248 = vpow2.f32 %v4112_v42  ;;  %4115 = vadd.xlane.f32.xlu1 %v4114_v45  ;;  %v4519_v61 = vpop.permute.xlu1 %4518 }
0x1486   :  { %v8245_v48 = vpop.eup %8244 }
0x1487   :  { %v4117_v49 = vsel %vm396_vm6, %v8245_v48, 0.0  ;;  %v4441_v36 = vpop.permute.xlu0 %4440 }
0x1488   :  { %4118 = vadd.xlane.f32.xlu0 %v4117_v49  ;;  %v4517_v62 = vpop.permute.xlu1 %4516 }
0x148b   :  { %v4439_v2 = vpop.permute.xlu0 %4438 }
0x148d   :  { %v8247_v51 = vpop.eup %8246 }
0x148e   :  { %v4120_v54 = vsel %vm396_vm6, %v8247_v51, 0.0 }
0x148f   :  { %4121 = vadd.xlane.f32.xlu1 %v4120_v54 }
0x1491   :  { %v8249_v31 = vpop.eup %8248 }
0x1492   :  { %v4123_v34 = vsel %vm396_vm6, %v8249_v31, 0.0 }
0x1493   :  { %4124 = vadd.xlane.f32.xlu0 %v4123_v34 }
0x14a0   :  { %4674 = vrot.lane.b32.xlu1 %v9137_v0, %s8348_s0 }
0x14a4   :  { %4672 = vrot.lane.b32.xlu1 %v9137_v0, %s8349_s30 }
0x14a9   :  { %4596 = vrot.lane.b32.xlu0 %v9133_v63, %s8348_s0  ;;  %s9706_s0 = smov 8  }
0x14ad   :  { %4594 = vrot.lane.b32.xlu0 %v9133_v63, %s8349_s30 }
0x150d   :  { %v4116_v3 = vpop.xlane.xlu1 %4115 }
0x150e   :  { %8250 = vrcp.f32 %v4116_v3 }
0x1511   :  { %v4119_v4 = vpop.xlane.xlu0 %4118 }
0x1512   :  { %8252 = vrcp.f32 %v4119_v4 }
0x1518   :  { %v4122_v27 = vpop.xlane.xlu1 %4121 }
0x1519   :  { %8254 = vrcp.f32 %v4122_v27 }
0x151b   :  { %v8251_v5 = vpop.eup %8250 }
0x151c   :  { %v4125_v37 = vpop.xlane.xlu0 %4124  ;;  %v4130_v25 = vmul.f32 %v8251_v5, %v8243_v26  ;;  %v4675_v13 = vpop.permute.xlu1 %4674 }
0x151d   :  { %8256 = vrcp.f32 %v4125_v37 }
0x151e   :  { %7923 = vmatmul.mubr.msk.f32.vlgmr.msra.gmra.mxu1 %vm396_vm6, %v4130_v25 }
0x151f   :  { %v8253_v6 = vpop.eup %8252  ;;  %7926 = vmatpush3.msra.mxu1 %v4211_v60  ;;  %7927 = vmatprep.mubr.msk.f32.mxu1 %vm8345_vm5, %v8344_v35 }
0x1520   :  { %7935 = vmatprep.subr.mxu1 %v8344_v35  ;;  %v4131_v7 = vmul.f32 %v8253_v6, %v8245_v48  ;;  %v4597_v11 = vpop.permute.xlu0 %4596  ;;  %v4673_v16 = vpop.permute.xlu1 %4672 }
0x1522   :  { %7928 = vmatmul.mubr.msk.f32.vlgmr.msra.gmra.mxu1 %vm396_vm6, %v4131_v7 }
0x1523   :  { %7936 = vmatpush3.msra.mxu1 %v4363_v58  ;;  %7937 = vmatprep.mubr.msk.f32.mxu1 %vm8345_vm5, %v8344_v35 }
0x1524   :  { %7945 = vmatprep.subr.mxu1 %v8344_v35  ;;  %v4595_v15 = vpop.permute.xlu0 %4594 }
0x1526   :  { %v8255_v9 = vpop.eup %8254 }
0x1527   :  { %v4132_v32 = vmul.f32 %v8255_v9, %v8247_v51 }
0x1529   :  { %7933 = vmatmul.mubr.msk.f32.vlgmr.msra.gmra.mxu0 %vm396_vm6, %v4132_v32 }
0x152a   :  { %v8257_v10 = vpop.eup %8256  ;;  %7941 = vmatpush3.xpose.msk.msra.mxu0 %vm396_vm6, %v4441_v36  ;;  %7942 = vmatprep.mubr.msk.f32.mxu0 %vm8345_vm5, %v8344_v35 }
0x152b   :  { %7950 = vmatprep.subr.mxu0 %v8344_v35  ;;  %v4133_v12 = vmul.f32 %v8257_v10, %v8249_v31 }
0x152d   :  { %7938 = vmatmul.mubr.msk.f32.vlgmr.msra.gmra.mxu1 %vm396_vm6, %v4133_v12  ;;  %7943 = vmatmul.mubr.msk.f32.vlgmr.msra.gmra.mxu0 %vm396_vm6, %v4439_v2 }
0x152e   :  { %7946 = vmatpush3.xpose.msk.msra.mxu1 %vm396_vm6, %v4519_v61  ;;  %7951 = vmatpush3.xpose.msk.msra.mxu0 %vm396_vm6, %v4597_v11 }
0x152f   :  { %7947 = vmatprep.mubr.msk.f32.mxu1 %vm8345_vm5, %v8344_v35  ;;  %7952 = vmatprep.mubr.msk.f32.mxu0 %vm8345_vm5, %v8344_v35 }
0x1530   :  { %7955 = vmatprep.subr.mxu1 %v8344_v35  ;;  %7960 = vmatprep.subr.mxu0 %v8344_v35 }
0x1531   :  { %7948 = vmatmul.mubr.msk.f32.vlgmr.msra.gmra.mxu1 %vm396_vm6, %v4517_v62  ;;  %7953 = vmatmul.mubr.msk.f32.vlgmr.msra.gmra.mxu0 %vm396_vm6, %v4595_v15 }
0x1532   :  { %7956 = vmatpush3.xpose.msk.msra.mxu1 %vm396_vm6, %v4675_v13  ;;  %7957 = vmatprep.mubr.msk.f32.mxu1 %vm8345_vm5, %v8344_v35 }
0x1533   :  { %7965 = vmatprep.subr.mxu1 %v8344_v35  ;;  %7962 = vmatprep.mubr.msk.f32.mxu0 %vm8345_vm5, %v8344_v35 }
0x1535   :  { %7958 = vmatmul.mubr.msk.f32.vlgmr.msra.gmra.mxu1 %vm396_vm6, %v4673_v16 }
0x1536   :  { %7967 = vmatprep.mubr.msk.f32.mxu1 %vm8345_vm5, %v8344_v35 }
0x15de   :  { %v9237_v40 = vpop.f32.mrf.mxu1 }
0x15e0   :  { %v7924_v18 = vpop.f32.mrf.mxu1 }
0x15e2   :  { %v9239_v20 = vpop.f32.mrf.mxu1 }
0x15e4   :  { %v7929_v17 = vpop.f32.mrf.mxu1 }
0x15e9   :  { %v9241_v24 = vpop.f32.mrf.mxu0 }
0x15eb   :  { %v7934_v29 = vpop.f32.mrf.mxu0 }
0x15ed   :  { %v9243_v30 = vpop.f32.mrf.mxu1  ;;  %v4512_v19 = vpop.f32.mrf.mxu0 }
0x15ee   :  { %v4750_v33 = vmul.f32 0.35355338, %v4512_v19 }
0x15ef   :  { %v7939_v44 = vpop.f32.mrf.mxu1  ;;  %v7944_v38 = vpop.f32.mrf.mxu0 }
0x15f0   :  { %v4754_v52 = vadd.f32 %v4750_v33, %v8634_v59 }
0x15f1   :  { %v4590_v22 = vpop.f32.mrf.mxu1  ;;  %v4668_v50 = vpop.f32.mrf.mxu0 }
0x15f2   :  { %v4751_v56 = vmul.f32 0.35355338, %v4590_v22  ;;  %v4752_v23 = vmul.f32 0.35355338, %v4668_v50  ;;  %v4758_v53 = vsel %vm396_vm6, %v4754_v52, -inf }
0x15f3   :  { %4759 = vmax.xlane.f32.xlu0 %v4758_v53  ;;  %v7949_v39 = vpop.f32.mrf.mxu1  ;;  %v7954_v41 = vpop.f32.mrf.mxu0 }
0x15f4   :  { %v4755_v28 = vadd.f32 %v4751_v56, %v8639_v1  ;;  %v4756_v26 = vadd.f32 %v4752_v23, %v8643_v8 }
0x15f5   :  { %v4746_v42 = vpop.f32.mrf.mxu1 }
0x15f6   :  { %v4753_v45 = vmul.f32 0.35355338, %v4746_v42  ;;  %v4761_v48 = vsel %vm396_vm6, %v4755_v28, -inf  ;;  %v4764_v49 = vsel %vm396_vm6, %v4756_v26, -inf }
0x15f7   :  { %4762 = vmax.xlane.f32.xlu1 %v4761_v48  ;;  %v7959_v51 = vpop.f32.mrf.mxu1  ;;  %4765 = vmax.xlane.f32.xlu0 %v4764_v49 }
0x15f8   :  { %v4757_v54 = vadd.f32 %v4753_v45, %v8647_v14 }
0x15fa   :  { %v4767_v31 = vsel %vm396_vm6, %v4757_v54, -inf }
0x15fb   :  { %4768 = vmax.xlane.f32.xlu0 %v4767_v31 }
0x1608   :  { %4802 = vrot.lane.b32.xlu1 %v9127_v43, %s8350_s21 }
0x160c   :  { %4954 = vrot.lane.b32.xlu1 %v9133_v63, %s8350_s21 }
0x1610   :  { %5030 = vrot.lane.b32.xlu1 %v9137_v0, %s8350_s21 }
0x1611   :  { %4878 = vrot.lane.b32.xlu0 %v9125_v21, %s8350_s21 }
0x1614   :  { %5186 = vrot.lane.b32.xlu1 %v9125_v21, %s8351_s3 }
0x1615   :  { %5108 = vrot.lane.b32.xlu0 %v9127_v43, %s8351_s3 }
0x1618   :  { %5184 = vrot.lane.b32.xlu1 %v9125_v21, %s8352_s22 }
0x1619   :  { %5106 = vrot.lane.b32.xlu0 %v9127_v43, %s8352_s22 }
0x167c   :  { %v4760_v34 = vpop.xlane.xlu0 %4759 }
0x167d   :  { %v4770_v58 = vsub.f32 %v4754_v52, %v4760_v34 }
0x167f   :  { %v4774_v60 = vmul.f32 1.442695, %v4770_v58 }
0x1680   :  { %v4763_v61 = vpop.xlane.xlu1 %4762  ;;  %v4766_v36 = vpop.xlane.xlu0 %4765 }
0x1681   :  { %8258 = vpow2.f32 %v4774_v60  ;;  %v4771_v62 = vsub.f32 %v4755_v28, %v4763_v61  ;;  %v4772_v2 = vsub.f32 %v4756_v26, %v4766_v36 }
0x1683   :  { %v4776_v3 = vmul.f32 1.442695, %v4771_v62  ;;  %v4778_v4 = vmul.f32 1.442695, %v4772_v2 }
0x1684   :  { %v4803_v27 = vpop.permute.xlu1 %4802  ;;  %v4769_v5 = vpop.xlane.xlu0 %4768 }
0x1685   :  { %8260 = vpow2.f32 %v4776_v3  ;;  %v4773_v37 = vsub.f32 %v4757_v54, %v4769_v5  ;;  %7961 = vmatpush3.msra.mxu0 %v4803_v27 }
0x1686   :  { %8262 = vpow2.f32 %v4778_v4  ;;  %7970 = vmatprep.subr.mxu0 %v8344_v35 }
0x1687   :  { %v4780_v25 = vmul.f32 1.442695, %v4773_v37 }
0x1688   :  { %v4879_v6 = vpop.permute.xlu0 %4878  ;;  %v4955_v16 = vpop.permute.xlu1 %4954 }
0x1689   :  { %8264 = vpow2.f32 %v4780_v25  ;;  %7966 = vmatpush3.msra.mxu1 %v4879_v6 }
0x168a   :  { %7975 = vmatprep.subr.mxu1 %v8344_v35 }
0x168c   :  { %v5031_v18 = vpop.permute.xlu1 %5030  ;;  %v5109_v29 = vpop.permute.xlu0 %5108 }
0x168e   :  { %v8259_v7 = vpop.eup %8258 }
0x168f   :  { %v4782_v9 = vsel %vm396_vm6, %v8259_v7, 0.0 }
0x1690   :  { %4783 = vadd.xlane.f32.xlu1 %v4782_v9  ;;  %v5187_v17 = vpop.permute.xlu1 %5186  ;;  %v5107_v33 = vpop.permute.xlu0 %5106 }
0x1692   :  { %v8261_v32 = vpop.eup %8260 }
0x1693   :  { %v8263_v10 = vpop.eup %8262  ;;  %v4785_v11 = vsel %vm396_vm6, %v8261_v32, 0.0 }
0x1694   :  { %4786 = vadd.xlane.f32.xlu0 %v4785_v11  ;;  %v4788_v12 = vsel %vm396_vm6, %v8263_v10, 0.0  ;;  %v5185_v19 = vpop.permute.xlu1 %5184 }
0x1695   :  { %4789 = vadd.xlane.f32.xlu1 %v4788_v12 }
0x1696   :  { %v8265_v13 = vpop.eup %8264 }
0x1697   :  { %v4791_v15 = vsel %vm396_vm6, %v8265_v13, 0.0 }
0x1698   :  { %4792 = vadd.xlane.f32.xlu0 %v4791_v15 }
0x16a6   :  { %5342 = vrot.lane.b32.xlu1 %v9137_v0, %s8351_s3 }
0x16aa   :  { %5340 = vrot.lane.b32.xlu1 %v9137_v0, %s8352_s22 }
0x16ae   :  { %5264 = vrot.lane.b32.xlu0 %v9133_v63, %s8351_s3 }
0x16b2   :  { %5262 = vrot.lane.b32.xlu0 %v9133_v63, %s8352_s22 }
0x1719   :  { %v4784_v44 = vpop.xlane.xlu1 %4783 }
0x171a   :  { %8266 = vrcp.f32 %v4784_v44 }
0x171d   :  { %v4787_v38 = vpop.xlane.xlu0 %4786 }
0x171e   :  { %v4790_v52 = vpop.xlane.xlu1 %4789  ;;  %8268 = vrcp.f32 %v4787_v38 }
0x171f   :  { %8270 = vrcp.f32 %v4790_v52 }
0x1721   :  { %v4793_v22 = vpop.xlane.xlu0 %4792 }
0x1722   :  { %8272 = vrcp.f32 %v4793_v22  ;;  %v5343_v45 = vpop.permute.xlu1 %5342 }
0x1725   :  { %v5265_v26 = vpop.permute.xlu0 %5264 }
0x1726   :  { %v5341_v49 = vpop.permute.xlu1 %5340 }
0x1727   :  { %v8267_v50 = vpop.eup %8266 }
0x1728   :  { %v4798_v56 = vmul.f32 %v8267_v50, %v8259_v7 }
0x1729   :  { %v5263_v48 = vpop.permute.xlu0 %5262 }
0x172a   :  { %7963 = vmatmul.mubr.msk.f32.vlgmr.msra.gmra.mxu0 %vm396_vm6, %v4798_v56 }
0x172b   :  { %v8269_v23 = vpop.eup %8268  ;;  %7971 = vmatpush3.msra.mxu0 %v4955_v16  ;;  %7972 = vmatprep.mubr.msk.f32.mxu0 %vm8345_vm5, %v8344_v35 }
0x172c   :  { %v8271_v53 = vpop.eup %8270  ;;  %7980 = vmatprep.subr.mxu0 %v8344_v35  ;;  %v4799_v39 = vmul.f32 %v8269_v23, %v8261_v32 }
0x172d   :  { %v4800_v41 = vmul.f32 %v8271_v53, %v8263_v10 }
0x172e   :  { %7968 = vmatmul.mubr.msk.f32.vlgmr.msra.gmra.mxu1 %vm396_vm6, %v4799_v39 }
0x172f   :  { %v8273_v28 = vpop.eup %8272  ;;  %7973 = vmatmul.mubr.msk.f32.vlgmr.msra.gmra.mxu0 %vm396_vm6, %v4800_v41  ;;  %7976 = vmatpush3.msra.mxu1 %v5031_v18 }
0x1730   :  { %7981 = vmatpush3.xpose.msk.msra.mxu0 %vm396_vm6, %v5109_v29  ;;  %7977 = vmatprep.mubr.msk.f32.mxu1 %vm8345_vm5, %v8344_v35  ;;  %v4801_v42 = vmul.f32 %v8273_v28, %v8265_v13 }
0x1731   :  { %7982 = vmatprep.mubr.msk.f32.mxu0 %vm8345_vm5, %v8344_v35  ;;  %7985 = vmatprep.subr.mxu1 %v8344_v35 }
0x1732   :  { %7990 = vmatprep.subr.mxu0 %v8344_v35  ;;  %7978 = vmatmul.mubr.msk.f32.vlgmr.msra.gmra.mxu1 %vm396_vm6, %v4801_v42 }
0x1733   :  { %7983 = vmatmul.mubr.msk.f32.vlgmr.msra.gmra.mxu0 %vm396_vm6, %v5107_v33  ;;  %7986 = vmatpush3.xpose.msk.msra.mxu1 %vm396_vm6, %v5187_v17 }
0x1734   :  { %7991 = vmatpush3.xpose.msk.msra.mxu0 %vm396_vm6, %v5265_v26  ;;  %7987 = vmatprep.mubr.msk.f32.mxu1 %vm8345_vm5, %v8344_v35 }
0x1735   :  { %7992 = vmatprep.mubr.msk.f32.mxu0 %vm8345_vm5, %v8344_v35  ;;  %7995 = vmatprep.subr.mxu1 %v8344_v35 }
0x1736   :  { %7988 = vmatmul.mubr.msk.f32.vlgmr.msra.gmra.mxu1 %vm396_vm6, %v5185_v19  ;;  %8000 = vmatprep.subr.mxu0 %v8344_v35 }
0x1737   :  { %7993 = vmatmul.mubr.msk.f32.vlgmr.msra.gmra.mxu0 %vm396_vm6, %v5263_v48  ;;  %7996 = vmatpush3.xpose.msk.msra.mxu1 %vm396_vm6, %v5343_v45 }
0x1738   :  { %7997 = vmatprep.mubr.msk.f32.mxu1 %vm8345_vm5, %v8344_v35  ;;  %8005 = vmatprep.subr.mxu1 %v8344_v35 }
0x1739   :  { %8002 = vmatprep.mubr.msk.f32.mxu0 %vm8345_vm5, %v8344_v35 }
0x173a   :  { %7998 = vmatmul.mubr.msk.f32.vlgmr.msra.gmra.mxu1 %vm396_vm6, %v5341_v49 }
0x173b   :  { %8007 = vmatprep.mubr.msk.f32.mxu1 %vm8345_vm5, %v8344_v35 }
0x17ea   :  { %v9317_v51 = vpop.f32.mrf.mxu0 }
0x17ec   :  { %v7964_v54 = vpop.f32.mrf.mxu0 }
0x17ee   :  { %v9319_v31 = vpop.f32.mrf.mxu1 }
0x17ef   :  { %v9321_v34 = vpop.f32.mrf.mxu0 }
0x17f0   :  { %v7969_v58 = vpop.f32.mrf.mxu1 }
0x17f1   :  { %v7974_v60 = vpop.f32.mrf.mxu0 }
0x17f2   :  { %v9323_v61 = vpop.f32.mrf.mxu1 }
0x17f3   :  { %v5180_v36 = vpop.f32.mrf.mxu0 }
0x17f4   :  { %v5418_v62 = vmul.f32 0.35355338, %v5180_v36  ;;  %v7979_v2 = vpop.f32.mrf.mxu1 }
0x17f5   :  { %v7984_v3 = vpop.f32.mrf.mxu0 }
0x17f6   :  { %v5422_v4 = vadd.f32 %v5418_v62, %v8634_v59  ;;  %v5258_v27 = vpop.f32.mrf.mxu1 }
0x17f7   :  { %v5419_v5 = vmul.f32 0.35355338, %v5258_v27  ;;  %v5336_v37 = vpop.f32.mrf.mxu0 }
0x17f8   :  { %v5420_v25 = vmul.f32 0.35355338, %v5336_v37  ;;  %v5426_v6 = vsel %vm396_vm6, %v5422_v4, -inf  ;;  %v7989_v7 = vpop.f32.mrf.mxu1 }
0x17f9   :  { %v5423_v9 = vadd.f32 %v5419_v5, %v8639_v1  ;;  %5427 = vmax.xlane.f32.xlu0 %v5426_v6  ;;  %v7994_v32 = vpop.f32.mrf.mxu0 }
0x17fa   :  { %v5424_v10 = vadd.f32 %v5420_v25, %v8643_v8  ;;  %v5414_v11 = vpop.f32.mrf.mxu1 }
0x17fb   :  { %v5421_v12 = vmul.f32 0.35355338, %v5414_v11  ;;  %v5429_v13 = vsel %vm396_vm6, %v5423_v9, -inf }
0x17fc   :  { %5430 = vmax.xlane.f32.xlu1 %v5429_v13  ;;  %v7999_v15 = vpop.f32.mrf.mxu1  ;;  %v5432_v16 = vsel %vm396_vm6, %v5424_v10, -inf }
0x17fd   :  { %v5425_v18 = vadd.f32 %v5421_v12, %v8647_v14  ;;  %5433 = vmax.xlane.f32.xlu0 %v5432_v16 }
0x17ff   :  { %v5435_v17 = vsel %vm396_vm6, %v5425_v18, -inf }
0x1801   :  { %5436 = vmax.xlane.f32.xlu0 %v5435_v17 }
0x180d   :  { %5470 = vrot.lane.b32.xlu1 %v9127_v43, %s8353_s5 }
0x1811   :  { %5622 = vrot.lane.b32.xlu1 %v9133_v63, %s8353_s5 }
0x1815   :  { %5698 = vrot.lane.b32.xlu1 %v9137_v0, %s8353_s5 }
0x1817   :  { %5546 = vrot.lane.b32.xlu0 %v9125_v21, %s8353_s5 }
0x1819   :  { %5854 = vrot.lane.b32.xlu1 %v9125_v21, %s9703_s8 }
0x181b   :  { %5776 = vrot.lane.b32.xlu0 %v9127_v43, %s9703_s8 }
0x181d   :  { %5852 = vrot.lane.b32.xlu1 %v9125_v21, %s9704_s20 }
0x181f   :  { %5774 = vrot.lane.b32.xlu0 %v9127_v43, %s9704_s20 }
0x1882   :  { %v5428_v29 = vpop.xlane.xlu0 %5427 }
0x1883   :  { %v5438_v19 = vsub.f32 %v5422_v4, %v5428_v29 }
0x1885   :  { %v5442_v33 = vmul.f32 1.442695, %v5438_v19  ;;  %v5431_v44 = vpop.xlane.xlu1 %5430 }
0x1886   :  { %v5439_v38 = vsub.f32 %v5423_v9, %v5431_v44  ;;  %v5434_v52 = vpop.xlane.xlu0 %5433 }
0x1887   :  { %8274 = vpow2.f32 %v5442_v33  ;;  %v5440_v22 = vsub.f32 %v5424_v10, %v5434_v52 }
0x1888   :  { %v5444_v50 = vmul.f32 1.442695, %v5439_v38 }
0x1889   :  { %v5446_v56 = vmul.f32 1.442695, %v5440_v22  ;;  %v5471_v23 = vpop.permute.xlu1 %5470 }
0x188a   :  { %8276 = vpow2.f32 %v5444_v50  ;;  %v5437_v53 = vpop.xlane.xlu0 %5436  ;;  %8001 = vmatpush3.msra.mxu0 %v5471_v23 }
0x188b   :  { %8278 = vpow2.f32 %v5446_v56  ;;  %v5441_v39 = vsub.f32 %v5425_v18, %v5437_v53  ;;  %8010 = vmatprep.subr.mxu0 %v8344_v35 }
0x188d   :  { %v5448_v41 = vmul.f32 1.442695, %v5441_v39  ;;  %v5623_v36 = vpop.permute.xlu1 %5622 }
0x188e   :  { %v5547_v28 = vpop.permute.xlu0 %5546 }
0x188f   :  { %8280 = vpow2.f32 %v5448_v41  ;;  %8006 = vmatpush3.msra.mxu1 %v5547_v28 }
0x1890   :  { %8015 = vmatprep.subr.mxu1 %v8344_v35 }
0x1891   :  { %v5699_v62 = vpop.permute.xlu1 %5698 }
0x1892   :  { %v5777_v3 = vpop.permute.xlu0 %5776 }
0x1894   :  { %v8275_v26 = vpop.eup %8274 }
0x1895   :  { %v5450_v42 = vsel %vm396_vm6, %v8275_v26, 0.0  ;;  %v5855_v2 = vpop.permute.xlu1 %5854 }
0x1896   :  { %5451 = vadd.xlane.f32.xlu1 %v5450_v42  ;;  %v5775_v27 = vpop.permute.xlu0 %5774 }
0x1897   :  { %v8277_v45 = vpop.eup %8276 }
0x1898   :  { %v8279_v48 = vpop.eup %8278  ;;  %v5453_v49 = vsel %vm396_vm6, %v8277_v45, 0.0 }
0x1899   :  { %5454 = vadd.xlane.f32.xlu0 %v5453_v49  ;;  %v5456_v54 = vsel %vm396_vm6, %v8279_v48, 0.0  ;;  %v5853_v4 = vpop.permute.xlu1 %5852 }
0x189a   :  { %5457 = vadd.xlane.f32.xlu1 %v5456_v54 }
0x189c   :  { %v8281_v58 = vpop.eup %8280 }
0x189d   :  { %v5459_v60 = vsel %vm396_vm6, %v8281_v58, 0.0 }
0x189e   :  { %5460 = vadd.xlane.f32.xlu0 %v5459_v60 }
0x18ab   :  { %6010 = vrot.lane.b32.xlu1 %v9137_v0, %s9703_s8 }
0x18af   :  { %6008 = vrot.lane.b32.xlu1 %v9137_v0, %s9704_s20 }
0x18b4   :  { %5932 = vrot.lane.b32.xlu0 %v9133_v63, %s9703_s8 }
0x18b8   :  { %5930 = vrot.lane.b32.xlu0 %v9133_v63, %s9704_s20 }
0x191f   :  { %v5452_v5 = vpop.xlane.xlu1 %5451 }
0x1920   :  { %8282 = vrcp.f32 %v5452_v5 }
0x1922   :  { %v5455_v37 = vpop.xlane.xlu0 %5454 }
0x1923   :  { %v5458_v25 = vpop.xlane.xlu1 %5457  ;;  %8284 = vrcp.f32 %v5455_v37 }
0x1924   :  { %8286 = vrcp.f32 %v5458_v25 }
0x1927   :  { %v5461_v6 = vpop.xlane.xlu0 %5460  ;;  %v6011_v18 = vpop.permute.xlu1 %6010 }
0x1928   :  { %8288 = vrcp.f32 %v5461_v6 }
0x192b   :  { %v5933_v15 = vpop.permute.xlu0 %5932  ;;  %v6009_v29 = vpop.permute.xlu1 %6008 }
0x192d   :  { %v8283_v7 = vpop.eup %8282 }
0x192e   :  { %v5466_v9 = vmul.f32 %v8283_v7, %v8275_v26 }
0x192f   :  { %v5931_v17 = vpop.permute.xlu0 %5930 }
0x1930   :  { %v8285_v32 = vpop.eup %8284  ;;  %8003 = vmatmul.mubr.msk.f32.vlgmr.msra.gmra.mxu0 %vm396_vm6, %v5466_v9 }
0x1931   :  { %v8287_v10 = vpop.eup %8286  ;;  %8011 = vmatpush3.msra.mxu0 %v5623_v36  ;;  %8012 = vmatprep.mubr.msk.f32.mxu0 %vm8345_vm5, %v8344_v35  ;;  %v5467_v11 = vmul.f32 %v8285_v32, %v8277_v45 }
0x1932   :  { %8020 = vmatprep.subr.mxu0 %v8344_v35  ;;  %v5468_v12 = vmul.f32 %v8287_v10, %v8279_v48 }
0x1933   :  { %8008 = vmatmul.mubr.msk.f32.vlgmr.msra.gmra.mxu1 %vm396_vm6, %v5467_v11 }
0x1934   :  { %8013 = vmatmul.mubr.msk.f32.vlgmr.msra.gmra.mxu0 %vm396_vm6, %v5468_v12  ;;  %8016 = vmatpush3.msra.mxu1 %v5699_v62 }
0x1935   :  { %v8289_v13 = vpop.eup %8288  ;;  %8021 = vmatpush3.xpose.msk.msra.mxu0 %vm396_vm6, %v5777_v3  ;;  %8017 = vmatprep.mubr.msk.f32.mxu1 %vm8345_vm5, %v8344_v35 }
0x1936   :  { %8022 = vmatprep.mubr.msk.f32.mxu0 %vm8345_vm5, %v8344_v35  ;;  %8025 = vmatprep.subr.mxu1 %v8344_v35  ;;  %v5469_v16 = vmul.f32 %v8289_v13, %v8281_v58 }
0x1937   :  { %8030 = vmatprep.subr.mxu0 %v8344_v35 }
0x1938   :  { %8018 = vmatmul.mubr.msk.f32.vlgmr.msra.gmra.mxu1 %vm396_vm6, %v5469_v16  ;;  %8023 = vmatmul.mubr.msk.f32.vlgmr.msra.gmra.mxu0 %vm396_vm6, %v5775_v27 }
0x1939   :  { %8026 = vmatpush3.xpose.msk.msra.mxu1 %vm396_vm6, %v5855_v2  ;;  %8031 = vmatpush3.xpose.msk.msra.mxu0 %vm396_vm6, %v5933_v15 }
0x193a   :  { %8027 = vmatprep.mubr.msk.f32.mxu1 %vm8345_vm5, %v8344_v35  ;;  %8032 = vmatprep.mubr.msk.f32.mxu0 %vm8345_vm5, %v8344_v35 }
0x193b   :  { %8035 = vmatprep.subr.mxu1 %v8344_v35  ;;  %8040 = vmatprep.subr.mxu0 %v8344_v35 }
0x193c   :  { %8028 = vmatmul.mubr.msk.f32.vlgmr.msra.gmra.mxu1 %vm396_vm6, %v5853_v4  ;;  %8033 = vmatmul.mubr.msk.f32.vlgmr.msra.gmra.mxu0 %vm396_vm6, %v5931_v17 }
0x193d   :  { %8036 = vmatpush3.xpose.msk.msra.mxu1 %vm396_vm6, %v6011_v18  ;;  %8037 = vmatprep.mubr.msk.f32.mxu1 %vm8345_vm5, %v8344_v35 }
0x193e   :  { %8045 = vmatprep.subr.mxu1 %v8344_v35  ;;  %8042 = vmatprep.mubr.msk.f32.mxu0 %vm8345_vm5, %v8344_v35 }
0x1940   :  { %8038 = vmatmul.mubr.msk.f32.vlgmr.msra.gmra.mxu1 %vm396_vm6, %v6009_v29 }
0x1941   :  { %8047 = vmatprep.mubr.msk.f32.mxu1 %vm8345_vm5, %v8344_v35 }
0x19f0   :  { %v9397_v19 = vpop.f32.mrf.mxu0 }
0x19f2   :  { %v8004_v33 = vpop.f32.mrf.mxu0 }
0x19f3   :  { %v9399_v44 = vpop.f32.mrf.mxu1 }
0x19f4   :  { %v9401_v38 = vpop.f32.mrf.mxu0 }
0x19f5   :  { %v8009_v52 = vpop.f32.mrf.mxu1 }
0x19f6   :  { %v8014_v22 = vpop.f32.mrf.mxu0 }
0x19f8   :  { %v9403_v50 = vpop.f32.mrf.mxu1  ;;  %v5848_v56 = vpop.f32.mrf.mxu0 }
0x19f9   :  { %v6086_v23 = vmul.f32 0.35355338, %v5848_v56 }
0x19fa   :  { %v8019_v53 = vpop.f32.mrf.mxu1  ;;  %v8024_v39 = vpop.f32.mrf.mxu0 }
0x19fb   :  { %v6090_v41 = vadd.f32 %v6086_v23, %v8634_v59  ;;  %v7329_v53 = vld [vmem:[%s9669_s9 + $0x38] sm:$0xff]  ;;  %v7328_v39 = vld [vmem:[%s9669_s9 + $0x30] sm:$0xff] }
0x19fc   :  { %v5926_v28 = vpop.f32.mrf.mxu1  ;;  %v6004_v26 = vpop.f32.mrf.mxu0 }
0x19fd   :  { %v6087_v42 = vmul.f32 0.35355338, %v5926_v28  ;;  %v6088_v45 = vmul.f32 0.35355338, %v6004_v26  ;;  %v6094_v48 = vsel %vm396_vm6, %v6090_v41, -inf }
0x19fe   :  { %6095 = vmax.xlane.f32.xlu0 %v6094_v48  ;;  %v8029_v49 = vpop.f32.mrf.mxu1  ;;  %v8034_v54 = vpop.f32.mrf.mxu0 }
0x19ff   :  { %v6091_v58 = vadd.f32 %v6087_v42, %v8639_v1  ;;  %v6092_v60 = vadd.f32 %v6088_v45, %v8643_v8 }
0x1a00   :  { %v6082_v36 = vpop.f32.mrf.mxu1 }
0x1a01   :  { %v6089_v62 = vmul.f32 0.35355338, %v6082_v36  ;;  %v6097_v2 = vsel %vm396_vm6, %v6091_v58, -inf  ;;  %v6100_v3 = vsel %vm396_vm6, %v6092_v60, -inf }
0x1a02   :  { %6098 = vmax.xlane.f32.xlu1 %v6097_v2  ;;  %v8039_v59 = vpop.f32.mrf.mxu1  ;;  %6101 = vmax.xlane.f32.xlu0 %v6100_v3 }
0x1a03   :  { %v6093_v4 = vadd.f32 %v6089_v62, %v8647_v14 }
0x1a05   :  { %v6103_v27 = vsel %vm396_vm6, %v6093_v4, -inf }
0x1a06   :  { %6104 = vmax.xlane.f32.xlu0 %v6103_v27 }
0x1a13   :  { %6138 = vrot.lane.b32.xlu1 %v9127_v43, %s9705_s1 }
0x1a87   :  { %v6096_v1 = vpop.xlane.xlu0 %6095 }
0x1a88   :  { %v6106_v5 = vsub.f32 %v6090_v41, %v6096_v1  ;;  %v7327_v41 = vld [vmem:[%s9669_s9 + $0x28] sm:$0xff] }
0x1a8a   :  { %v6110_v8 = vmul.f32 1.442695, %v6106_v5 }
0x1a8b   :  { %v6099_v37 = vpop.xlane.xlu1 %6098  ;;  %v6102_v25 = vpop.xlane.xlu0 %6101 }
0x1a8c   :  { %8290 = vpow2.f32 %v6110_v8  ;;  %v6107_v6 = vsub.f32 %v6091_v58, %v6099_v37  ;;  %v6108_v7 = vsub.f32 %v6092_v60, %v6102_v25 }
0x1a8e   :  { %v6112_v9 = vmul.f32 1.442695, %v6107_v6  ;;  %v6114_v32 = vmul.f32 1.442695, %v6108_v7 }
0x1a8f   :  { %v6139_v10 = vpop.permute.xlu1 %6138  ;;  %v6105_v11 = vpop.xlane.xlu0 %6104 }
0x1a90   :  { %8292 = vpow2.f32 %v6112_v9  ;;  %v6109_v14 = vsub.f32 %v6093_v4, %v6105_v11  ;;  %8041 = vmatpush3.msra.mxu0 %v6139_v10 }
0x1a91   :  { %8294 = vpow2.f32 %v6114_v32  ;;  %8050 = vmatprep.subr.mxu0 %v8344_v35 }
0x1a92   :  { %v6116_v12 = vmul.f32 1.442695, %v6109_v14 }
0x1a94   :  { %8296 = vpow2.f32 %v6116_v12 }
0x1a99   :  { %v8291_v43 = vpop.eup %8290 }
0x1a9a   :  { %v6118_v13 = vsel %vm396_vm6, %v8291_v43, 0.0 }
0x1a9b   :  { %6119 = vadd.xlane.f32.xlu1 %v6118_v13 }
0x1a9d   :  { %v8293_v15 = vpop.eup %8292 }
0x1a9e   :  { %v8295_v16 = vpop.eup %8294  ;;  %v6121_v18 = vsel %vm396_vm6, %v8293_v15, 0.0 }
0x1a9f   :  { %6122 = vadd.xlane.f32.xlu0 %v6121_v18  ;;  %v6124_v17 = vsel %vm396_vm6, %v8295_v16, 0.0 }
0x1aa0   :  { %6125 = vadd.xlane.f32.xlu1 %v6124_v17 }
0x1aa1   :  { %v8297_v29 = vpop.eup %8296 }
0x1aa2   :  { %v6127_v33 = vsel %vm396_vm6, %v8297_v29, 0.0 }
0x1aa3   :  { %6128 = vadd.xlane.f32.xlu0 %v6127_v33 }
0x1ab1   :  { %6290 = vrot.lane.b32.xlu1 %v9133_v63, %s9705_s1 }
0x1ab5   :  { %6366 = vrot.lane.b32.xlu1 %v9137_v0, %s9705_s1 }
0x1ab9   :  { %6448 = vrot.lane.b32.xlu1 %v9319_v31, %s9706_s0  ;;  %6214 = vrot.lane.b32.xlu0 %v9125_v21, %s9705_s1 }
0x1abd   :  { %6464 = vrot.lane.b32.xlu1 %v9399_v44, %s8358_s26  ;;  %6446 = vrot.lane.b32.xlu0 %v9317_v51, %s9706_s0 }
0x1ac1   :  { %6452 = vrot.lane.b32.xlu1 %v9323_v61, %s9706_s0  ;;  %6462 = vrot.lane.b32.xlu0 %v9397_v19, %s8358_s26 }
0x1ac5   :  { %6468 = vrot.lane.b32.xlu1 %v9403_v50, %s8358_s26  ;;  %6450 = vrot.lane.b32.xlu0 %v9321_v34, %s9706_s0 }
0x1ac9   :  { %6466 = vrot.lane.b32.xlu0 %v9401_v38, %s8358_s26 }
0x1b24   :  { %v6120_v21 = vpop.xlane.xlu1 %6119 }
0x1b25   :  { %8298 = vrcp.f32 %v6120_v21 }
0x1b28   :  { %v6123_v63 = vpop.xlane.xlu0 %6122 }
0x1b29   :  { %v6126_v0 = vpop.xlane.xlu1 %6125  ;;  %8300 = vrcp.f32 %v6123_v63 }
0x1b2a   :  { %8302 = vrcp.f32 %v6126_v0 }
0x1b2c   :  { %v6129_v51 = vpop.xlane.xlu0 %6128 }
0x1b2d   :  { %8304 = vrcp.f32 %v6129_v51  ;;  %v6291_v19 = vpop.permute.xlu1 %6290 }
0x1b30   :  { %v6215_v31 = vpop.permute.xlu0 %6214 }
0x1b31   :  { %8046 = vmatpush3.msra.mxu1 %v6215_v31  ;;  %v6367_v50 = vpop.permute.xlu1 %6366 }
0x1b32   :  { %v8299_v61 = vpop.eup %8298  ;;  %8055 = vmatprep.subr.mxu1 %v8344_v35 }
0x1b33   :  { %v6134_v44 = vmul.f32 %v8299_v61, %v8291_v43  ;;  %v7331_v43 = vld [vmem:[%s9670_s10 + $0x1] ss:$0 sm:$0xff] }
0x1b34   :  { %v6447_v60 = vpop.permute.xlu0 %6446 }
0x1b35   :  { %8043 = vmatmul.mubr.msk.f32.vlgmr.msra.gmra.mxu0 %vm396_vm6, %v6134_v44  ;;  %v6449_v36 = vpop.permute.xlu1 %6448  ;;  %v6490_v27 = vsel %vm396_vm6, %v9237_v40, %v6447_v60  ;;  %v7340_v60 = vld [vmem:[%s9671_s13 + $0x20] sm:$0xff] }
0x1b36   :  { %v8301_v34 = vpop.eup %8300  ;;  %8051 = vmatpush3.msra.mxu0 %v6291_v19  ;;  %8052 = vmatprep.mubr.msk.f32.mxu0 %vm8345_vm5, %v8344_v35  ;;  %v6491_v25 = vsel %vm396_vm6, %v9239_v20, %v6449_v36 }
0x1b37   :  { %v8303_v38 = vpop.eup %8302  ;;  %v6135_v52 = vmul.f32 %v8301_v34, %v8293_v15 }
0x1b38   :  { %v6136_v22 = vmul.f32 %v8303_v38, %v8295_v16  ;;  %v6463_v62 = vpop.permute.xlu0 %6462 }
0x1b39   :  { %8048 = vmatmul.mubr.msk.f32.vlgmr.msra.gmra.mxu1 %vm396_vm6, %v6135_v52  ;;  %v6465_v2 = vpop.permute.xlu1 %6464  ;;  %v6494_v1 = vsel %vm3138_vm7, %v6490_v27, %v6463_v62 }
0x1b3a   :  { %v8305_v56 = vpop.eup %8304  ;;  %8053 = vmatmul.mubr.msk.f32.vlgmr.msra.gmra.mxu0 %vm396_vm6, %v6136_v22  ;;  %8056 = vmatpush3.msra.mxu1 %v6367_v50  ;;  %v6495_v6 = vsel %vm3138_vm7, %v6491_v25, %v6465_v2 }
0x1b3b   :  { %8057 = vmatprep.mubr.msk.f32.mxu1 %vm8345_vm5, %v8344_v35  ;;  %v6137_v23 = vmul.f32 %v8305_v56, %v8297_v29  ;;  %8060 = vmatprep.subr.mxu1 %v7329_v53  ;;  %v7326_v35 = vld [vmem:[%s9669_s9 + $0x20] sm:$0xff] }
0x1b3c   :  { %v6451_v3 = vpop.permute.xlu0 %6450 }
0x1b3d   :  { %8058 = vmatmul.mubr.msk.f32.vlgmr.msra.gmra.mxu1 %vm396_vm6, %v6137_v23  ;;  %v6453_v59 = vpop.permute.xlu1 %6452  ;;  %v6492_v7 = vsel %vm396_vm6, %v9241_v24, %v6451_v3 }
0x1b3e   :  { %8061 = vmatpush3.msra.mxu1 %v7329_v53  ;;  %v6493_v14 = vsel %vm396_vm6, %v9243_v30, %v6453_v59 }
0x1b3f   :  { %8062 = vmatprep.subr.mxu1 %v7328_v39 }
0x1b40   :  { %8063 = vmatpush3.msra.mxu1 %v7328_v39  ;;  %v6467_v4 = vpop.permute.xlu0 %6466 }
0x1b41   :  { %8064 = vmatprep.subr.mxu1 %v7327_v41  ;;  %v6469_v5 = vpop.permute.xlu1 %6468  ;;  %v6496_v32 = vsel %vm3138_vm7, %v6492_v7, %v6467_v4 }
0x1b42   :  { %8065 = vmatpush3.msra.mxu1 %v7327_v41  ;;  %v6497_v20 = vsel %vm3138_vm7, %v6493_v14, %v6469_v5 }
0x1b43   :  { %8066 = vmatprep.subr.mxu1 %v7326_v35 }
0x1b44   :  { %8067 = vmatpush3.msra.mxu1 %v7326_v35 }
0x1bf5   :  { %v6210_v28 = vpop.f32.mrf.mxu0 }
0x1bf6   :  { %6478 = vrot.lane.b32.xlu0 %v6210_v28, %s9707_s4 }
0x1bf7   :  { %v8044_v26 = vpop.f32.mrf.mxu0 }
0x1bf9   :  { %v6286_v42 = vpop.f32.mrf.mxu1 }
0x1bfa   :  { %v6362_v45 = vpop.f32.mrf.mxu0  ;;  %6480 = vrot.lane.b32.xlu1 %v6286_v42, %s9707_s4 }
0x1bfb   :  { %6482 = vrot.lane.b32.xlu0 %v6362_v45, %s9707_s4  ;;  %v8049_v48 = vpop.f32.mrf.mxu1 }
0x1bfc   :  { %v8054_v49 = vpop.f32.mrf.mxu0 }
0x1bfd   :  { %v6438_v54 = vpop.f32.mrf.mxu1  ;;  %v7343_v49 = vld [vmem:[%s9671_s13 + $0x38] sm:$0xff] }
0x1bfe   :  { %6484 = vrot.lane.b32.xlu1 %v6438_v54, %s9707_s4  ;;  %v7342_v54 = vld [vmem:[%s9671_s13 + $0x30] sm:$0xff]  ;;  %8074 = vmatprep.subr.mxu1 %v7343_v49 }
0x1bff   :  { %v8059_v58 = vpop.f32.mrf.mxu1 }
0x1c00   :  { %v7341_v58 = vld [vmem:[%s9671_s13 + $0x28] sm:$0xff] }
0x1c68   :  { %v6479_v8 = vpop.permute.xlu0 %6478 }
0x1c69   :  { %v6498_v37 = vsel %vm3143_vm8, %v6494_v1, %v6479_v8 }
0x1c6a   :  { %8068 = vmatprep.mubr.msk.f32.mxu1 %vm199_vm4, %v6498_v37 }
0x1c6c   :  { %v6481_v9 = vpop.permute.xlu1 %6480 }
0x1c6d   :  { %v6499_v40 = vsel %vm3143_vm8, %v6495_v6, %v6481_v9  ;;  %v6483_v10 = vpop.permute.xlu0 %6482  ;;  %v7338_v9 = vld [vmem:[%s9672_s11 + $0x1] ss:$0 sm:$0xff] }
0x1c6e   :  { %v6500_v11 = vsel %vm3143_vm8, %v6496_v32, %v6483_v10  ;;  %8069 = vmatmul.mubr.msk.f32.vlgmr.msra.gmra.mxu1 %vm199_vm4, %v6499_v40 }
0x1c6f   :  { %8071 = vmatprep.mubr.msk.f32.mxu1 %vm199_vm4, %v6500_v11  ;;  %8075 = vmatpush3.msra.mxu1 %v7343_v49  ;;  %v7339_v11 = vld [vmem:[%s9673_s12 + $0x1] ss:$0 sm:$0xff] }
0x1c70   :  { %v6485_v12 = vpop.permute.xlu1 %6484  ;;  %8076 = vmatprep.subr.mxu1 %v7342_v54 }
0x1c71   :  { %v6501_v24 = vsel %vm3143_vm8, %v6497_v20, %v6485_v12  ;;  %8077 = vmatpush3.msra.mxu1 %v7342_v54 }
0x1c72   :  { %8072 = vmatmul.mubr.msk.f32.gmra.mxu1 %vm199_vm4, %v6501_v24  ;;  %8078 = vmatprep.subr.mxu1 %v7341_v58 }
0x1c73   :  { %8079 = vmatpush3.msra.mxu1 %v7341_v58 }
0x1c74   :  { %8080 = vmatprep.subr.mxu1 %v7340_v60 }
0x1c75   :  { %8081 = vmatpush3.msra.mxu1 %v7340_v60 }
0x1d2e   :  { %v8070_v13 = vpop.f32.mrf.mxu1 }
0x1d2f   :  { %v6599_v15 = vadd.f32 %v8070_v13, %v7331_v43 }
0x1d30   :  { %v6593_v16 = vpop.f32.mrf.mxu1 }
0x1d31   :  { %v6613_v18 = vadd.f32 %v6599_v15, %v9106_v47  ;;  %v6594_v17 = vadd.f32 %v7331_v43, %v6593_v16 }
0x1d32   :  { %v8073_v30 = vpop.f32.mrf.mxu1 }
0x1d33   :  { %v6612_v29 = vadd.f32 %v6594_v17, %v9104_v46  ;;  %v6623_v33 = vsel %vm199_vm4, %v6613_v18, 0.0  ;;  %v6609_v63 = vadd.f32 %v8073_v30, %v7331_v43 }
0x1d34   :  { %6624 = vadd.xlane.f32.xlu1 %v6623_v33  ;;  %v6603_v21 = vpop.f32.mrf.mxu1  ;;  %v7364_v33 = vld [vmem:[%s9674_s15 + $0xf0] sm:$0xff] }
0x1d35   :  { %v6604_v0 = vadd.f32 %v7331_v43, %v6603_v21  ;;  %v6620_v51 = vsel %vm199_vm4, %v6612_v29, 0.0  ;;  %v6615_v61 = vadd.f32 %v6609_v63, %v9114_v57  ;;  %v7363_v21 = vld [vmem:[%s9674_s15 + $0xe8] sm:$0xff]  ;;  %v7362_v63 = vld [vmem:[%s9674_s15 + $0xe0] sm:$0xff] }
0x1d36   :  { %6621 = vadd.xlane.f32.xlu0 %v6620_v51  ;;  %v7360_v51 = vld [vmem:[%s9674_s15 + $0xd0] sm:$0xff] }
0x1d37   :  { %v6614_v31 = vadd.f32 %v6604_v0, %v9112_v55  ;;  %v6629_v47 = vsel %vm199_vm4, %v6615_v61, 0.0  ;;  %v7361_v0 = vld [vmem:[%s9674_s15 + $0xd8] sm:$0xff] }
0x1d39   :  { %v6626_v19 = vsel %vm199_vm4, %v6614_v31, 0.0 }
0x1d3a   :  { %6627 = vadd.xlane.f32.xlu0 %v6626_v19  ;;  %v7357_v19 = vld [vmem:[%s9674_s15 + $0xb8] sm:$0xff] }
0x1d3e   :  { %6630 = vadd.xlane.f32.xlu0 %v6629_v47  ;;  %v7356_v47 = vld [vmem:[%s9674_s15 + $0xb0] sm:$0xff] }
0x1dbd   :  { %v6625_v46 = vpop.xlane.xlu1 %6624 }
0x1dbe   :  { %v6633_v44 = vmul.f32 0.03125, %v6625_v46  ;;  %v7355_v46 = vld [vmem:[%s9674_s15 + $0xa8] sm:$0xff] }
0x1dbf   :  { %v6622_v34 = vpop.xlane.xlu0 %6621 }
0x1dc0   :  { %v6637_v38 = vsub.f32 %v6613_v18, %v6633_v44  ;;  %v6632_v52 = vmul.f32 0.03125, %v6622_v34  ;;  %v7354_v44 = vld [vmem:[%s9674_s15 + $0xa0] sm:$0xff]  ;;  %v7353_v34 = vld [vmem:[%s9674_s15 + $0x98] sm:$0xff] }
0x1dc2   :  { %v6636_v22 = vsub.f32 %v6612_v29, %v6632_v52  ;;  %v6641_v50 = vmul.f32 %v6637_v38, %v6637_v38  ;;  %v7365_v29 = vld [vmem:[%s9674_s15 + $0xf8] sm:$0xff]  ;;  %v7351_v52 = vld [vmem:[%s9674_s15 + $0x88] sm:$0xff] }
0x1dc3   :  { %v6628_v56 = vpop.xlane.xlu0 %6627  ;;  %8088 = vmatprep.subr.mxu0 %v7365_v29 }
0x1dc4   :  { %v6634_v23 = vmul.f32 0.03125, %v6628_v56  ;;  %v6647_v53 = vsel %vm199_vm4, %v6641_v50, 0.0  ;;  %v6640_v55 = vmul.f32 %v6636_v22, %v6636_v22  ;;  %8089 = vmatpush3.msra.mxu0 %v7365_v29  ;;  %v7345_v50 = vld [vmem:[%s9675_s14 + $0x1] ss:$0 sm:$0xff] }
0x1dc5   :  { %6648 = vadd.xlane.f32.xlu0 %v6647_v53  ;;  %8090 = vmatprep.subr.mxu0 %v7364_v33 }
0x1dc6   :  { %v6638_v57 = vsub.f32 %v6614_v31, %v6634_v23  ;;  %v6644_v39 = vsel %vm199_vm4, %v6640_v55, 0.0  ;;  %8091 = vmatpush3.msra.mxu0 %v7364_v33  ;;  %v7359_v31 = vld [vmem:[%s9674_s15 + $0xc8] sm:$0xff]  ;;  %v7367_v33 = vld [vmem:[%s9676_s16 + $0x1] ss:$0 sm:$0xff] }
0x1dc7   :  { %6645 = vadd.xlane.f32.xlu1 %v6644_v39  ;;  %v6631_v41 = vpop.xlane.xlu0 %6630  ;;  %8092 = vmatprep.subr.mxu0 %v7363_v21 }
0x1dc8   :  { %v6635_v35 = vmul.f32 0.03125, %v6631_v41  ;;  %v6642_v28 = vmul.f32 %v6638_v57, %v6638_v57  ;;  %8093 = vmatpush3.msra.mxu0 %v7363_v21 }
0x1dc9   :  { %8094 = vmatprep.subr.mxu0 %v7362_v63 }
0x1dca   :  { %v6639_v26 = vsub.f32 %v6615_v61, %v6635_v35  ;;  %v6650_v42 = vsel %vm199_vm4, %v6642_v28, 0.0  ;;  %8095 = vmatpush3.msra.mxu0 %v7362_v63  ;;  %v7358_v61 = vld [vmem:[%s9674_s15 + $0xc0] sm:$0xff] }
0x1dcb   :  { %6651 = vadd.xlane.f32.xlu1 %v6650_v42  ;;  %8096 = vmatprep.subr.mxu0 %v7361_v0 }
0x1dcc   :  { %v6643_v45 = vmul.f32 %v6639_v26, %v6639_v26  ;;  %8097 = vmatpush3.msra.mxu0 %v7361_v0 }
0x1dcd   :  { %8098 = vmatprep.subr.mxu0 %v7360_v51 }
0x1dce   :  { %v6653_v48 = vsel %vm199_vm4, %v6643_v45, 0.0  ;;  %8099 = vmatpush3.msra.mxu0 %v7360_v51 }
0x1dcf   :  { %6654 = vadd.xlane.f32.xlu0 %v6653_v48  ;;  %8100 = vmatprep.subr.mxu0 %v7359_v31 }
0x1dd0   :  { %8101 = vmatpush3.msra.mxu0 %v7359_v31 }
0x1dd1   :  { %8102 = vmatprep.subr.mxu0 %v7358_v61 }
0x1dd2   :  { %8103 = vmatpush3.msra.mxu0 %v7358_v61 }
0x1dd3   :  { %8104 = vmatprep.subr.mxu0 %v7357_v19 }
0x1dd4   :  { %8105 = vmatpush3.msra.mxu0 %v7357_v19 }
0x1dd5   :  { %8106 = vmatprep.subr.mxu0 %v7356_v47 }
0x1dd6   :  { %8107 = vmatpush3.msra.mxu0 %v7356_v47 }
0x1dd7   :  { %8108 = vmatprep.subr.mxu0 %v7355_v46 }
0x1dd8   :  { %8109 = vmatpush3.msra.mxu0 %v7355_v46 }
0x1dd9   :  { %8110 = vmatprep.subr.mxu0 %v7354_v44 }
0x1dda   :  { %8111 = vmatpush3.msra.mxu0 %v7354_v44 }
0x1ddb   :  { %8112 = vmatprep.subr.mxu0 %v7353_v34 }
0x1ddc   :  { %8113 = vmatpush3.msra.mxu0 %v7353_v34 }
0x1e4e   :  { %v6649_v36 = vpop.xlane.xlu0 %6648 }
0x1e4f   :  { %v6657_v62 = vmul.f32 0.03125, %v6649_v36 }
0x1e50   :  { %v6646_v2 = vpop.xlane.xlu1 %6645 }
0x1e51   :  { %v6661_v3 = vadd.f32 1e-05, %v6657_v62  ;;  %v6656_v59 = vmul.f32 0.03125, %v6646_v2 }
0x1e53   :  { %8306 = vrsqrt.f32 %v6661_v3  ;;  %v6660_v4 = vadd.f32 1e-05, %v6656_v59 }
0x1e54   :  { %v6652_v27 = vpop.xlane.xlu1 %6651 }
0x1e55   :  { %8308 = vrsqrt.f32 %v6660_v4  ;;  %v6658_v1 = vmul.f32 0.03125, %v6652_v27 }
0x1e57   :  { %v6662_v5 = vadd.f32 1e-05, %v6658_v1 }
0x1e58   :  { %v6655_v8 = vpop.xlane.xlu0 %6654 }
0x1e59   :  { %8310 = vrsqrt.f32 %v6662_v5  ;;  %v6659_v37 = vmul.f32 0.03125, %v6655_v8 }
0x1e5b   :  { %v6663_v25 = vadd.f32 1e-05, %v6659_v37 }
0x1e5d   :  { %8312 = vrsqrt.f32 %v6663_v25 }
0x1e60   :  { %v8307_v6 = vpop.eup %8306 }
0x1e61   :  { %v6669_v7 = vmul.f32 %v8307_v6, %v6637_v38  ;;  %v7352_v38 = vld [vmem:[%s9674_s15 + $0x90] sm:$0xff] }
0x1e62   :  { %v8309_v32 = vpop.eup %8308  ;;  %8114 = vmatprep.subr.mxu0 %v7352_v38 }
0x1e63   :  { %v6668_v40 = vmul.f32 %v8309_v32, %v6636_v22  ;;  %v6679_v10 = vmul.f32 %v7338_v9, %v6669_v7  ;;  %8115 = vmatpush3.msra.mxu0 %v7352_v38  ;;  %v7350_v22 = vld [vmem:[%s9674_s15 + $0x80] sm:$0xff] }
0x1e64   :  { %8116 = vmatprep.subr.mxu0 %v7351_v52 }
0x1e65   :  { %v6678_v14 = vmul.f32 %v7338_v9, %v6668_v40  ;;  %v9522_v43 = vadd.f32 %v7339_v11, %v6679_v10  ;;  %8117 = vmatpush3.msra.mxu0 %v7351_v52 }
0x1e66   :  { %v8311_v20 = vpop.eup %8310  ;;  %8118 = vmatprep.subr.mxu0 %v7350_v22 }
0x1e67   :  { %v9520_v12 = vadd.f32 %v7339_v11, %v6678_v14  ;;  %v6670_v24 = vmul.f32 %v8311_v20, %v6638_v57  ;;  %8119 = vmatpush3.msra.mxu0 %v7350_v22 }
0x1e69   :  { %8082 = vmatprep.mubr.msk.f32.mxu1 %vm199_vm4, %v9520_v12  ;;  %v6680_v13 = vmul.f32 %v7338_v9, %v6670_v24 }
0x1e6a   :  { %v8313_v15 = vpop.eup %8312  ;;  %8083 = vmatmul.mubr.msk.f32.vlgmr.msra.gmra.mxu1 %vm199_vm4, %v9522_v43 }
0x1e6b   :  { %v9528_v16 = vadd.f32 %v7339_v11, %v6680_v13  ;;  %v6671_v18 = vmul.f32 %v8313_v15, %v6639_v26 }
0x1e6d   :  { %8085 = vmatprep.mubr.msk.f32.mxu1 %vm199_vm4, %v9528_v16  ;;  %v6681_v17 = vmul.f32 %v7338_v9, %v6671_v18 }
0x1e6f   :  { %v9532_v30 = vadd.f32 %v7339_v11, %v6681_v17 }
0x1e71   :  { %8086 = vmatmul.mubr.msk.f32.gmra.mxu1 %vm199_vm4, %v9532_v30 }
0x1f2a   :  { %v8084_v56 = vpop.f32.mrf.mxu1 }
0x1f2b   :  { %v6789_v23 = vadd.f32 %v8084_v56, %v7345_v50 }
0x1f2c   :  { %v6783_v53 = vpop.f32.mrf.mxu1 }
0x1f2d   :  { %v6807_v55 = vmul.f32 0.044715, %v6789_v23  ;;  %v6784_v57 = vadd.f32 %v7345_v50, %v6783_v53  ;;  %v6803_v40 = vmul.f32 0.5, %v6789_v23 }
0x1f2f   :  { %v6811_v39 = vmul.f32 %v6807_v55, %v6789_v23  ;;  %v6806_v41 = vmul.f32 0.044715, %v6784_v57  ;;  %v6802_v9 = vmul.f32 0.5, %v6784_v57 }
0x1f31   :  { %v6815_v35 = vmul.f32 %v6811_v39, %v6789_v23  ;;  %v6810_v28 = vmul.f32 %v6806_v41, %v6784_v57  ;;  %v8087_v26 = vpop.f32.mrf.mxu1 }
0x1f32   :  { %v6799_v42 = vadd.f32 %v8087_v26, %v7345_v50 }
0x1f33   :  { %v6819_v45 = vadd.f32 %v6815_v35, %v6789_v23  ;;  %v6793_v48 = vpop.f32.mrf.mxu1  ;;  %v6814_v49 = vmul.f32 %v6810_v28, %v6784_v57 }
0x1f34   :  { %v6809_v54 = vmul.f32 0.044715, %v6799_v42  ;;  %v6794_v58 = vadd.f32 %v7345_v50, %v6793_v48  ;;  %v6805_v18 = vmul.f32 0.5, %v6799_v42  ;;  %v7028_v50 = vld [vmem:[%s9679_s2] sm:$0xff] }
0x1f35   :  { %v6818_v60 = vadd.f32 %v6814_v49, %v6784_v57  ;;  %v6823_v36 = vmul.f32 0.7978846, %v6819_v45  ;;  %v7085_v56 = vsel %vm7084_vm9, %v7028_v50, 0.0 }
0x1f36   :  { %v6813_v62 = vmul.f32 %v6809_v54, %v6799_v42  ;;  %v6808_v2 = vmul.f32 0.044715, %v6794_v58  ;;  %v6804_v13 = vmul.f32 0.5, %v6794_v58 }
0x1f37   :  { %v6822_v3 = vmul.f32 0.7978846, %v6818_v60  ;;  %8314 = vtanh.f32 %v6823_v36 }
0x1f38   :  { %v6812_v59 = vmul.f32 %v6808_v2, %v6794_v58  ;;  %v6817_v4 = vmul.f32 %v6813_v62, %v6799_v42 }
0x1f39   :  { %8316 = vtanh.f32 %v6822_v3 }
0x1f3a   :  { %v6816_v27 = vmul.f32 %v6812_v59, %v6794_v58  ;;  %v6821_v1 = vadd.f32 %v6817_v4, %v6799_v42 }
0x1f3c   :  { %v6820_v5 = vadd.f32 %v6816_v27, %v6794_v58  ;;  %v6825_v8 = vmul.f32 0.7978846, %v6821_v1 }
0x1f3e   :  { %v6824_v37 = vmul.f32 0.7978846, %v6820_v5  ;;  %8318 = vtanh.f32 %v6825_v8 }
0x1f40   :  { %8320 = vtanh.f32 %v6824_v37 }
0x1f44   :  { %v8315_v25 = vpop.eup %8314 }
0x1f45   :  { %v6831_v7 = vadd.f32 1.0, %v8315_v25 }
0x1f46   :  { %v8317_v6 = vpop.eup %8316 }
0x1f47   :  { %v6830_v32 = vadd.f32 1.0, %v8317_v6  ;;  %v6835_v11 = vmul.f32 %v6831_v7, %v6803_v40  ;;  %v7029_v7 = vld [vmem:[%s9679_s2 + $0x8] sm:$0xff]  ;;  %v7031_v40 = vld [vmem:[%s9679_s2 + $0x18] sm:$0xff] }
0x1f49   :  { %v6834_v10 = vmul.f32 %v6830_v32, %v6802_v9  ;;  %v7092_v9 = vsel %vm7084_vm9, %v7029_v7, 0.0 }
0x1f4b   :  { %v8319_v14 = vpop.eup %8318  ;;  %8120 = vmatprep.mubr.f32.mxu0 %v6834_v10  ;;  %v7093_v10 = vrot.slane %v7092_v9, 4 }
0x1f4c   :  { %8121 = vmatmul.mubr.f32.vlgmr.msra.gmra.mxu0 %v6835_v11  ;;  %v6833_v24 = vadd.f32 1.0, %v8319_v14  ;;  %v7106_v11 = vsel %vm7084_vm9, %v7031_v40, 0.0 }
0x1f4d   :  { %v8321_v20 = vpop.eup %8320 }
0x1f4e   :  { %v6832_v15 = vadd.f32 1.0, %v8321_v20  ;;  %v6837_v29 = vmul.f32 %v6833_v24, %v6805_v18  ;;  %v7094_v20 = vadd.f32 %v7093_v10, %v7092_v9  ;;  %v7107_v24 = vrot.slane %v7106_v11, 4 }
0x1f50   :  { %v6836_v17 = vmul.f32 %v6832_v15, %v6804_v13  ;;  %v7095_v15 = vrot.slane %v7094_v20, 2  ;;  %v7108_v18 = vadd.f32 %v7107_v24, %v7106_v11 }
0x1f52   :  { %8123 = vmatprep.mubr.f32.mxu0 %v6836_v17 }
0x1f53   :  { %8124 = vmatmul.mubr.f32.gmra.mxu0 %v6837_v29  ;;  %v7096_v29 = vadd.f32 %v7095_v15, %v7094_v20 }
0x200c   :  { %v8122_v21 = vpop.f32.mrf.mxu0 }
0x200d   :  { %v6935_v63 = vadd.f32 %v8122_v21, %v7367_v33 }
0x200e   :  { %v6929_v0 = vpop.f32.mrf.mxu0 }
0x200f   :  { %v6949_v51 = vadd.f32 %v6935_v63, %v9522_v43  ;;  %v6930_v31 = vadd.f32 %v7367_v33, %v6929_v0  ;;  %v7097_v63 = vrot.slane %v7096_v29, 1 }
0x2011   :  { %v6948_v61 = vadd.f32 %v6930_v31, %v9520_v12  ;;  %v6959_v19 = vsel %vm199_vm4, %v6949_v51, 0.0  ;;  %v7098_v31 = vadd.f32 %v7097_v63, %v7096_v29 }
0x2012   :  { %6960 = vadd.xlane.f32.xlu0 %v6959_v19 }
0x2013   :  { %v8125_v47 = vpop.f32.mrf.mxu0  ;;  %v6956_v46 = vsel %vm199_vm4, %v6948_v61, 0.0 }
0x2014   :  { %v6945_v44 = vadd.f32 %v8125_v47, %v7367_v33  ;;  %6957 = vadd.xlane.f32.xlu1 %v6956_v46  ;;  %v7114_v47 = vmax.f32 %v7098_v31, 1e-09 }
0x2015   :  { %v6939_v34 = vpop.f32.mrf.mxu0 }
0x2016   :  { %v6951_v38 = vadd.f32 %v6945_v44, %v9532_v30  ;;  %v6940_v52 = vadd.f32 %v7367_v33, %v6939_v34  ;;  %v7086_v30 = vrot.slane %v7085_v56, 4  ;;  %v7109_v33 = vrot.slane %v7108_v18, 2 }
0x2018   :  { %v9596_v22 = vadd.f32 %v6940_v52, %v9528_v16  ;;  %v6965_v43 = vsel %vm199_vm4, %v6951_v38, 0.0  ;;  %v7030_v16 = vld [vmem:[%s9679_s2 + $0x10] sm:$0xff]  ;;  %v7087_v55 = vadd.f32 %v7086_v30, %v7085_v56  ;;  %v7110_v0 = vadd.f32 %v7109_v33, %v7108_v18 }
0x2019   :  { %6966 = vadd.xlane.f32.xlu0 %v6965_v43  ;;  %v7099_v23 = vsel %vm7084_vm9, %v7030_v16, 0.0 }
0x201a   :  { %v6962_v12 = vsel %vm199_vm4, %v9596_v22, 0.0  ;;  %v7100_v39 = vrot.slane %v7099_v23, 4  ;;  %v7088_v26 = vrot.slane %v7087_v55, 2 }
0x201b   :  { %6963 = vadd.xlane.f32.xlu1 %v6962_v12 }
0x201c   :  { %v7101_v48 = vadd.f32 %v7100_v39, %v7099_v23  ;;  %v7089_v36 = vadd.f32 %v7088_v26, %v7087_v55  ;;  %v7370_v55 = vld [vmem:[%s9677_s17 + $0x1] ss:$0 sm:$0xff] }
0x201e   :  { %v7102_v2 = vrot.slane %v7101_v48, 2  ;;  %v7090_v4 = vrot.slane %v7089_v36, 1 }
0x2020   :  { %v7103_v27 = vadd.f32 %v7102_v2, %v7101_v48  ;;  %v7091_v5 = vadd.f32 %v7090_v4, %v7089_v36 }
0x2022   :  { %v7104_v8 = vrot.slane %v7103_v27, 1  ;;  %v7113_v37 = vmax.f32 %v7091_v5, 1e-09 }
0x2024   :  { %v7105_v25 = vadd.f32 %v7104_v8, %v7103_v27  ;;  %8322 = vrcp.f32 %v7113_v37 }
0x2026   :  { %v7115_v6 = vmax.f32 %v7105_v25, 1e-09 }
0x2028   :  { %8324 = vrcp.f32 %v7115_v6 }
0x2029   :  { %8326 = vrcp.f32 %v7114_v47 }
0x202c   :  { %7034 = vperm.xlu1 %8145, %v7028_v50  }
0x2031   :  { %v8323_v32 = vpop.eup %8322 }
0x2035   :  { %v8325_v14 = vpop.eup %8324 }
0x2036   :  { %v8327_v34 = vpop.eup %8326 }
0x209b   :  { %v6961_v53 = vpop.xlane.xlu0 %6960 }
0x209c   :  { %v6969_v57 = vmul.f32 0.03125, %v6961_v53 }
0x209d   :  { %v6958_v41 = vpop.xlane.xlu1 %6957 }
0x209e   :  { %v9609_v35 = vsub.f32 %v6949_v51, %v6969_v57  ;;  %v6968_v28 = vmul.f32 0.03125, %v6958_v41 }
0x20a0   :  { %v9611_v42 = vsub.f32 %v6948_v61, %v6968_v28  ;;  %v6977_v45 = vmul.f32 %v9609_v35, %v9609_v35  ;;  %v7111_v61 = vrot.slane %v7110_v0, 1  ;;  %v7371_v28 = vld [vmem:[%s9678_s18 + $0x1] ss:$0 sm:$0xff] }
0x20a2   :  { %v6967_v49 = vpop.xlane.xlu0 %6966  ;;  %v6983_v54 = vsel %vm199_vm4, %v6977_v45, 0.0  ;;  %v6976_v58 = vmul.f32 %v9611_v42, %v9611_v42  ;;  %v7112_v46 = vadd.f32 %v7111_v61, %v7110_v0 }
0x20a3   :  { %v6971_v60 = vmul.f32 0.03125, %v6967_v49  ;;  %6984 = vadd.xlane.f32.xlu0 %v6983_v54 }
0x20a4   :  { %v6980_v62 = vsel %vm199_vm4, %v6976_v58, 0.0  ;;  %v6964_v13 = vpop.xlane.xlu1 %6963  ;;  %v7116_v44 = vmax.f32 %v7112_v46, 1e-09 }
0x20a5   :  { %v9619_v3 = vsub.f32 %v6951_v38, %v6971_v60  ;;  %6981 = vadd.xlane.f32.xlu1 %v6980_v62  ;;  %v6970_v17 = vmul.f32 0.03125, %v6964_v13 }
0x20a6   :  { %8328 = vrcp.f32 %v7116_v44 }
0x20a7   :  { %v6979_v59 = vmul.f32 %v9619_v3, %v9619_v3  ;;  %v9633_v21 = vsub.f32 %v9596_v22, %v6970_v17 }
0x20a8   :  { %v7035_v52 = vpop.permute.xlu1 %7034 }
0x20a9   :  { %v6989_v1 = vsel %vm199_vm4, %v6979_v59, 0.0  ;;  %v6978_v51 = vmul.f32 %v9633_v21, %v9633_v21 }
0x20aa   :  { %6990 = vadd.xlane.f32.xlu0 %v6989_v1 }
0x20ab   :  { %v6986_v19 = vsel %vm199_vm4, %v6978_v51, 0.0 }
0x20b3   :  { %v8329_v38 = vpop.eup %8328 }
0x20b6   :  { %7044 = vperm.xlu1 %8145, %v7030_v16  }
0x20c0   :  { %7039 = vperm.xlu0 %8144, %v7029_v7  }
0x20c4   :  { %7123 = vperm.xlu0 %8144, %v8323_v32  }
0x20c8   :  { %7133 = vperm.xlu0 %8144, %v8325_v14  }
0x20da   :  { %6987 = vadd.xlane.f32.xlu1 %v6986_v19 }
0x20eb   :  { %7049 = vperm.xlu1 %8145, %v7031_v40  }
0x20ef   :  { %7128 = vperm.xlu1 %8145, %v8327_v34  }
0x20f3   :  { %7138 = vperm.xlu1 %8145, %v8329_v38  }
0x212c   :  { %v6985_v22 = vpop.xlane.xlu0 %6984 }
0x212d   :  { %v6993_v43 = vmul.f32 0.03125, %v6985_v22 }
0x212e   :  { %v6982_v12 = vpop.xlane.xlu1 %6981 }
0x212f   :  { %v6997_v50 = vadd.f32 1e-05, %v6993_v43  ;;  %v6992_v56 = vmul.f32 0.03125, %v6982_v12 }
0x2131   :  { %v6996_v16 = vadd.f32 1e-05, %v6992_v56  ;;  %8330 = vrsqrt.f32 %v6997_v50 }
0x2132   :  { %v7045_v37 = vpop.permute.xlu1 %7044 }
0x2133   :  { %8332 = vrsqrt.f32 %v6996_v16  ;;  %v6991_v41 = vpop.xlane.xlu0 %6990 }
0x2134   :  { %v6995_v48 = vmul.f32 0.03125, %v6991_v41 }
0x2136   :  { %v6999_v58 = vadd.f32 1e-05, %v6995_v48 }
0x2138   :  { %8334 = vrsqrt.f32 %v6999_v58 }
0x213b   :  { %v7040_v60 = vpop.permute.xlu0 %7039 }
0x213e   :  { %v8331_v30 = vpop.eup %8330 }
0x213f   :  { %v7005_v57 = vmul.f32 %v8331_v30, %v9609_v35  ;;  %v7124_v13 = vpop.permute.xlu0 %7123 }
0x2140   :  { %v8333_v23 = vpop.eup %8332 }
0x2141   :  { %v7004_v53 = vmul.f32 %v8333_v23, %v9611_v42  ;;  %v7015_v26 = vmul.f32 %v7370_v55, %v7005_v57 }
0x2143   :  { %v7014_v39 = vmul.f32 %v7370_v55, %v7004_v53  ;;  %v7025_v49 = vadd.f32 %v7371_v28, %v7015_v26  ;;  %v7134_v26 = vpop.permute.xlu0 %7133 }
0x2145   :  { %v7024_v45 = vadd.f32 %v7371_v28, %v7014_v39  ;;  %v7053_v42 = vmul.f32 %v7040_v60, %v7025_v49  ;;  %v8335_v1 = vpop.eup %8334 }
0x2146   :  { %v7007_v25 = vmul.f32 %v8335_v1, %v9619_v3 }
0x2147   :  { %v7052_v54 = vmul.f32 %v7035_v52, %v7024_v45  ;;  %v7063_v35 = vsel %vm199_vm4, %v7053_v42, 0.0 }
0x2148   :  { %v7064_v2 = vrot.slane %v7063_v35, 4  ;;  %v7017_v40 = vmul.f32 %v7370_v55, %v7007_v25 }
0x2149   :  { %v7056_v36 = vsel %vm199_vm4, %v7052_v54, 0.0 }
0x214a   :  { %v7057_v62 = vrot.slane %v7056_v36, 4  ;;  %v7065_v4 = vadd.f32 %v7064_v2, %v7063_v35  ;;  %v7027_v24 = vadd.f32 %v7371_v28, %v7017_v40 }
0x214c   :  { %v7058_v59 = vadd.f32 %v7057_v62, %v7056_v36  ;;  %v7066_v5 = vrot.slane %v7065_v4, 2 }
0x214e   :  { %v7059_v27 = vrot.slane %v7058_v59, 2  ;;  %v7067_v7 = vadd.f32 %v7066_v5, %v7065_v4 }
0x2150   :  { %v7060_v8 = vadd.f32 %v7059_v27, %v7058_v59  ;;  %v7068_v14 = vrot.slane %v7067_v7, 1 }
0x2152   :  { %v7061_v6 = vrot.slane %v7060_v8, 1  ;;  %v7069_v17 = vadd.f32 %v7068_v14, %v7067_v7 }
0x2154   :  { %v7062_v10 = vadd.f32 %v7061_v6, %v7060_v8 }
0x2156   :  { %v7141_v15 = vmul.f32 %v7124_v13, %v7062_v10 }
0x2158   :  { %v7156_v63 = vmul.f32 %v7141_v15, %v7141_v15 }
0x2163   :  { %v6988_v9 = vpop.xlane.xlu1 %6987 }
0x2164   :  { %v6994_v32 = vmul.f32 0.03125, %v6988_v9 }
0x2166   :  { %v6998_v11 = vadd.f32 1e-05, %v6994_v32 }
0x2167   :  { %v7050_v20 = vpop.permute.xlu1 %7049 }
0x2168   :  { %8336 = vrsqrt.f32 %v6998_v11  ;;  %v7055_v18 = vmul.f32 %v7050_v20, %v7027_v24 }
0x216a   :  { %v7077_v3 = vsel %vm199_vm4, %v7055_v18, 0.0 }
0x216b   :  { %v7129_v29 = vpop.permute.xlu1 %7128  ;;  %v7078_v31 = vrot.slane %v7077_v3, 4 }
0x216c   :  { %v7142_v33 = vmul.f32 %v7129_v29, %v7069_v17 }
0x216d   :  { %v7079_v47 = vadd.f32 %v7078_v31, %v7077_v3 }
0x216e   :  { %v7157_v0 = vmul.f32 %v7142_v33, %v7142_v33 }
0x216f   :  { %v7080_v34 = vrot.slane %v7079_v47, 2  ;;  %v7139_v57 = vpop.permute.xlu1 %7138 }
0x2170   :  { %v7160_v51 = vsel %vm7149_vm10, %v7157_v0, %v7156_v63 }
0x2171   :  { %v7162_v61 = vsel %vm7152_vm11, %v7160_v51, 0.0  ;;  %v7081_v22 = vadd.f32 %v7080_v34, %v7079_v47 }
0x2172   :  { %7163 = vadd.xlane.f32.xlu0 %v7162_v61 }
0x2173   :  { %v7082_v50 = vrot.slane %v7081_v22, 1 }
0x2175   :  { %v8337_v19 = vpop.eup %8336  ;;  %v7083_v30 = vadd.f32 %v7082_v50, %v7081_v22 }
0x2176   :  { %v7006_v46 = vmul.f32 %v8337_v19, %v9633_v21 }
0x2177   :  { %v7144_v39 = vmul.f32 %v7139_v57, %v7083_v30 }
0x2178   :  { %v7016_v44 = vmul.f32 %v7370_v55, %v7006_v46 }
0x2179   :  { %v7146_v21 = vmul.f32 %v7144_v39, %v7142_v33  ;;  %v7166_v55 = vmul.f32 %v7144_v39, %v7144_v39 }
0x217a   :  { %v7026_v38 = vadd.f32 %v7371_v28, %v7016_v44 }
0x217c   :  { %v7054_v52 = vmul.f32 %v7045_v37, %v7026_v38 }
0x217e   :  { %v7070_v43 = vsel %vm199_vm4, %v7054_v52, 0.0 }
0x217f   :  { %v7071_v12 = vrot.slane %v7070_v43, 4 }
0x2181   :  { %v7072_v56 = vadd.f32 %v7071_v12, %v7070_v43 }
0x2183   :  { %v7073_v16 = vrot.slane %v7072_v56, 2 }
0x2185   :  { %v7074_v23 = vadd.f32 %v7073_v16, %v7072_v56 }
0x2187   :  { %v7075_v53 = vrot.slane %v7074_v23, 1 }
0x2189   :  { %v7076_v41 = vadd.f32 %v7075_v53, %v7074_v23 }
0x218b   :  { %v7143_v45 = vmul.f32 %v7134_v26, %v7076_v41 }
0x218d   :  { %v7165_v48 = vmul.f32 %v7143_v45, %v7143_v45  ;;  %v7145_v28 = vmul.f32 %v7143_v45, %v7141_v15 }
0x218f   :  { %v7169_v49 = vsel %vm7149_vm10, %v7166_v55, %v7165_v48  ;;  %v7150_v54 = vsel %vm7149_vm10, %v7146_v21, %v7145_v28 }
0x2190   :  { %v7171_v58 = vsel %vm7152_vm11, %v7169_v49, 0.0  ;;  %v7153_v60 = vsel %vm7152_vm11, %v7150_v54, 0.0 }
0x2191   :  { %7172 = vadd.xlane.f32.xlu1 %v7171_v58  ;;  %7154 = vadd.xlane.f32.xlu0 %v7153_v60 }
0x21fb   :  { %v7164_v42 = vpop.xlane.xlu0 %7163 }
0x221a   :  { %v7173_v36 = vpop.xlane.xlu1 %7172  ;;  %v7155_v8 = vpop.xlane.xlu0 %7154 }
0x221b   :  { %v7174_v62 = vmul.f32 %v7173_v36, %v7164_v42 }
0x221d   :  { %v7175_v35 = vmax.f32 %v7174_v62, 1e-08 }
0x221f   :  { %8338 = vrsqrt.f32 %v7175_v35  ;;  %vm7178_vm12 = vcmp.eq.f32.partialorder %v7175_v35, inf  ;;  %v7181_v4 = vand.u32 2147483648, %v7175_v35  ;;  %vm7180_vm13 = vcmp.eq.f32.partialorder %v7175_v35, 0.0 }
0x222c   :  { %v8339_v2 = vpop.eup %8338 }
0x222d   :  { %v7177_v59 = vmul.f32 %v8339_v2, %v7175_v35 }
0x222f   :  { %v7179_v27 = vsel %vm7178_vm12, %v7175_v35, %v7177_v59 }
0x2230   :  { %v7182_v1 = vsel %vm7180_vm13, %v7181_v4, %v7179_v27 }
0x2231   :  { %8340 = vrcp.f32 %v7182_v1 }
0x223e   :  { %v8341_v5 = vpop.eup %8340 }
0x223f   :  { %v7184_v37 = vmul.f32 %v8341_v5, %v7155_v8 }
0x2241   :  { %7185 = vst [vmem:[%s9680_s19] sm:$0x3] %v7184_v37 }

</bundles_post_ra>
